<compile_context>
chip_gen: v5e
topology: v5e:2x2
jax: 0.10.0
libtpu: 0.0.40
codegen_flags: <defaults>
</compile_context>

<pallas_src>
import jax
import jax.numpy as jnp
from jax import lax
from jax.experimental import pallas as pl
from jax.experimental.pallas import tpu as pltpu

# Scaled-down hyperparameters, structurally identical to the PyTorch defaults
# (channel_in=128, channel_out=3, basis_num=90, kernel_size=15).
CHANNEL_IN = 128
CHANNEL_OUT = 3
BASIS_NUM = 16
KSIZE = 7                              # basis kernel size (ties spatial extent to reshape)
N = 2
H = W = KSIZE + 1                      # 2x2 VALID conv maps (K+1,K+1) -> (K,K)
HO = WO = KSIZE
COUT3 = CHANNEL_OUT * 2 * BASIS_NUM    # = 96
NEG_SLOPE = 0.1


def _leaky(v):
    return jnp.where(v >= 0.0, v, NEG_SLOPE * v)


def _tail_kernel(x_ref, w1_ref, b1_ref, w2_ref, b2_ref, w3_ref, b3_ref,
                 out_ref, y1p, y2p):
    """Whole batch in one grid step, fully resident in VMEM.

    x_ref  : (N, H, W, Cin)        f32 NHWC input
    w*_ref : (kh, kw, Cin, Cout)   bf16 HWIO conv weights (w3 lane-padded to 128 out)
    b*_ref : (1, 1, 1, Cout)       f32 biases (b3 lane-padded)
    y1p/y2p: (N, HO+2, WP, Cin)    f32 zero-padded intermediate maps, WP 8-aligned
    out_ref: (N, HO, WO, 128)      f32 conv-stack output (lane-dense, pre-reshape)
    """
    n, h, w, cin = x_ref.shape
    _, ho, wo, cpad = out_ref.shape
    _, hp, wp, _ = y1p.shape

    # Zero padded scratch once; interiors are fully overwritten below, only the
    # 1-pixel border (and unread alignment columns) must stay zero.
    y1p[...] = jnp.zeros(y1p.shape, jnp.float32)
    y2p[...] = jnp.zeros(y2p.shape, jnp.float32)

    # ---- conv1: 2x2, VALID, + LeakyReLU ------------------------------------
    # One (N*H*W, Cin) x (Cin, Cin) bf16 matmul per tap; accumulate shifted windows.
    x_flat = x_ref[...].reshape(n * h * w, cin).astype(jnp.bfloat16)
    acc = jnp.zeros((n, ho, wo, cin), jnp.float32)
    for kh in range(2):
        for kw in range(2):
            z = jnp.dot(x_flat, w1_ref[kh, kw],
                        preferred_element_type=jnp.float32).reshape(n, h, w, cin)
            acc = acc + z[:, kh:kh + ho, kw:kw + wo, :]
    y1p[:, 1:1 + ho, 1:1 + wo, :] = _leaky(acc + b1_ref[...])

    # ---- conv2: 3x3, SAME (pad 1), + LeakyReLU ------------------------------
    y1_flat = y1p[...].reshape(n * hp * wp, cin).astype(jnp.bfloat16)
    acc = jnp.zeros((n, ho, wo, cin), jnp.float32)
    for kh in range(3):
        for kw in range(3):
            z = jnp.dot(y1_flat, w2_ref[kh, kw],
                        preferred_element_type=jnp.float32).reshape(n, hp, wp, cin)
            acc = acc + z[:, kh:kh + ho, kw:kw + wo, :]
    y2p[:, 1:1 + ho, 1:1 + wo, :] = _leaky(acc + b2_ref[...])

    # ---- conv3: 3x3, SAME (pad 1), + LeakyReLU, lane-padded out channels ----
    y2_flat = y2p[...].reshape(n * hp * wp, cin).astype(jnp.bfloat16)
    acc = jnp.zeros((n, ho, wo, cpad), jnp.float32)
    for kh in range(3):
        for kw in range(3):
            z = jnp.dot(y2_flat, w3_ref[kh, kw],
                        preferred_element_type=jnp.float32).reshape(n, hp, wp, cpad)
            acc = acc + z[:, kh:kh + ho, kw:kw + wo, :]
    out_ref[...] = _leaky(acc + b3_ref[...])


def basis_decoder_tail(x_nchw, params):
    """JAX wrapper matching Basis_Decoder_Tail.forward (NCHW input like PyTorch)."""
    w1, b1, w2, b2, w3, b3 = params
    x = jnp.transpose(x_nchw, (0, 2, 3, 1)).astype(jnp.float32)   # NCHW -> NHWC
    n, h, w, cin = x.shape
    ho, wo = h - 1, w - 1
    cout3 = w3.shape[-1]
    cpad = ((cout3 + 127) // 128) * 128          # lane-dense conv3 output width
    hp = ho + 2
    wp = ((wo + 2 + 7) // 8) * 8                 # 8-aligned padded map width

    # bf16 matmul operands (accumulation and VPU epilogue remain f32 in-kernel).
    w1b = w1.astype(jnp.bfloat16)
    w2b = w2.astype(jnp.bfloat16)
    w3b = jnp.pad(w3, ((0, 0), (0, 0), (0, 0), (0, cpad - cout3))).astype(jnp.bfloat16)
    b1r = b1.reshape(1, 1, 1, -1).astype(jnp.float32)
    b2r = b2.reshape(1, 1, 1, -1).astype(jnp.float32)
    b3r = jnp.pad(b3, ((0, 0), (0, cpad - cout3))).reshape(1, 1, 1, -1).astype(jnp.float32)

    conv_out = pl.pallas_call(
        _tail_kernel,
        out_shape=jax.ShapeDtypeStruct((n, ho, wo, cpad), jnp.float32),
        grid_spec=pltpu.PrefetchScalarGridSpec(
            num_scalar_prefetch=0,
            grid=(1,),                                  # batch folded into matmul rows
            in_specs=[
                pl.BlockSpec((n, h, w, cin), lambda i: (0, 0, 0, 0)),
                pl.BlockSpec(w1b.shape, lambda i: (0, 0, 0, 0)),
                pl.BlockSpec(b1r.shape, lambda i: (0, 0, 0, 0)),
                pl.BlockSpec(w2b.shape, lambda i: (0, 0, 0, 0)),
                pl.BlockSpec(b2r.shape, lambda i: (0, 0, 0, 0)),
                pl.BlockSpec(w3b.shape, lambda i: (0, 0, 0, 0)),
                pl.BlockSpec(b3r.shape, lambda i: (0, 0, 0, 0)),
            ],
            out_specs=pl.BlockSpec((n, ho, wo, cpad), lambda i: (0, 0, 0, 0)),
            scratch_shapes=[
                pltpu.VMEM((n, hp, wp, cin), jnp.float32),   # padded conv1 output
                pltpu.VMEM((n, hp, wp, cin), jnp.float32),   # padded conv2 output
            ],
        ),
        compiler_params=pltpu.CompilerParams(dimension_semantics=("arbitrary",)),
    )(x, w1b, b1r, w2b, b2r, w3b, b3r)

    # PyTorch tail glue: permute(0,2,3,1) already done (NHWC); drop lane padding,
    # then reshape + permute in plain JAX.
    out = conv_out[..., :cout3].reshape(-1, KSIZE * KSIZE * CHANNEL_OUT * 2, BASIS_NUM)
    return jnp.transpose(out, (0, 2, 1))


def ref_forward(x_nchw, params):
    """Pure-JAX reference (XLA convs) with identical bf16 operand quantization."""
    w1, b1, w2, b2, w3, b3 = params
    x = jnp.transpose(x_nchw, (0, 2, 3, 1)).astype(jnp.float32)
    dn = ('NHWC', 'HWIO', 'NHWC')

    def conv(v, wt, b, padding):
        y = lax.conv_general_dilated(
            v.astype(jnp.bfloat16), wt.astype(jnp.bfloat16), (1, 1), padding,
            dimension_numbers=dn, preferred_element_type=jnp.float32)
        return _leaky(y + b.reshape(1, 1, 1, -1).astype(jnp.float32))

    y = conv(x, w1, b1, 'VALID')
    y = conv(y, w2, b2, [(1, 1), (1, 1)])
    y = conv(y, w3, b3, [(1, 1), (1, 1)])
    y = y.reshape(-1, KSIZE * KSIZE * CHANNEL_OUT * 2, BASIS_NUM)
    return jnp.transpose(y, (0, 2, 1))


if __name__ == "__main__":
    key = jax.random.PRNGKey(0)
    ks = jax.random.split(key, 7)
    # Deterministic synthetic parameters (HWIO conv weights), no checkpoint load.
    x = jax.random.normal(ks[0], (N, CHANNEL_IN, H, W), jnp.float32)
    w1 = jax.random.normal(ks[1], (2, 2, CHANNEL_IN, CHANNEL_IN), jnp.float32) * 0.05
    b1 = jax.random.normal(ks[2], (1, CHANNEL_IN), jnp.float32) * 0.05
    w2 = jax.random.normal(ks[3], (3, 3, CHANNEL_IN, CHANNEL_IN), jnp.float32) * 0.05
    b2 = jax.random.normal(ks[4], (1, CHANNEL_IN), jnp.float32) * 0.05
    w3 = jax.random.normal(ks[5], (3, 3, CHANNEL_IN, COUT3), jnp.float32) * 0.05
    b3 = jax.random.normal(ks[6], (1, COUT3), jnp.float32) * 0.05
    params = (w1, b1, w2, b2, w3, b3)

    out = jax.block_until_ready(basis_decoder_tail(x, params))
    assert out.shape == (N, BASIS_NUM, KSIZE * KSIZE * CHANNEL_OUT * 2), out.shape

    ref = jax.block_until_ready(ref_forward(x, params))
    max_err = float(jnp.max(jnp.abs(out - ref)))
    scale = float(jnp.max(jnp.abs(ref))) + 1e-6
    if max_err / scale < 2e-3:
        print("KERNEL_OK")
    else:
        print(f"MISMATCH max_err={max_err} scale={scale}")
</pallas_src>

<mosaic_0001>
module attributes {stable_mosaic.version = 11 : i64} {
  func.func @_tail_kernel(%arg0: i32, %arg1: memref<2x8x8x128xf32, #tpu.memory_space<vmem>>, %arg2: memref<2x2x128x128xbf16, #tpu.memory_space<vmem>>, %arg3: memref<1x1x1x128xf32, #tpu.memory_space<vmem>>, %arg4: memref<3x3x128x128xbf16, #tpu.memory_space<vmem>>, %arg5: memref<1x1x1x128xf32, #tpu.memory_space<vmem>>, %arg6: memref<3x3x128x128xbf16, #tpu.memory_space<vmem>>, %arg7: memref<1x1x1x128xf32, #tpu.memory_space<vmem>>, %arg8: memref<2x7x7x128xf32, #tpu.memory_space<vmem>>, %arg9: memref<2x9x16x128xf32, #tpu.memory_space<vmem>>, %arg10: memref<2x9x16x128xf32, #tpu.memory_space<vmem>>) attributes {dimension_semantics = [#tpu.dimension_semantics<arbitrary>], iteration_bounds = array<i64: 1>, scalar_prefetch = 0 : i64, scratch_operands = 2 : i64, tpu.core_type = #tpu.core_type<tc>, window_params = [{pipeline_mode = #tpu.pipeline_mode<synchronous>, transform_indices = @transform_0, window_bounds = array<i64: 2, 8, 8, 128>}, {pipeline_mode = #tpu.pipeline_mode<synchronous>, transform_indices = @transform_1, window_bounds = array<i64: 2, 2, 128, 128>}, {pipeline_mode = #tpu.pipeline_mode<synchronous>, transform_indices = @transform_2, window_bounds = array<i64: 1, 1, 1, 128>}, {pipeline_mode = #tpu.pipeline_mode<synchronous>, transform_indices = @transform_3, window_bounds = array<i64: 3, 3, 128, 128>}, {pipeline_mode = #tpu.pipeline_mode<synchronous>, transform_indices = @transform_4, window_bounds = array<i64: 1, 1, 1, 128>}, {pipeline_mode = #tpu.pipeline_mode<synchronous>, transform_indices = @transform_5, window_bounds = array<i64: 3, 3, 128, 128>}, {pipeline_mode = #tpu.pipeline_mode<synchronous>, transform_indices = @transform_6, window_bounds = array<i64: 1, 1, 1, 128>}, {pipeline_mode = #tpu.pipeline_mode<synchronous>, transform_indices = @transform_7, window_bounds = array<i64: 2, 7, 7, 128>}]} {
    %cst = arith.constant 0.000000e+00 : f32
    %0 = vector.broadcast %cst : f32 to vector<2x9x16x128xf32>
    %c0 = arith.constant 0 : index
    %c0_0 = arith.constant 0 : index
    %c0_1 = arith.constant 0 : index
    %c0_2 = arith.constant 0 : index
    %1 = vector.load %arg9[%c0, %c0_0, %c0_1, %c0_2] : memref<2x9x16x128xf32, #tpu.memory_space<vmem>>, vector<2x9x16x128xf32>
    tpu.vector_store %arg9[%c0, %c0_0, %c0_1, %c0_2], %0 {strides = array<i32>} : memref<2x9x16x128xf32, #tpu.memory_space<vmem>>, vector<2x9x16x128xf32>,
    %cst_3 = arith.constant 0.000000e+00 : f32
    %2 = vector.broadcast %cst_3 : f32 to vector<2x9x16x128xf32>
    %c0_4 = arith.constant 0 : index
    %c0_5 = arith.constant 0 : index
    %c0_6 = arith.constant 0 : index
    %c0_7 = arith.constant 0 : index
    %3 = vector.load %arg10[%c0_4, %c0_5, %c0_6, %c0_7] : memref<2x9x16x128xf32, #tpu.memory_space<vmem>>, vector<2x9x16x128xf32>
    tpu.vector_store %arg10[%c0_4, %c0_5, %c0_6, %c0_7], %2 {strides = array<i32>} : memref<2x9x16x128xf32, #tpu.memory_space<vmem>>, vector<2x9x16x128xf32>,
    %c0_8 = arith.constant 0 : index
    %c0_9 = arith.constant 0 : index
    %c0_10 = arith.constant 0 : index
    %c0_11 = arith.constant 0 : index
    %4 = vector.load %arg1[%c0_8, %c0_9, %c0_10, %c0_11] : memref<2x8x8x128xf32, #tpu.memory_space<vmem>>, vector<2x8x8x128xf32>
    %5 = vector.shape_cast %4 : vector<2x8x8x128xf32> to vector<128x128xf32>
    %6 = arith.truncf %5 : vector<128x128xf32> to vector<128x128xbf16>
    %cst_12 = arith.constant 0.000000e+00 : f32
    %7 = vector.broadcast %cst_12 : f32 to vector<2x7x7x128xf32>
    %c0_13 = arith.constant 0 : index
    %c0_14 = arith.constant 0 : index
    %c0_15 = arith.constant 0 : index
    %c0_16 = arith.constant 0 : index
    %8 = vector.load %arg2[%c0_13, %c0_14, %c0_15, %c0_16] : memref<2x2x128x128xbf16, #tpu.memory_space<vmem>>, vector<1x1x128x128xbf16>
    %9 = vector.shape_cast %8 : vector<1x1x128x128xbf16> to vector<128x128xbf16>
    %cst_17 = arith.constant dense<0.000000e+00> : vector<128x128xf32>
    %10 = tpu.matmul %6, %9, %cst_17 {dimension_numbers = #tpu.dot_dimension_numbers<[1], [0], [0], [1], [0, 0, 1, 1], [], []>} : vector<128x128xbf16>, vector<128x128xbf16>, vector<128x128xf32> -> vector<128x128xf32>
    %11 = vector.shape_cast %10 : vector<128x128xf32> to vector<2x8x8x128xf32>
    %12 = vector.extract_strided_slice %11 {offsets = [0, 0, 0, 0], sizes = [2, 7, 7, 128], strides = [1, 1, 1, 1]} : vector<2x8x8x128xf32> to vector<2x7x7x128xf32>
    %13 = arith.addf %7, %12 : vector<2x7x7x128xf32>
    %c0_18 = arith.constant 0 : index
    %c1 = arith.constant 1 : index
    %c0_19 = arith.constant 0 : index
    %c0_20 = arith.constant 0 : index
    %14 = vector.load %arg2[%c0_18, %c1, %c0_19, %c0_20] : memref<2x2x128x128xbf16, #tpu.memory_space<vmem>>, vector<1x1x128x128xbf16>
    %15 = vector.shape_cast %14 : vector<1x1x128x128xbf16> to vector<128x128xbf16>
    %cst_21 = arith.constant dense<0.000000e+00> : vector<128x128xf32>
    %16 = tpu.matmul %6, %15, %cst_21 {dimension_numbers = #tpu.dot_dimension_numbers<[1], [0], [0], [1], [0, 0, 1, 1], [], []>} : vector<128x128xbf16>, vector<128x128xbf16>, vector<128x128xf32> -> vector<128x128xf32>
    %17 = vector.shape_cast %16 : vector<128x128xf32> to vector<2x8x8x128xf32>
    %18 = vector.extract_strided_slice %17 {offsets = [0, 0, 1, 0], sizes = [2, 7, 7, 128], strides = [1, 1, 1, 1]} : vector<2x8x8x128xf32> to vector<2x7x7x128xf32>
    %19 = arith.addf %13, %18 : vector<2x7x7x128xf32>
    %c1_22 = arith.constant 1 : index
    %c0_23 = arith.constant 0 : index
    %c0_24 = arith.constant 0 : index
    %c0_25 = arith.constant 0 : index
    %20 = vector.load %arg2[%c1_22, %c0_23, %c0_24, %c0_25] : memref<2x2x128x128xbf16, #tpu.memory_space<vmem>>, vector<1x1x128x128xbf16>
    %21 = vector.shape_cast %20 : vector<1x1x128x128xbf16> to vector<128x128xbf16>
    %cst_26 = arith.constant dense<0.000000e+00> : vector<128x128xf32>
    %22 = tpu.matmul %6, %21, %cst_26 {dimension_numbers = #tpu.dot_dimension_numbers<[1], [0], [0], [1], [0, 0, 1, 1], [], []>} : vector<128x128xbf16>, vector<128x128xbf16>, vector<128x128xf32> -> vector<128x128xf32>
    %23 = vector.shape_cast %22 : vector<128x128xf32> to vector<2x8x8x128xf32>
    %24 = vector.extract_strided_slice %23 {offsets = [0, 1, 0, 0], sizes = [2, 7, 7, 128], strides = [1, 1, 1, 1]} : vector<2x8x8x128xf32> to vector<2x7x7x128xf32>
    %25 = arith.addf %19, %24 : vector<2x7x7x128xf32>
    %c1_27 = arith.constant 1 : index
    %c1_28 = arith.constant 1 : index
    %c0_29 = arith.constant 0 : index
    %c0_30 = arith.constant 0 : index
    %26 = vector.load %arg2[%c1_27, %c1_28, %c0_29, %c0_30] : memref<2x2x128x128xbf16, #tpu.memory_space<vmem>>, vector<1x1x128x128xbf16>
    %27 = vector.shape_cast %26 : vector<1x1x128x128xbf16> to vector<128x128xbf16>
    %cst_31 = arith.constant dense<0.000000e+00> : vector<128x128xf32>
    %28 = tpu.matmul %6, %27, %cst_31 {dimension_numbers = #tpu.dot_dimension_numbers<[1], [0], [0], [1], [0, 0, 1, 1], [], []>} : vector<128x128xbf16>, vector<128x128xbf16>, vector<128x128xf32> -> vector<128x128xf32>
    %29 = vector.shape_cast %28 : vector<128x128xf32> to vector<2x8x8x128xf32>
    %30 = vector.extract_strided_slice %29 {offsets = [0, 1, 1, 0], sizes = [2, 7, 7, 128], strides = [1, 1, 1, 1]} : vector<2x8x8x128xf32> to vector<2x7x7x128xf32>
    %31 = arith.addf %25, %30 : vector<2x7x7x128xf32>
    %c0_32 = arith.constant 0 : index
    %c0_33 = arith.constant 0 : index
    %c0_34 = arith.constant 0 : index
    %c0_35 = arith.constant 0 : index
    %32 = vector.load %arg3[%c0_32, %c0_33, %c0_34, %c0_35] : memref<1x1x1x128xf32, #tpu.memory_space<vmem>>, vector<1x1x1x128xf32>
    %33 = vector.broadcast %32 : vector<1x1x1x128xf32> to vector<2x7x7x128xf32>
    %34 = arith.addf %31, %33 : vector<2x7x7x128xf32>
    %cst_36 = arith.constant 0.000000e+00 : f32
    %35 = vector.broadcast %cst_36 : f32 to vector<2x7x7x128xf32>
    %36 = arith.cmpf oge, %34, %35 : vector<2x7x7x128xf32>
    %cst_37 = arith.constant 1.000000e-01 : f32
    %37 = vector.broadcast %cst_37 : f32 to vector<2x7x7x128xf32>
    %38 = arith.mulf %37, %34 : vector<2x7x7x128xf32>
    %39 = arith.select %36, %34, %38 : vector<2x7x7x128xi1>, vector<2x7x7x128xf32>
    %c0_38 = arith.constant 0 : index
    %c1_39 = arith.constant 1 : index
    %c1_40 = arith.constant 1 : index
    %c0_41 = arith.constant 0 : index
    %40 = vector.load %arg9[%c0_38, %c1_39, %c1_40, %c0_41] : memref<2x9x16x128xf32, #tpu.memory_space<vmem>>, vector<2x7x7x128xf32>
    tpu.vector_store %arg9[%c0_38, %c1_39, %c1_40, %c0_41], %39 {strides = array<i32>} : memref<2x9x16x128xf32, #tpu.memory_space<vmem>>, vector<2x7x7x128xf32>,
    %c0_42 = arith.constant 0 : index
    %c0_43 = arith.constant 0 : index
    %c0_44 = arith.constant 0 : index
    %c0_45 = arith.constant 0 : index
    %41 = vector.load %arg9[%c0_42, %c0_43, %c0_44, %c0_45] : memref<2x9x16x128xf32, #tpu.memory_space<vmem>>, vector<2x9x16x128xf32>
    %42 = vector.shape_cast %41 : vector<2x9x16x128xf32> to vector<288x128xf32>
    %43 = arith.truncf %42 : vector<288x128xf32> to vector<288x128xbf16>
    %cst_46 = arith.constant 0.000000e+00 : f32
    %44 = vector.broadcast %cst_46 : f32 to vector<2x7x7x128xf32>
    %c0_47 = arith.constant 0 : index
    %c0_48 = arith.constant 0 : index
    %c0_49 = arith.constant 0 : index
    %c0_50 = arith.constant 0 : index
    %45 = vector.load %arg4[%c0_47, %c0_48, %c0_49, %c0_50] : memref<3x3x128x128xbf16, #tpu.memory_space<vmem>>, vector<1x1x128x128xbf16>
    %46 = vector.shape_cast %45 : vector<1x1x128x128xbf16> to vector<128x128xbf16>
    %cst_51 = arith.constant dense<0.000000e+00> : vector<288x128xf32>
    %47 = tpu.matmul %43, %46, %cst_51 {dimension_numbers = #tpu.dot_dimension_numbers<[1], [0], [0], [1], [0, 0, 1, 1], [], []>} : vector<288x128xbf16>, vector<128x128xbf16>, vector<288x128xf32> -> vector<288x128xf32>
    %48 = vector.shape_cast %47 : vector<288x128xf32> to vector<2x9x16x128xf32>
    %49 = vector.extract_strided_slice %48 {offsets = [0, 0, 0, 0], sizes = [2, 7, 7, 128], strides = [1, 1, 1, 1]} : vector<2x9x16x128xf32> to vector<2x7x7x128xf32>
    %50 = arith.addf %44, %49 : vector<2x7x7x128xf32>
    %c0_52 = arith.constant 0 : index
    %c1_53 = arith.constant 1 : index
    %c0_54 = arith.constant 0 : index
    %c0_55 = arith.constant 0 : index
    %51 = vector.load %arg4[%c0_52, %c1_53, %c0_54, %c0_55] : memref<3x3x128x128xbf16, #tpu.memory_space<vmem>>, vector<1x1x128x128xbf16>
    %52 = vector.shape_cast %51 : vector<1x1x128x128xbf16> to vector<128x128xbf16>
    %cst_56 = arith.constant dense<0.000000e+00> : vector<288x128xf32>
    %53 = tpu.matmul %43, %52, %cst_56 {dimension_numbers = #tpu.dot_dimension_numbers<[1], [0], [0], [1], [0, 0, 1, 1], [], []>} : vector<288x128xbf16>, vector<128x128xbf16>, vector<288x128xf32> -> vector<288x128xf32>
    %54 = vector.shape_cast %53 : vector<288x128xf32> to vector<2x9x16x128xf32>
    %55 = vector.extract_strided_slice %54 {offsets = [0, 0, 1, 0], sizes = [2, 7, 7, 128], strides = [1, 1, 1, 1]} : vector<2x9x16x128xf32> to vector<2x7x7x128xf32>
    %56 = arith.addf %50, %55 : vector<2x7x7x128xf32>
    %c0_57 = arith.constant 0 : index
    %c2 = arith.constant 2 : index
    %c0_58 = arith.constant 0 : index
    %c0_59 = arith.constant 0 : index
    %57 = vector.load %arg4[%c0_57, %c2, %c0_58, %c0_59] : memref<3x3x128x128xbf16, #tpu.memory_space<vmem>>, vector<1x1x128x128xbf16>
    %58 = vector.shape_cast %57 : vector<1x1x128x128xbf16> to vector<128x128xbf16>
    %cst_60 = arith.constant dense<0.000000e+00> : vector<288x128xf32>
    %59 = tpu.matmul %43, %58, %cst_60 {dimension_numbers = #tpu.dot_dimension_numbers<[1], [0], [0], [1], [0, 0, 1, 1], [], []>} : vector<288x128xbf16>, vector<128x128xbf16>, vector<288x128xf32> -> vector<288x128xf32>
    %60 = vector.shape_cast %59 : vector<288x128xf32> to vector<2x9x16x128xf32>
    %61 = vector.extract_strided_slice %60 {offsets = [0, 0, 2, 0], sizes = [2, 7, 7, 128], strides = [1, 1, 1, 1]} : vector<2x9x16x128xf32> to vector<2x7x7x128xf32>
    %62 = arith.addf %56, %61 : vector<2x7x7x128xf32>
    %c1_61 = arith.constant 1 : index
    %c0_62 = arith.constant 0 : index
    %c0_63 = arith.constant 0 : index
    %c0_64 = arith.constant 0 : index
    %63 = vector.load %arg4[%c1_61, %c0_62, %c0_63, %c0_64] : memref<3x3x128x128xbf16, #tpu.memory_space<vmem>>, vector<1x1x128x128xbf16>
    %64 = vector.shape_cast %63 : vector<1x1x128x128xbf16> to vector<128x128xbf16>
    %cst_65 = arith.constant dense<0.000000e+00> : vector<288x128xf32>
    %65 = tpu.matmul %43, %64, %cst_65 {dimension_numbers = #tpu.dot_dimension_numbers<[1], [0], [0], [1], [0, 0, 1, 1], [], []>} : vector<288x128xbf16>, vector<128x128xbf16>, vector<288x128xf32> -> vector<288x128xf32>
    %66 = vector.shape_cast %65 : vector<288x128xf32> to vector<2x9x16x128xf32>
    %67 = vector.extract_strided_slice %66 {offsets = [0, 1, 0, 0], sizes = [2, 7, 7, 128], strides = [1, 1, 1, 1]} : vector<2x9x16x128xf32> to vector<2x7x7x128xf32>
    %68 = arith.addf %62, %67 : vector<2x7x7x128xf32>
    %c1_66 = arith.constant 1 : index
    %c1_67 = arith.constant 1 : index
    %c0_68 = arith.constant 0 : index
    %c0_69 = arith.constant 0 : index
    %69 = vector.load %arg4[%c1_66, %c1_67, %c0_68, %c0_69] : memref<3x3x128x128xbf16, #tpu.memory_space<vmem>>, vector<1x1x128x128xbf16>
    %70 = vector.shape_cast %69 : vector<1x1x128x128xbf16> to vector<128x128xbf16>
    %cst_70 = arith.constant dense<0.000000e+00> : vector<288x128xf32>
    %71 = tpu.matmul %43, %70, %cst_70 {dimension_numbers = #tpu.dot_dimension_numbers<[1], [0], [0], [1], [0, 0, 1, 1], [], []>} : vector<288x128xbf16>, vector<128x128xbf16>, vector<288x128xf32> -> vector<288x128xf32>
    %72 = vector.shape_cast %71 : vector<288x128xf32> to vector<2x9x16x128xf32>
    %73 = vector.extract_strided_slice %72 {offsets = [0, 1, 1, 0], sizes = [2, 7, 7, 128], strides = [1, 1, 1, 1]} : vector<2x9x16x128xf32> to vector<2x7x7x128xf32>
    %74 = arith.addf %68, %73 : vector<2x7x7x128xf32>
    %c1_71 = arith.constant 1 : index
    %c2_72 = arith.constant 2 : index
    %c0_73 = arith.constant 0 : index
    %c0_74 = arith.constant 0 : index
    %75 = vector.load %arg4[%c1_71, %c2_72, %c0_73, %c0_74] : memref<3x3x128x128xbf16, #tpu.memory_space<vmem>>, vector<1x1x128x128xbf16>
    %76 = vector.shape_cast %75 : vector<1x1x128x128xbf16> to vector<128x128xbf16>
    %cst_75 = arith.constant dense<0.000000e+00> : vector<288x128xf32>
    %77 = tpu.matmul %43, %76, %cst_75 {dimension_numbers = #tpu.dot_dimension_numbers<[1], [0], [0], [1], [0, 0, 1, 1], [], []>} : vector<288x128xbf16>, vector<128x128xbf16>, vector<288x128xf32> -> vector<288x128xf32>
    %78 = vector.shape_cast %77 : vector<288x128xf32> to vector<2x9x16x128xf32>
    %79 = vector.extract_strided_slice %78 {offsets = [0, 1, 2, 0], sizes = [2, 7, 7, 128], strides = [1, 1, 1, 1]} : vector<2x9x16x128xf32> to vector<2x7x7x128xf32>
    %80 = arith.addf %74, %79 : vector<2x7x7x128xf32>
    %c2_76 = arith.constant 2 : index
    %c0_77 = arith.constant 0 : index
    %c0_78 = arith.constant 0 : index
    %c0_79 = arith.constant 0 : index
    %81 = vector.load %arg4[%c2_76, %c0_77, %c0_78, %c0_79] : memref<3x3x128x128xbf16, #tpu.memory_space<vmem>>, vector<1x1x128x128xbf16>
    %82 = vector.shape_cast %81 : vector<1x1x128x128xbf16> to vector<128x128xbf16>
    %cst_80 = arith.constant dense<0.000000e+00> : vector<288x128xf32>
    %83 = tpu.matmul %43, %82, %cst_80 {dimension_numbers = #tpu.dot_dimension_numbers<[1], [0], [0], [1], [0, 0, 1, 1], [], []>} : vector<288x128xbf16>, vector<128x128xbf16>, vector<288x128xf32> -> vector<288x128xf32>
    %84 = vector.shape_cast %83 : vector<288x128xf32> to vector<2x9x16x128xf32>
    %85 = vector.extract_strided_slice %84 {offsets = [0, 2, 0, 0], sizes = [2, 7, 7, 128], strides = [1, 1, 1, 1]} : vector<2x9x16x128xf32> to vector<2x7x7x128xf32>
    %86 = arith.addf %80, %85 : vector<2x7x7x128xf32>
    %c2_81 = arith.constant 2 : index
    %c1_82 = arith.constant 1 : index
    %c0_83 = arith.constant 0 : index
    %c0_84 = arith.constant 0 : index
    %87 = vector.load %arg4[%c2_81, %c1_82, %c0_83, %c0_84] : memref<3x3x128x128xbf16, #tpu.memory_space<vmem>>, vector<1x1x128x128xbf16>
    %88 = vector.shape_cast %87 : vector<1x1x128x128xbf16> to vector<128x128xbf16>
    %cst_85 = arith.constant dense<0.000000e+00> : vector<288x128xf32>
    %89 = tpu.matmul %43, %88, %cst_85 {dimension_numbers = #tpu.dot_dimension_numbers<[1], [0], [0], [1], [0, 0, 1, 1], [], []>} : vector<288x128xbf16>, vector<128x128xbf16>, vector<288x128xf32> -> vector<288x128xf32>
    %90 = vector.shape_cast %89 : vector<288x128xf32> to vector<2x9x16x128xf32>
    %91 = vector.extract_strided_slice %90 {offsets = [0, 2, 1, 0], sizes = [2, 7, 7, 128], strides = [1, 1, 1, 1]} : vector<2x9x16x128xf32> to vector<2x7x7x128xf32>
    %92 = arith.addf %86, %91 : vector<2x7x7x128xf32>
    %c2_86 = arith.constant 2 : index
    %c2_87 = arith.constant 2 : index
    %c0_88 = arith.constant 0 : index
    %c0_89 = arith.constant 0 : index
    %93 = vector.load %arg4[%c2_86, %c2_87, %c0_88, %c0_89] : memref<3x3x128x128xbf16, #tpu.memory_space<vmem>>, vector<1x1x128x128xbf16>
    %94 = vector.shape_cast %93 : vector<1x1x128x128xbf16> to vector<128x128xbf16>
    %cst_90 = arith.constant dense<0.000000e+00> : vector<288x128xf32>
    %95 = tpu.matmul %43, %94, %cst_90 {dimension_numbers = #tpu.dot_dimension_numbers<[1], [0], [0], [1], [0, 0, 1, 1], [], []>} : vector<288x128xbf16>, vector<128x128xbf16>, vector<288x128xf32> -> vector<288x128xf32>
    %96 = vector.shape_cast %95 : vector<288x128xf32> to vector<2x9x16x128xf32>
    %97 = vector.extract_strided_slice %96 {offsets = [0, 2, 2, 0], sizes = [2, 7, 7, 128], strides = [1, 1, 1, 1]} : vector<2x9x16x128xf32> to vector<2x7x7x128xf32>
    %98 = arith.addf %92, %97 : vector<2x7x7x128xf32>
    %c0_91 = arith.constant 0 : index
    %c0_92 = arith.constant 0 : index
    %c0_93 = arith.constant 0 : index
    %c0_94 = arith.constant 0 : index
    %99 = vector.load %arg5[%c0_91, %c0_92, %c0_93, %c0_94] : memref<1x1x1x128xf32, #tpu.memory_space<vmem>>, vector<1x1x1x128xf32>
    %100 = vector.broadcast %99 : vector<1x1x1x128xf32> to vector<2x7x7x128xf32>
    %101 = arith.addf %98, %100 : vector<2x7x7x128xf32>
    %cst_95 = arith.constant 0.000000e+00 : f32
    %102 = vector.broadcast %cst_95 : f32 to vector<2x7x7x128xf32>
    %103 = arith.cmpf oge, %101, %102 : vector<2x7x7x128xf32>
    %cst_96 = arith.constant 1.000000e-01 : f32
    %104 = vector.broadcast %cst_96 : f32 to vector<2x7x7x128xf32>
    %105 = arith.mulf %104, %101 : vector<2x7x7x128xf32>
    %106 = arith.select %103, %101, %105 : vector<2x7x7x128xi1>, vector<2x7x7x128xf32>
    %c0_97 = arith.constant 0 : index
    %c1_98 = arith.constant 1 : index
    %c1_99 = arith.constant 1 : index
    %c0_100 = arith.constant 0 : index
    %107 = vector.load %arg10[%c0_97, %c1_98, %c1_99, %c0_100] : memref<2x9x16x128xf32, #tpu.memory_space<vmem>>, vector<2x7x7x128xf32>
    tpu.vector_store %arg10[%c0_97, %c1_98, %c1_99, %c0_100], %106 {strides = array<i32>} : memref<2x9x16x128xf32, #tpu.memory_space<vmem>>, vector<2x7x7x128xf32>,
    %c0_101 = arith.constant 0 : index
    %c0_102 = arith.constant 0 : index
    %c0_103 = arith.constant 0 : index
    %c0_104 = arith.constant 0 : index
    %108 = vector.load %arg10[%c0_101, %c0_102, %c0_103, %c0_104] : memref<2x9x16x128xf32, #tpu.memory_space<vmem>>, vector<2x9x16x128xf32>
    %109 = vector.shape_cast %108 : vector<2x9x16x128xf32> to vector<288x128xf32>
    %110 = arith.truncf %109 : vector<288x128xf32> to vector<288x128xbf16>
    %cst_105 = arith.constant 0.000000e+00 : f32
    %111 = vector.broadcast %cst_105 : f32 to vector<2x7x7x128xf32>
    %c0_106 = arith.constant 0 : index
    %c0_107 = arith.constant 0 : index
    %c0_108 = arith.constant 0 : index
    %c0_109 = arith.constant 0 : index
    %112 = vector.load %arg6[%c0_106, %c0_107, %c0_108, %c0_109] : memref<3x3x128x128xbf16, #tpu.memory_space<vmem>>, vector<1x1x128x128xbf16>
    %113 = vector.shape_cast %112 : vector<1x1x128x128xbf16> to vector<128x128xbf16>
    %cst_110 = arith.constant dense<0.000000e+00> : vector<288x128xf32>
    %114 = tpu.matmul %110, %113, %cst_110 {dimension_numbers = #tpu.dot_dimension_numbers<[1], [0], [0], [1], [0, 0, 1, 1], [], []>} : vector<288x128xbf16>, vector<128x128xbf16>, vector<288x128xf32> -> vector<288x128xf32>
    %115 = vector.shape_cast %114 : vector<288x128xf32> to vector<2x9x16x128xf32>
    %116 = vector.extract_strided_slice %115 {offsets = [0, 0, 0, 0], sizes = [2, 7, 7, 128], strides = [1, 1, 1, 1]} : vector<2x9x16x128xf32> to vector<2x7x7x128xf32>
    %117 = arith.addf %111, %116 : vector<2x7x7x128xf32>
    %c0_111 = arith.constant 0 : index
    %c1_112 = arith.constant 1 : index
    %c0_113 = arith.constant 0 : index
    %c0_114 = arith.constant 0 : index
    %118 = vector.load %arg6[%c0_111, %c1_112, %c0_113, %c0_114] : memref<3x3x128x128xbf16, #tpu.memory_space<vmem>>, vector<1x1x128x128xbf16>
    %119 = vector.shape_cast %118 : vector<1x1x128x128xbf16> to vector<128x128xbf16>
    %cst_115 = arith.constant dense<0.000000e+00> : vector<288x128xf32>
    %120 = tpu.matmul %110, %119, %cst_115 {dimension_numbers = #tpu.dot_dimension_numbers<[1], [0], [0], [1], [0, 0, 1, 1], [], []>} : vector<288x128xbf16>, vector<128x128xbf16>, vector<288x128xf32> -> vector<288x128xf32>
    %121 = vector.shape_cast %120 : vector<288x128xf32> to vector<2x9x16x128xf32>
    %122 = vector.extract_strided_slice %121 {offsets = [0, 0, 1, 0], sizes = [2, 7, 7, 128], strides = [1, 1, 1, 1]} : vector<2x9x16x128xf32> to vector<2x7x7x128xf32>
    %123 = arith.addf %117, %122 : vector<2x7x7x128xf32>
    %c0_116 = arith.constant 0 : index
    %c2_117 = arith.constant 2 : index
    %c0_118 = arith.constant 0 : index
    %c0_119 = arith.constant 0 : index
    %124 = vector.load %arg6[%c0_116, %c2_117, %c0_118, %c0_119] : memref<3x3x128x128xbf16, #tpu.memory_space<vmem>>, vector<1x1x128x128xbf16>
    %125 = vector.shape_cast %124 : vector<1x1x128x128xbf16> to vector<128x128xbf16>
    %cst_120 = arith.constant dense<0.000000e+00> : vector<288x128xf32>
    %126 = tpu.matmul %110, %125, %cst_120 {dimension_numbers = #tpu.dot_dimension_numbers<[1], [0], [0], [1], [0, 0, 1, 1], [], []>} : vector<288x128xbf16>, vector<128x128xbf16>, vector<288x128xf32> -> vector<288x128xf32>
    %127 = vector.shape_cast %126 : vector<288x128xf32> to vector<2x9x16x128xf32>
    %128 = vector.extract_strided_slice %127 {offsets = [0, 0, 2, 0], sizes = [2, 7, 7, 128], strides = [1, 1, 1, 1]} : vector<2x9x16x128xf32> to vector<2x7x7x128xf32>
    %129 = arith.addf %123, %128 : vector<2x7x7x128xf32>
    %c1_121 = arith.constant 1 : index
    %c0_122 = arith.constant 0 : index
    %c0_123 = arith.constant 0 : index
    %c0_124 = arith.constant 0 : index
    %130 = vector.load %arg6[%c1_121, %c0_122, %c0_123, %c0_124] : memref<3x3x128x128xbf16, #tpu.memory_space<vmem>>, vector<1x1x128x128xbf16>
    %131 = vector.shape_cast %130 : vector<1x1x128x128xbf16> to vector<128x128xbf16>
    %cst_125 = arith.constant dense<0.000000e+00> : vector<288x128xf32>
    %132 = tpu.matmul %110, %131, %cst_125 {dimension_numbers = #tpu.dot_dimension_numbers<[1], [0], [0], [1], [0, 0, 1, 1], [], []>} : vector<288x128xbf16>, vector<128x128xbf16>, vector<288x128xf32> -> vector<288x128xf32>
    %133 = vector.shape_cast %132 : vector<288x128xf32> to vector<2x9x16x128xf32>
    %134 = vector.extract_strided_slice %133 {offsets = [0, 1, 0, 0], sizes = [2, 7, 7, 128], strides = [1, 1, 1, 1]} : vector<2x9x16x128xf32> to vector<2x7x7x128xf32>
    %135 = arith.addf %129, %134 : vector<2x7x7x128xf32>
    %c1_126 = arith.constant 1 : index
    %c1_127 = arith.constant 1 : index
    %c0_128 = arith.constant 0 : index
    %c0_129 = arith.constant 0 : index
    %136 = vector.load %arg6[%c1_126, %c1_127, %c0_128, %c0_129] : memref<3x3x128x128xbf16, #tpu.memory_space<vmem>>, vector<1x1x128x128xbf16>
    %137 = vector.shape_cast %136 : vector<1x1x128x128xbf16> to vector<128x128xbf16>
    %cst_130 = arith.constant dense<0.000000e+00> : vector<288x128xf32>
    %138 = tpu.matmul %110, %137, %cst_130 {dimension_numbers = #tpu.dot_dimension_numbers<[1], [0], [0], [1], [0, 0, 1, 1], [], []>} : vector<288x128xbf16>, vector<128x128xbf16>, vector<288x128xf32> -> vector<288x128xf32>
    %139 = vector.shape_cast %138 : vector<288x128xf32> to vector<2x9x16x128xf32>
    %140 = vector.extract_strided_slice %139 {offsets = [0, 1, 1, 0], sizes = [2, 7, 7, 128], strides = [1, 1, 1, 1]} : vector<2x9x16x128xf32> to vector<2x7x7x128xf32>
    %141 = arith.addf %135, %140 : vector<2x7x7x128xf32>
    %c1_131 = arith.constant 1 : index
    %c2_132 = arith.constant 2 : index
    %c0_133 = arith.constant 0 : index
    %c0_134 = arith.constant 0 : index
    %142 = vector.load %arg6[%c1_131, %c2_132, %c0_133, %c0_134] : memref<3x3x128x128xbf16, #tpu.memory_space<vmem>>, vector<1x1x128x128xbf16>
    %143 = vector.shape_cast %142 : vector<1x1x128x128xbf16> to vector<128x128xbf16>
    %cst_135 = arith.constant dense<0.000000e+00> : vector<288x128xf32>
    %144 = tpu.matmul %110, %143, %cst_135 {dimension_numbers = #tpu.dot_dimension_numbers<[1], [0], [0], [1], [0, 0, 1, 1], [], []>} : vector<288x128xbf16>, vector<128x128xbf16>, vector<288x128xf32> -> vector<288x128xf32>
    %145 = vector.shape_cast %144 : vector<288x128xf32> to vector<2x9x16x128xf32>
    %146 = vector.extract_strided_slice %145 {offsets = [0, 1, 2, 0], sizes = [2, 7, 7, 128], strides = [1, 1, 1, 1]} : vector<2x9x16x128xf32> to vector<2x7x7x128xf32>
    %147 = arith.addf %141, %146 : vector<2x7x7x128xf32>
    %c2_136 = arith.constant 2 : index
    %c0_137 = arith.constant 0 : index
    %c0_138 = arith.constant 0 : index
    %c0_139 = arith.constant 0 : index
    %148 = vector.load %arg6[%c2_136, %c0_137, %c0_138, %c0_139] : memref<3x3x128x128xbf16, #tpu.memory_space<vmem>>, vector<1x1x128x128xbf16>
    %149 = vector.shape_cast %148 : vector<1x1x128x128xbf16> to vector<128x128xbf16>
    %cst_140 = arith.constant dense<0.000000e+00> : vector<288x128xf32>
    %150 = tpu.matmul %110, %149, %cst_140 {dimension_numbers = #tpu.dot_dimension_numbers<[1], [0], [0], [1], [0, 0, 1, 1], [], []>} : vector<288x128xbf16>, vector<128x128xbf16>, vector<288x128xf32> -> vector<288x128xf32>
    %151 = vector.shape_cast %150 : vector<288x128xf32> to vector<2x9x16x128xf32>
    %152 = vector.extract_strided_slice %151 {offsets = [0, 2, 0, 0], sizes = [2, 7, 7, 128], strides = [1, 1, 1, 1]} : vector<2x9x16x128xf32> to vector<2x7x7x128xf32>
    %153 = arith.addf %147, %152 : vector<2x7x7x128xf32>
    %c2_141 = arith.constant 2 : index
    %c1_142 = arith.constant 1 : index
    %c0_143 = arith.constant 0 : index
    %c0_144 = arith.constant 0 : index
    %154 = vector.load %arg6[%c2_141, %c1_142, %c0_143, %c0_144] : memref<3x3x128x128xbf16, #tpu.memory_space<vmem>>, vector<1x1x128x128xbf16>
    %155 = vector.shape_cast %154 : vector<1x1x128x128xbf16> to vector<128x128xbf16>
    %cst_145 = arith.constant dense<0.000000e+00> : vector<288x128xf32>
    %156 = tpu.matmul %110, %155, %cst_145 {dimension_numbers = #tpu.dot_dimension_numbers<[1], [0], [0], [1], [0, 0, 1, 1], [], []>} : vector<288x128xbf16>, vector<128x128xbf16>, vector<288x128xf32> -> vector<288x128xf32>
    %157 = vector.shape_cast %156 : vector<288x128xf32> to vector<2x9x16x128xf32>
    %158 = vector.extract_strided_slice %157 {offsets = [0, 2, 1, 0], sizes = [2, 7, 7, 128], strides = [1, 1, 1, 1]} : vector<2x9x16x128xf32> to vector<2x7x7x128xf32>
    %159 = arith.addf %153, %158 : vector<2x7x7x128xf32>
    %c2_146 = arith.constant 2 : index
    %c2_147 = arith.constant 2 : index
    %c0_148 = arith.constant 0 : index
    %c0_149 = arith.constant 0 : index
    %160 = vector.load %arg6[%c2_146, %c2_147, %c0_148, %c0_149] : memref<3x3x128x128xbf16, #tpu.memory_space<vmem>>, vector<1x1x128x128xbf16>
    %161 = vector.shape_cast %160 : vector<1x1x128x128xbf16> to vector<128x128xbf16>
    %cst_150 = arith.constant dense<0.000000e+00> : vector<288x128xf32>
    %162 = tpu.matmul %110, %161, %cst_150 {dimension_numbers = #tpu.dot_dimension_numbers<[1], [0], [0], [1], [0, 0, 1, 1], [], []>} : vector<288x128xbf16>, vector<128x128xbf16>, vector<288x128xf32> -> vector<288x128xf32>
    %163 = vector.shape_cast %162 : vector<288x128xf32> to vector<2x9x16x128xf32>
    %164 = vector.extract_strided_slice %163 {offsets = [0, 2, 2, 0], sizes = [2, 7, 7, 128], strides = [1, 1, 1, 1]} : vector<2x9x16x128xf32> to vector<2x7x7x128xf32>
    %165 = arith.addf %159, %164 : vector<2x7x7x128xf32>
    %c0_151 = arith.constant 0 : index
    %c0_152 = arith.constant 0 : index
    %c0_153 = arith.constant 0 : index
    %c0_154 = arith.constant 0 : index
    %166 = vector.load %arg7[%c0_151, %c0_152, %c0_153, %c0_154] : memref<1x1x1x128xf32, #tpu.memory_space<vmem>>, vector<1x1x1x128xf32>
    %167 = vector.broadcast %166 : vector<1x1x1x128xf32> to vector<2x7x7x128xf32>
    %168 = arith.addf %165, %167 : vector<2x7x7x128xf32>
    %cst_155 = arith.constant 0.000000e+00 : f32
    %169 = vector.broadcast %cst_155 : f32 to vector<2x7x7x128xf32>
    %170 = arith.cmpf oge, %168, %169 : vector<2x7x7x128xf32>
    %cst_156 = arith.constant 1.000000e-01 : f32
    %171 = vector.broadcast %cst_156 : f32 to vector<2x7x7x128xf32>
    %172 = arith.mulf %171, %168 : vector<2x7x7x128xf32>
    %173 = arith.select %170, %168, %172 : vector<2x7x7x128xi1>, vector<2x7x7x128xf32>
    %c0_157 = arith.constant 0 : index
    %c0_158 = arith.constant 0 : index
    %c0_159 = arith.constant 0 : index
    %c0_160 = arith.constant 0 : index
    %174 = vector.load %arg8[%c0_157, %c0_158, %c0_159, %c0_160] : memref<2x7x7x128xf32, #tpu.memory_space<vmem>>, vector<2x7x7x128xf32>
    tpu.vector_store %arg8[%c0_157, %c0_158, %c0_159, %c0_160], %173 {strides = array<i32>} : memref<2x7x7x128xf32, #tpu.memory_space<vmem>>, vector<2x7x7x128xf32>,
    return
  }
  func.func @transform_0(%arg0: i32) -> (i32, i32, i32, i32) {
    %c0_i32 = arith.constant 0 : i32
    %c0_i32_0 = arith.constant 0 : i32
    %c0_i32_1 = arith.constant 0 : i32
    %c0_i32_2 = arith.constant 0 : i32
    %c0_i32_3 = arith.constant 0 : i32
    return %c0_i32, %c0_i32_0, %c0_i32_1, %c0_i32_2 : i32, i32, i32, i32
  }
  func.func @transform_1(%arg0: i32) -> (i32, i32, i32, i32) {
    %c0_i32 = arith.constant 0 : i32
    %c0_i32_0 = arith.constant 0 : i32
    %c0_i32_1 = arith.constant 0 : i32
    %c0_i32_2 = arith.constant 0 : i32
    %c0_i32_3 = arith.constant 0 : i32
    return %c0_i32, %c0_i32_0, %c0_i32_1, %c0_i32_2 : i32, i32, i32, i32
  }
  func.func @transform_2(%arg0: i32) -> (i32, i32, i32, i32) {
    %c0_i32 = arith.constant 0 : i32
    %c0_i32_0 = arith.constant 0 : i32
    %c0_i32_1 = arith.constant 0 : i32
    %c0_i32_2 = arith.constant 0 : i32
    %c0_i32_3 = arith.constant 0 : i32
    return %c0_i32, %c0_i32_0, %c0_i32_1, %c0_i32_2 : i32, i32, i32, i32
  }
  func.func @transform_3(%arg0: i32) -> (i32, i32, i32, i32) {
    %c0_i32 = arith.constant 0 : i32
    %c0_i32_0 = arith.constant 0 : i32
    %c0_i32_1 = arith.constant 0 : i32
    %c0_i32_2 = arith.constant 0 : i32
    %c0_i32_3 = arith.constant 0 : i32
    return %c0_i32, %c0_i32_0, %c0_i32_1, %c0_i32_2 : i32, i32, i32, i32
  }
  func.func @transform_4(%arg0: i32) -> (i32, i32, i32, i32) {
    %c0_i32 = arith.constant 0 : i32
    %c0_i32_0 = arith.constant 0 : i32
    %c0_i32_1 = arith.constant 0 : i32
    %c0_i32_2 = arith.constant 0 : i32
    %c0_i32_3 = arith.constant 0 : i32
    return %c0_i32, %c0_i32_0, %c0_i32_1, %c0_i32_2 : i32, i32, i32, i32
  }
  func.func @transform_5(%arg0: i32) -> (i32, i32, i32, i32) {
    %c0_i32 = arith.constant 0 : i32
    %c0_i32_0 = arith.constant 0 : i32
    %c0_i32_1 = arith.constant 0 : i32
    %c0_i32_2 = arith.constant 0 : i32
    %c0_i32_3 = arith.constant 0 : i32
    return %c0_i32, %c0_i32_0, %c0_i32_1, %c0_i32_2 : i32, i32, i32, i32
  }
  func.func @transform_6(%arg0: i32) -> (i32, i32, i32, i32) {
    %c0_i32 = arith.constant 0 : i32
    %c0_i32_0 = arith.constant 0 : i32
    %c0_i32_1 = arith.constant 0 : i32
    %c0_i32_2 = arith.constant 0 : i32
    %c0_i32_3 = arith.constant 0 : i32
    return %c0_i32, %c0_i32_0, %c0_i32_1, %c0_i32_2 : i32, i32, i32, i32
  }
  func.func @transform_7(%arg0: i32) -> (i32, i32, i32, i32) {
    %c0_i32 = arith.constant 0 : i32
    %c0_i32_0 = arith.constant 0 : i32
    %c0_i32_1 = arith.constant 0 : i32
    %c0_i32_2 = arith.constant 0 : i32
    %c0_i32_3 = arith.constant 0 : i32
    return %c0_i32, %c0_i32_0, %c0_i32_1, %c0_i32_2 : i32, i32, i32, i32
  }
}

</mosaic_0001>

<bundles_post_ra>
// kernel: tpu_custom_call.1
= control target key start
LH: loop header
LB: loop body
LE: loop exit
PB: predicated region body
PF: predicated region fallthrough
CT: control target
= control target key end

     0   :  { %12 = vsyncpa [#allocation5], 0  ;;  %s6932_s0 = inlined_call_operand.hbm [shape: f32[2,8,8,128], index: 0, kind: input, shape index: {}]   ;;  %s6933_s1 = inlined_call_operand.hbm [shape: bf16[2,2,128,128], index: 1, kind: input, shape index: {}]   ;;  %s6934_s2 = inlined_call_operand.vmem [shape: f32[1,1,1,128], index: 2, kind: input, shape index: {}]   ;;  %s6935_s3 = inlined_call_operand.hbm [shape: bf16[3,3,128,128], index: 3, kind: input, shape index: {}]   ;;  %s6936_s4 = inlined_call_operand.vmem [shape: f32[1,1,1,128], index: 4, kind: input, shape index: {}]   ;;  %s6937_s5 = inlined_call_operand.hbm [shape: bf16[3,3,128,128], index: 5, kind: input, shape index: {}]   ;;  %s6938_s6 = inlined_call_operand.vmem [shape: f32[1,1,1,128], index: 6, kind: input, shape index: {}]   ;;  %s6939_s7 = inlined_call_operand.vmem [shape: f32[2,7,7,128], index: 7, kind: output, shape index: {}]  }
   0x1   :  { %13 = vsyncpa [#allocation7], 0  ;;  %s32_s26 = sshll.u32 %s6933_s1, 4  ;;  %s33_s26 = int_to_ptr.hbm [resolvable:$true] %s32_s26 }
   0x2   :  { %14 = vsyncpa [#allocation10], 0  ;;  %s5769_s27 = smov [#allocation6]   ;;  %s19_s8 = sshll.u32 %s6932_s0, 4  ;;  %s20_s8 = int_to_ptr.hbm [resolvable:$true] %s19_s8 }
   0x3   :  { %s34_s28 = sshll.u32 %s5769_s27, 4  ;;  %s5770_s9 = smov 64   ;;  %s35_s28 = int_to_ptr.vmem [resolvable:$true] %s34_s28 }
   0x4   :  { %s5771_s10 = smov 4   ;;  %s5772_s11 = smov [#allocation4]  }
   0x5   :  { %40 = dma.hbm_to_vmem [thread:$0]  %s33_s26, 4096, %s35_s28, [#allocation7], %s5770_s9, %s5770_s9, %s5771_s10  }
   0x6   :  { %s21_s12 = sshll.u32 %s5772_s11, 4  ;;  %s5773_s13 = smov 128   ;;  %s22_s12 = int_to_ptr.vmem [resolvable:$true] %s21_s12 }
   0x7   :  { %s5774_s14 = smov 8   ;;  %s47_s16 = sshll.u32 %s6935_s3, 4  ;;  %s48_s16 = int_to_ptr.hbm [resolvable:$true] %s47_s16 }
   0x8   :  { %27 = dma.hbm_to_vmem [thread:$0]  %s20_s8, 2048, %s22_s12, [#allocation5], %s5773_s13, %s5773_s13, %s5774_s14  }
   0x9   :  { %s5775_s17 = smov [#allocation8]   ;;  %s62_s20 = sshll.u32 %s6937_s5, 4  ;;  %s63_s20 = int_to_ptr.hbm [resolvable:$true] %s62_s20 }
   0xa   :  { %s49_s18 = sshll.u32 %s5775_s17, 4  ;;  %s5776_s21 = smov [#allocation9]   ;;  %s50_s18 = int_to_ptr.vmem [resolvable:$true] %s49_s18 }
   0xb   :  { %55 = dma.hbm_to_vmem [thread:$0]  %s48_s16, 9216, %s50_s18, [#allocation7], %s5770_s9, %s5770_s9, %s5771_s10  }
   0xc   :  { %s64_s22 = sshll.u32 %s5776_s21, 4  ;;  %s65_s22 = int_to_ptr.vmem [resolvable:$true] %s64_s22 }
   0xd   :  { %70 = dma.hbm_to_vmem [thread:$0]  %s63_s20, 9216, %s65_s22, [#allocation10], %s5770_s9, %s5770_s9, %s5771_s10  }
   0xe   :  { %5763 = dma.done.wait [#allocation5], 2048  }
   0xf   :  { %5764 = vsyncadd [#allocation5], 4294965248 }
  0x10   :  { %5765 = dma.done.wait [#allocation7], 13312  }
  0x11   :  { %5766 = vsyncadd [#allocation7], 4294953984 }
  0x12   :  { %5767 = dma.done.wait [#allocation10], 9216  }
  0x13   :  { %5768 = vsyncadd [#allocation10], 4294958080  ;;  %v5485_v0 = vld [vmem:[#allocation6 + $0xb8] sm:$0xff]  ;;  %v5484_v4 = vld [vmem:[#allocation6 + $0xb0] sm:$0xff]  ;;  %vm1438_vm14 = vcmask 1045504  }
  0x14   :  { %v5493_v1 = vld [vmem:[#allocation6 + $0xf8] sm:$0xff]  ;;  %543 = vmatpush.bf16.msra.mxu2 %v5485_v0  ;;  %v5492_v5 = vld [vmem:[#allocation6 + $0xf0] sm:$0xff]  ;;  %v5483_v8 = vld [vmem:[#allocation6 + $0xa8] sm:$0xff] }
  0x15   :  { %v5477_v2 = vld [vmem:[#allocation6 + $0x78] sm:$0xff]  ;;  %669 = vmatpush.bf16.msra.mxu3 %v5493_v1  ;;  %v5476_v6 = vld [vmem:[#allocation6 + $0x70] sm:$0xff]  ;;  %v5491_v9 = vld [vmem:[#allocation6 + $0xe8] sm:$0xff] }
  0x16   :  { %v5469_v3 = vld [vmem:[#allocation6 + $0x38] sm:$0xff]  ;;  %375 = vmatpush.bf16.msra.mxu1 %v5477_v2  ;;  %v5468_v7 = vld [vmem:[#allocation6 + $0x30] sm:$0xff]  ;;  %v5475_v10 = vld [vmem:[#allocation6 + $0x68] sm:$0xff] }
  0x17   :  { %249 = vmatpush.bf16.msra.mxu0 %v5469_v3  ;;  %v5467_v11 = vld [vmem:[#allocation6 + $0x28] sm:$0xff]  ;;  %v5482_v12 = vld [vmem:[#allocation6 + $0xa0] sm:$0xff]  ;;  %v5481_v16 = vld [vmem:[#allocation6 + $0x98] sm:$0xff] }
  0x18   :  { %544 = vmatpush.bf16.msra.mxu2 %v5484_v4  ;;  %v5490_v13 = vld [vmem:[#allocation6 + $0xe0] sm:$0xff]  ;;  %v5489_v17 = vld [vmem:[#allocation6 + $0xd8] sm:$0xff]  ;;  %v5480_v20 = vld [vmem:[#allocation6 + $0x90] sm:$0xff] }
  0x19   :  { %670 = vmatpush.bf16.msra.mxu3 %v5492_v5  ;;  %v5474_v14 = vld [vmem:[#allocation6 + $0x60] sm:$0xff]  ;;  %v5473_v18 = vld [vmem:[#allocation6 + $0x58] sm:$0xff]  ;;  %v5488_v21 = vld [vmem:[#allocation6 + $0xd0] sm:$0xff] }
  0x1a   :  { %376 = vmatpush.bf16.msra.mxu1 %v5476_v6  ;;  %v5466_v15 = vld [vmem:[#allocation6 + $0x20] sm:$0xff]  ;;  %v5465_v19 = vld [vmem:[#allocation6 + $0x18] sm:$0xff]  ;;  %v5472_v22 = vld [vmem:[#allocation6 + $0x50] sm:$0xff] }
  0x1b   :  { %250 = vmatpush.bf16.msra.mxu0 %v5468_v7  ;;  %v5464_v23 = vld [vmem:[#allocation6 + $0x10] sm:$0xff]  ;;  %v5479_v24 = vld [vmem:[#allocation6 + $0x88] sm:$0xff]  ;;  %v5478_v28 = vld [vmem:[#allocation6 + $0x80] sm:$0xff] }
  0x1c   :  { %545 = vmatpush.bf16.msra.mxu2 %v5483_v8  ;;  %v5487_v25 = vld [vmem:[#allocation6 + $0xc8] sm:$0xff]  ;;  %v5486_v29 = vld [vmem:[#allocation6 + $0xc0] sm:$0xff]  ;;  %v163_v35 = vld [vmem:[#allocation4 + $0x10] sm:$0xff]  ;;  %v5777_v8 = vmov 0.0  }
  0x1d   :  { %671 = vmatpush.bf16.msra.mxu3 %v5491_v9  ;;  %v5471_v26 = vld [vmem:[#allocation6 + $0x48] sm:$0xff]  ;;  %v161_v30 = vld [vmem:[#allocation4] sm:$0xff]  ;;  %v164_v36 = vld [vmem:[#allocation4 + $0x18] sm:$0xff]  ;;  %91 = vst [vmem:[#allocation2 + $0x10] sm:$0xff] %v5777_v8 }
  0x1e   :  { %377 = vmatpush.bf16.msra.mxu1 %v5475_v10  ;;  %v5463_v27 = vld [vmem:[#allocation6 + $0x8] sm:$0xff]  ;;  %v5470_v32 = vld [vmem:[#allocation6 + $0x40] sm:$0xff]  ;;  %v178_v37 = vpack.c.bf16 %v164_v36, %v163_v35  ;;  %v5501_v41 = vld [vmem:[#allocation8 + $0x38] sm:$0xff]  ;;  %89 = vst [vmem:[#allocation2] sm:$0xff] %v5777_v8 }
  0x1f   :  { %251 = vmatpush.bf16.msra.mxu0 %v5467_v11  ;;  %v162_v31 = vld [vmem:[#allocation4 + $0x8] sm:$0xff]  ;;  %v5462_v33 = vld [vmem:[#allocation6] sm:$0xff]  ;;  %v5509_v42 = vld [vmem:[#allocation8 + $0x78] sm:$0xff]  ;;  %93 = vst [vmem:[#allocation2 + $0x20] sm:$0xff] %v5777_v8  ;;  %v5778_v11 = vmov 0.0|0.0  }
  0x20   :  { %546 = vmatpush.bf16.msra.mxu2 %v5482_v12  ;;  %v177_v34 = vpack.c.bf16 %v162_v31, %v161_v30  ;;  %v165_v38 = vld [vmem:[#allocation4 + $0x20] sm:$0xff]  ;;  %v166_v39 = vld [vmem:[#allocation4 + $0x28] sm:$0xff]  ;;  %v167_v43 = vld [vmem:[#allocation4 + $0x30] sm:$0xff]  ;;  %95 = vst [vmem:[#allocation2 + $0x30] sm:$0xff] %v5777_v8 }
  0x21   :  { %672 = vmatpush.bf16.msra.mxu3 %v5490_v13  ;;  %v179_v40 = vpack.c.bf16 %v166_v39, %v165_v38  ;;  %v168_v44 = vld [vmem:[#allocation4 + $0x38] sm:$0xff]  ;;  %v5500_v46 = vld [vmem:[#allocation8 + $0x30] sm:$0xff]  ;;  %v169_v48 = vld [vmem:[#allocation4 + $0x40] sm:$0xff]  ;;  %97 = vst [vmem:[#allocation2 + $0x40] sm:$0xff] %v5777_v8 }
  0x22   :  { %378 = vmatpush.bf16.msra.mxu1 %v5474_v14  ;;  %v180_v45 = vpack.c.bf16 %v168_v44, %v167_v43  ;;  %v5508_v47 = vld [vmem:[#allocation8 + $0x70] sm:$0xff]  ;;  %v170_v49 = vld [vmem:[#allocation4 + $0x48] sm:$0xff]  ;;  %v5498_v53 = vld [vmem:[#allocation8 + $0x20] sm:$0xff]  ;;  %99 = vst [vmem:[#allocation2 + $0x50] sm:$0xff] %v5777_v8 }
  0x23   :  { %252 = vmatpush.bf16.msra.mxu0 %v5466_v15  ;;  %v181_v50 = vpack.c.bf16 %v170_v49, %v169_v48  ;;  %v5499_v51 = vld [vmem:[#allocation8 + $0x28] sm:$0xff]  ;;  %v5506_v54 = vld [vmem:[#allocation8 + $0x60] sm:$0xff]  ;;  %v171_v55 = vld [vmem:[#allocation4 + $0x50] sm:$0xff]  ;;  %101 = vst [vmem:[#allocation2 + $0x60] sm:$0xff] %v5777_v8 }
  0x24   :  { %547 = vmatpush.bf16.msra.mxu2 %v5481_v16  ;;  %v5507_v52 = vld [vmem:[#allocation8 + $0x68] sm:$0xff]  ;;  %v172_v56 = vld [vmem:[#allocation4 + $0x58] sm:$0xff]  ;;  %v173_v58 = vld [vmem:[#allocation4 + $0x60] sm:$0xff]  ;;  %103 = vst [vmem:[#allocation2 + $0x70] sm:$0xff] %v5777_v8 }
  0x25   :  { %673 = vmatpush.bf16.msra.mxu3 %v5489_v17  ;;  %v182_v57 = vpack.c.bf16 %v172_v56, %v171_v55  ;;  %v174_v59 = vld [vmem:[#allocation4 + $0x68] sm:$0xff]  ;;  %v5497_v61 = vld [vmem:[#allocation8 + $0x18] sm:$0xff]  ;;  %v5496_v63 = vld [vmem:[#allocation8 + $0x10] sm:$0xff]  ;;  %109 = vst [vmem:[#allocation2 + $0xa0] sm:$0xff] %v5777_v8 }
  0x26   :  { %379 = vmatpush.bf16.msra.mxu1 %v5473_v18  ;;  %v183_v60 = vpack.c.bf16 %v174_v59, %v173_v58  ;;  %v5505_v62 = vld [vmem:[#allocation8 + $0x58] sm:$0xff]  ;;  %v5504_v0 = vld [vmem:[#allocation8 + $0x50] sm:$0xff]  ;;  %v5495_v1 = vld [vmem:[#allocation8 + $0x8] sm:$0xff]  ;;  %111 = vst [vmem:[#allocation2 + $0xb0] sm:$0xff] %v5777_v8 }
  0x27   :  { %253 = vmatpush.bf16.msra.mxu0 %v5465_v19  ;;  %v5503_v2 = vld [vmem:[#allocation8 + $0x48] sm:$0xff]  ;;  %v175_v3 = vld [vmem:[#allocation4 + $0x70] sm:$0xff]  ;;  %v176_v4 = vld [vmem:[#allocation4 + $0x78] sm:$0xff]  ;;  %113 = vst [vmem:[#allocation2 + $0xc0] sm:$0xff] %v5777_v8 }
  0x28   :  { %548 = vmatpush.bf16.msra.mxu2 %v5480_v20  ;;  %v5494_v5 = vld [vmem:[#allocation8] sm:$0xff]  ;;  %v184_v7 = vpack.c.bf16 %v176_v4, %v175_v3  ;;  %115 = vst [vmem:[#allocation2 + $0xd0] sm:$0xff] %v5777_v8 }
  0x29   :  { %674 = vmatpush.bf16.msra.mxu3 %v5488_v21  ;;  %v5502_v6 = vld [vmem:[#allocation8 + $0x40] sm:$0xff]  ;;  %117 = vst [vmem:[#allocation2 + $0xe0] sm:$0xff] %v5777_v8 }
  0x2a   :  { %380 = vmatpush.bf16.msra.mxu1 %v5472_v22  ;;  %119 = vst [vmem:[#allocation2 + $0xf0] sm:$0xff] %v5777_v8  ;;  %v5852_v22 = vld [vmem:[%s6934_s2] ss:$0 sm:$0xff] }
  0x2b   :  { %254 = vmatpush.bf16.msra.mxu0 %v5464_v23  ;;  %121 = vst [vmem:[#allocation2 + $0x100] sm:$0xff] %v5777_v8 }
  0x2c   :  { %549 = vmatpush.bf16.msra.mxu2 %v5479_v24  ;;  %127 = vst [vmem:[#allocation3 + $0x10] sm:$0xff] %v5777_v8 }
  0x2d   :  { %675 = vmatpush.bf16.msra.mxu3 %v5487_v25  ;;  %129 = vst [vmem:[#allocation3 + $0x20] sm:$0xff] %v5777_v8 }
  0x2e   :  { %381 = vmatpush.bf16.msra.mxu1 %v5471_v26  ;;  %131 = vst [vmem:[#allocation3 + $0x30] sm:$0xff] %v5777_v8 }
  0x2f   :  { %255 = vmatpush.bf16.msra.mxu0 %v5463_v27  ;;  %133 = vst [vmem:[#allocation3 + $0x40] sm:$0xff] %v5777_v8 }
  0x30   :  { %550 = vmatpush.bf16.msra.mxu2 %v5478_v28  ;;  %135 = vst [vmem:[#allocation3 + $0x50] sm:$0xff] %v5777_v8 }
  0x31   :  { %676 = vmatpush.bf16.msra.mxu3 %v5486_v29  ;;  %137 = vst [vmem:[#allocation3 + $0x60] sm:$0xff] %v5777_v8 }
  0x32   :  { %382 = vmatpush.bf16.msra.mxu1 %v5470_v32  ;;  %139 = vst [vmem:[#allocation3 + $0x70] sm:$0xff] %v5777_v8 }
  0x33   :  { %256 = vmatpush.bf16.msra.mxu0 %v5462_v33  ;;  %551 = vmatmul.bf16.vlgmr.msra.gmra.mxu2 %v177_v34  ;;  %145 = vst [vmem:[#allocation3 + $0xa0] sm:$0xff] %v5777_v8 }
  0x34   :  { %677 = vmatmul.bf16.vlgmr.msra.gmra.mxu3 %v177_v34  ;;  %5638 = vmatpush.bf16.msrb.mxu2 %v5501_v41  ;;  %147 = vst [vmem:[#allocation3 + $0xb0] sm:$0xff] %v5777_v8 }
  0x35   :  { %383 = vmatmul.bf16.vlgmr.msra.gmra.mxu1 %v177_v34  ;;  %5646 = vmatpush.bf16.msrb.mxu3 %v5509_v42  ;;  %149 = vst [vmem:[#allocation3 + $0xc0] sm:$0xff] %v5777_v8 }
  0x36   :  { %257 = vmatmul.bf16.vlgmr.msra.gmra.mxu0 %v177_v34  ;;  %1121 = vmatpush.bf16.msrb.mxu1 %v5509_v42  ;;  %151 = vst [vmem:[#allocation3 + $0xd0] sm:$0xff] %v5777_v8 }
  0x37   :  { %965 = vmatpush.bf16.msrb.mxu0 %v5501_v41  ;;  %153 = vst [vmem:[#allocation3 + $0xe0] sm:$0xff] %v5777_v8 }
  0x38   :  { %5639 = vmatpush.bf16.msrb.mxu2 %v5500_v46  ;;  %155 = vst [vmem:[#allocation3 + $0xf0] sm:$0xff] %v5777_v8 }
  0x39   :  { %5647 = vmatpush.bf16.msrb.mxu3 %v5508_v47  ;;  %157 = vst [vmem:[#allocation3 + $0x100] sm:$0xff] %v5777_v8 }
  0x3a   :  { %1122 = vmatpush.bf16.msrb.mxu1 %v5508_v47 }
  0x3b   :  { %966 = vmatpush.bf16.msrb.mxu0 %v5500_v46 }
  0x3c   :  { %5640 = vmatpush.bf16.msrb.mxu2 %v5499_v51 }
  0x3d   :  { %5648 = vmatpush.bf16.msrb.mxu3 %v5507_v52 }
  0x3e   :  { %1123 = vmatpush.bf16.msrb.mxu1 %v5507_v52 }
  0x3f   :  { %967 = vmatpush.bf16.msrb.mxu0 %v5499_v51 }
  0x40   :  { %5641 = vmatpush.bf16.msrb.mxu2 %v5498_v53 }
  0x41   :  { %5649 = vmatpush.bf16.msrb.mxu3 %v5506_v54 }
  0x42   :  { %1124 = vmatpush.bf16.msrb.mxu1 %v5506_v54 }
  0x43   :  { %555 = vmatmul.bf16.gmra.mxu2 %v178_v37  ;;  %968 = vmatpush.bf16.msrb.mxu0 %v5498_v53 }
  0x44   :  { %681 = vmatmul.bf16.gmra.mxu3 %v178_v37  ;;  %5642 = vmatpush.bf16.msrb.mxu2 %v5497_v61 }
  0x45   :  { %388 = vmatmul.bf16.gmra.mxu1 %v178_v37  ;;  %5650 = vmatpush.bf16.msrb.mxu3 %v5505_v62 }
  0x46   :  { %262 = vmatmul.bf16.gmra.mxu0 %v178_v37  ;;  %1125 = vmatpush.bf16.msrb.mxu1 %v5505_v62 }
  0x47   :  { %969 = vmatpush.bf16.msrb.mxu0 %v5497_v61 }
  0x48   :  { %5643 = vmatpush.bf16.msrb.mxu2 %v5496_v63 }
  0x49   :  { %5651 = vmatpush.bf16.msrb.mxu3 %v5504_v0 }
  0x4a   :  { %1126 = vmatpush.bf16.msrb.mxu1 %v5504_v0 }
  0x4b   :  { %970 = vmatpush.bf16.msrb.mxu0 %v5496_v63 }
  0x4c   :  { %5644 = vmatpush.bf16.msrb.mxu2 %v5495_v1 }
  0x4d   :  { %5652 = vmatpush.bf16.msrb.mxu3 %v5503_v2 }
  0x4e   :  { %1127 = vmatpush.bf16.msrb.mxu1 %v5503_v2 }
  0x4f   :  { %971 = vmatpush.bf16.msrb.mxu0 %v5495_v1 }
  0x50   :  { %5645 = vmatpush.bf16.msrb.mxu2 %v5494_v5 }
  0x51   :  { %5653 = vmatpush.bf16.msrb.mxu3 %v5502_v6 }
  0x52   :  { %1128 = vmatpush.bf16.msrb.mxu1 %v5502_v6 }
  0x53   :  { %560 = vmatmul.bf16.gmra.mxu2 %v179_v40  ;;  %972 = vmatpush.bf16.msrb.mxu0 %v5494_v5 }
  0x54   :  { %686 = vmatmul.bf16.gmra.mxu3 %v179_v40 }
  0x55   :  { %393 = vmatmul.bf16.gmra.mxu1 %v179_v40 }
  0x56   :  { %267 = vmatmul.bf16.gmra.mxu0 %v179_v40 }
  0x63   :  { %565 = vmatmul.bf16.gmra.mxu2 %v180_v45 }
  0x64   :  { %691 = vmatmul.bf16.gmra.mxu3 %v180_v45 }
  0x65   :  { %398 = vmatmul.bf16.gmra.mxu1 %v180_v45 }
  0x66   :  { %272 = vmatmul.bf16.gmra.mxu0 %v180_v45 }
  0x73   :  { %570 = vmatmul.bf16.gmra.mxu2 %v181_v50 }
  0x74   :  { %696 = vmatmul.bf16.gmra.mxu3 %v181_v50 }
  0x75   :  { %402 = vmatmul.bf16.gmra.mxu1 %v181_v50 }
  0x76   :  { %276 = vmatmul.bf16.gmra.mxu0 %v181_v50 }
  0x83   :  { %574 = vmatmul.bf16.gmra.mxu2 %v182_v57 }
  0x84   :  { %700 = vmatmul.bf16.gmra.mxu3 %v182_v57 }
  0x85   :  { %407 = vmatmul.bf16.gmra.mxu1 %v182_v57 }
  0x86   :  { %281 = vmatmul.bf16.gmra.mxu0 %v182_v57 }
  0x93   :  { %579 = vmatmul.bf16.gmra.mxu2 %v183_v60 }
  0x94   :  { %705 = vmatmul.bf16.gmra.mxu3 %v183_v60 }
  0x95   :  { %412 = vmatmul.bf16.gmra.mxu1 %v183_v60 }
  0x96   :  { %286 = vmatmul.bf16.gmra.mxu0 %v183_v60 }
  0xa3   :  { %584 = vmatmul.bf16.gmra.mxu2 %v184_v7 }
  0xa4   :  { %710 = vmatmul.bf16.gmra.mxu3 %v184_v7 }
  0xa5   :  { %417 = vmatmul.bf16.gmra.mxu1 %v184_v7 }
  0xa6   :  { %291 = vmatmul.bf16.gmra.mxu0 %v184_v7 }
  0xb2   :  { %v384_v9 = vpop.f32.mrf.mxu1 }
  0xb3   :  { %v258_v10 = vpop.f32.mrf.mxu0  ;;  %1007 = vmatmul.bf16.vlgmr.msrb.gmra.mxu2 %v5778_v11  ;;  %v436_v14 = vrot.slane %v384_v9, 1 }
  0xb4   :  { %1163 = vmatmul.bf16.vlgmr.msrb.gmra.mxu3 %v5778_v11 }
  0xb5   :  { %1129 = vmatmul.bf16.vlgmr.msrb.gmra.mxu1 %v5778_v11  ;;  %v464_v17 = vadd.f32 %v436_v14, %v258_v10 }
  0xb6   :  { %973 = vmatmul.bf16.vlgmr.msrb.gmra.mxu0 %v5778_v11  ;;  %v552_v12 = vpop.f32.mrf.mxu2 }
  0xb7   :  { %v678_v13 = vpop.f32.mrf.mxu3 }
  0xba   :  { %v386_v15 = vpop.f32.mrf.mxu1 }
  0xbb   :  { %v260_v16 = vpop.f32.mrf.mxu0  ;;  %v437_v37 = vrot.slane %v386_v15, 1 }
  0xbd   :  { %v465_v43 = vadd.f32 %v437_v37, %v260_v16 }
  0xbe   :  { %v553_v18 = vpop.f32.mrf.mxu2 }
  0xbf   :  { %v679_v19 = vpop.f32.mrf.mxu3  ;;  %v590_v20 = vadd.f32 %v553_v18, %v464_v17 }
  0xc0   :  { %v730_v21 = vrot.slane %v679_v19, 1 }
  0xc2   :  { %v758_v23 = vadd.f32 %v730_v21, %v590_v20  ;;  %v389_v24 = vpop.f32.mrf.mxu1 }
  0xc3   :  { %v263_v25 = vpop.f32.mrf.mxu0  ;;  %v438_v35 = vrot.slane %v389_v24, 1  ;;  %v5533_v24 = vld [vmem:[#allocation8 + $0x138] sm:$0xff] }
  0xc4   :  { %v776_v26 = vadd.f32 %v5852_v22, %v758_v23  ;;  %1730 = vmatpush.bf16.msra.mxu0 %v5533_v24 }
  0xc5   :  { %v466_v42 = vadd.f32 %v438_v35, %v263_v25 }
  0xc6   :  { %vm790_vm0 = vcmp.ge.f32.partialorder %v776_v26, 0.0  ;;  %v804_v27 = vmul.f32 0.1, %v776_v26  ;;  %v556_v28 = vpop.f32.mrf.mxu2 }
  0xc7   :  { %v682_v29 = vpop.f32.mrf.mxu3  ;;  %v591_v44 = vadd.f32 %v556_v28, %v465_v43  ;;  %v5517_v43 = vld [vmem:[#allocation8 + $0xb8] sm:$0xff] }
  0xc8   :  { %v818_v30 = vsel %vm790_vm0, %v776_v26, %v804_v27  ;;  %v731_v45 = vrot.slane %v682_v29, 1  ;;  %1319 = vmatpush.bf16.msra.mxu2 %v5517_v43 }
  0xc9   :  { %833 = vst [vmem:[#allocation2 + $0x11] sm:$0x7f] %v818_v30 }
  0xca   :  { %v391_v31 = vpop.f32.mrf.mxu1  ;;  %v759_v56 = vadd.f32 %v731_v45, %v591_v44  ;;  %v5525_v44 = vld [vmem:[#allocation8 + $0xf8] sm:$0xff] }
  0xcb   :  { %v265_v32 = vpop.f32.mrf.mxu0  ;;  %v439_v41 = vrot.slane %v391_v31, 1  ;;  %1574 = vmatpush.bf16.msra.mxu3 %v5525_v44 }
  0xcc   :  { %v777_v60 = vadd.f32 %v5852_v22, %v759_v56 }
  0xcd   :  { %v467_v46 = vadd.f32 %v439_v41, %v265_v32 }
  0xce   :  { %v558_v33 = vpop.f32.mrf.mxu2  ;;  %v805_v7 = vmul.f32 0.1, %v777_v60  ;;  %vm791_vm1 = vcmp.ge.f32.partialorder %v777_v60, 0.0 }
  0xcf   :  { %v684_v34 = vpop.f32.mrf.mxu3  ;;  %v592_v49 = vadd.f32 %v558_v33, %v466_v42 }
  0xd0   :  { %v849_v36 = vld [vmem:[#allocation2 + $0x10] sm:$0xff]  ;;  %v732_v50 = vrot.slane %v684_v34, 1  ;;  %v819_v15 = vsel %vm791_vm1, %v777_v60, %v805_v7 }
  0xd1   :  { %v5861_v38 = vpack.c.bf16 0.0, %v849_v36  ;;  %834 = vst [vmem:[#allocation2 + $0x21] sm:$0x7f] %v819_v15 }
  0xd2   :  { %v394_v39 = vpop.f32.mrf.mxu1  ;;  %v760_v57 = vadd.f32 %v732_v50, %v592_v49 }
  0xd3   :  { %v268_v40 = vpop.f32.mrf.mxu0  ;;  %977 = vmatmul.bf16.gmra.mxu0 %v5861_v38  ;;  %1133 = vmatmul.bf16.gmra.mxu1 %v5861_v38  ;;  %v440_v51 = vrot.slane %v394_v39, 1 }
  0xd4   :  { %v778_v63 = vadd.f32 %v5852_v22, %v760_v57 }
  0xd5   :  { %v468_v58 = vadd.f32 %v440_v51, %v268_v40 }
  0xd6   :  { %v561_v47 = vpop.f32.mrf.mxu2  ;;  %v806_v9 = vmul.f32 0.1, %v778_v63  ;;  %vm792_vm2 = vcmp.ge.f32.partialorder %v778_v63, 0.0 }
  0xd7   :  { %v687_v48 = vpop.f32.mrf.mxu3  ;;  %v593_v52 = vadd.f32 %v561_v47, %v467_v46 }
  0xd8   :  { %v733_v53 = vrot.slane %v687_v48, 1  ;;  %v820_v18 = vsel %vm792_vm2, %v778_v63, %v806_v9  ;;  %v851_v36 = vld [vmem:[#allocation2 + $0x20] sm:$0xff] }
  0xd9   :  { %835 = vst [vmem:[#allocation2 + $0x31] sm:$0x7f] %v820_v18  ;;  %v5879_v37 = vpack.c.bf16 0.0, %v851_v36  ;;  %v5523_v36 = vld [vmem:[#allocation8 + $0xe8] sm:$0xff] }
  0xda   :  { %v396_v54 = vpop.f32.mrf.mxu1  ;;  %v761_v59 = vadd.f32 %v733_v53, %v593_v52 }
  0xdb   :  { %v270_v55 = vpop.f32.mrf.mxu0  ;;  %v441_v3 = vrot.slane %v396_v54, 1 }
  0xdc   :  { %v779_v2 = vadd.f32 %v5852_v22, %v761_v59 }
  0xdd   :  { %v469_v13 = vadd.f32 %v441_v3, %v270_v55 }
  0xde   :  { %v563_v61 = vpop.f32.mrf.mxu2  ;;  %v807_v12 = vmul.f32 0.1, %v779_v2  ;;  %vm793_vm3 = vcmp.ge.f32.partialorder %v779_v2, 0.0 }
  0xdf   :  { %v689_v62 = vpop.f32.mrf.mxu3  ;;  %v594_v0 = vadd.f32 %v563_v61, %v468_v58 }
  0xe0   :  { %v734_v1 = vrot.slane %v689_v62, 1  ;;  %v821_v23 = vsel %vm793_vm3, %v779_v2, %v807_v12  ;;  %v853_v53 = vld [vmem:[#allocation2 + $0x30] sm:$0xff] }
  0xe1   :  { %836 = vst [vmem:[#allocation2 + $0x41] sm:$0x7f] %v821_v23  ;;  %v5884_v58 = vpack.c.bf16 0.0, %v853_v53  ;;  %v5524_v2 = vld [vmem:[#allocation8 + $0xf0] sm:$0xff] }
  0xe2   :  { %v762_v4 = vadd.f32 %v734_v1, %v594_v0  ;;  %v399_v5 = vpop.f32.mrf.mxu1  ;;  %v5532_v0 = vld [vmem:[#allocation8 + $0x130] sm:$0xff]  ;;  %1575 = vmatpush.bf16.msra.mxu3 %v5524_v2 }
  0xe3   :  { %v273_v6 = vpop.f32.mrf.mxu0  ;;  %v442_v19 = vrot.slane %v399_v5, 1  ;;  %981 = vmatmul.bf16.gmra.mxu0 %v5879_v37  ;;  %1137 = vmatmul.bf16.gmra.mxu1 %v5879_v37  ;;  %v5516_v1 = vld [vmem:[#allocation8 + $0xb0] sm:$0xff] }
  0xe4   :  { %v780_v10 = vadd.f32 %v5852_v22, %v762_v4  ;;  %1731 = vmatpush.bf16.msra.mxu0 %v5532_v0  ;;  %1320 = vmatpush.bf16.msra.mxu2 %v5516_v1 }
  0xe5   :  { %v470_v8 = vadd.f32 %v442_v19, %v273_v6 }
  0xe6   :  { %v808_v14 = vmul.f32 0.1, %v780_v10  ;;  %vm794_vm4 = vcmp.ge.f32.partialorder %v780_v10, 0.0  ;;  %v566_v16 = vpop.f32.mrf.mxu2  ;;  %1576 = vmatpush.bf16.msra.mxu3 %v5523_v36  ;;  %v5529_v36 = vld [vmem:[#allocation8 + $0x118] sm:$0xff] }
  0xe7   :  { %v692_v17 = vpop.f32.mrf.mxu3  ;;  %v595_v20 = vadd.f32 %v566_v16, %v469_v13 }
  0xe8   :  { %v735_v21 = vrot.slane %v692_v17, 1  ;;  %v822_v25 = vsel %vm794_vm4, %v780_v10, %v808_v14  ;;  %v855_v19 = vld [vmem:[#allocation2 + $0x40] sm:$0xff] }
  0xe9   :  { %837 = vst [vmem:[#allocation2 + $0x51] sm:$0x7f] %v822_v25 }
  0xea   :  { %v763_v26 = vadd.f32 %v735_v21, %v595_v20  ;;  %v401_v27 = vpop.f32.mrf.mxu1 }
  0xeb   :  { %v275_v28 = vpop.f32.mrf.mxu0 }
  0xec   :  { %v781_v29 = vadd.f32 %v5852_v22, %v763_v26 }
  0xee   :  { %vm795_vm5 = vcmp.ge.f32.partialorder %v781_v29, 0.0  ;;  %v809_v30 = vmul.f32 0.1, %v781_v29  ;;  %v568_v31 = vpop.f32.mrf.mxu2 }
  0xef   :  { %v694_v32 = vpop.f32.mrf.mxu3  ;;  %v596_v34 = vadd.f32 %v568_v31, %v470_v8  ;;  %v5892_v8 = vpack.c.bf16 0.0, %v855_v19  ;;  %v5539_v19 = vld [vmem:[#allocation8 + $0x168] sm:$0xff] }
  0xf0   :  { %v823_v33 = vsel %vm795_vm5, %v781_v29, %v809_v30  ;;  %v736_v35 = vrot.slane %v694_v32, 1  ;;  %v857_v53 = vld [vmem:[#allocation2 + $0x50] sm:$0xff] }
  0xf1   :  { %838 = vst [vmem:[#allocation2 + $0x61] sm:$0x7f] %v823_v33 }
  0xf2   :  { %v764_v39 = vadd.f32 %v736_v35, %v596_v34  ;;  %v403_v40 = vpop.f32.mrf.mxu1  ;;  %v5531_v34 = vld [vmem:[#allocation8 + $0x128] sm:$0xff] }
  0xf3   :  { %v277_v41 = vpop.f32.mrf.mxu0  ;;  %v443_v49 = vrot.slane %v403_v40, 1  ;;  %985 = vmatmul.bf16.gmra.mxu0 %v5884_v58  ;;  %1141 = vmatmul.bf16.gmra.mxu1 %v5884_v58  ;;  %v5515_v35 = vld [vmem:[#allocation8 + $0xa8] sm:$0xff] }
  0xf4   :  { %v782_v42 = vadd.f32 %v5852_v22, %v764_v39  ;;  %1732 = vmatpush.bf16.msra.mxu0 %v5531_v34  ;;  %1321 = vmatpush.bf16.msra.mxu2 %v5515_v35 }
  0xf5   :  { %v471_v52 = vadd.f32 %v443_v49, %v277_v41 }
  0xf6   :  { %vm796_vm6 = vcmp.ge.f32.partialorder %v782_v42, 0.0  ;;  %v810_v45 = vmul.f32 0.1, %v782_v42  ;;  %v571_v46 = vpop.f32.mrf.mxu2 }
  0xf7   :  { %v697_v47 = vpop.f32.mrf.mxu3 }
  0xf8   :  { %v824_v48 = vsel %vm796_vm6, %v782_v42, %v810_v45 }
  0xf9   :  { %839 = vst [vmem:[#allocation2 + $0x71] sm:$0x7f] %v824_v48 }
  0xfa   :  { %v405_v50 = vpop.f32.mrf.mxu1 }
  0xfb   :  { %v279_v51 = vpop.f32.mrf.mxu0  ;;  %v444_v59 = vrot.slane %v405_v50, 1 }
  0xfd   :  { %v472_v3 = vadd.f32 %v444_v59, %v279_v51 }
  0xfe   :  { %v572_v54 = vpop.f32.mrf.mxu2 }
  0xff   :  { %v698_v55 = vpop.f32.mrf.mxu3  ;;  %v597_v56 = vadd.f32 %v572_v54, %v471_v52 }
 0x100   :  { %v737_v57 = vrot.slane %v698_v55, 1 }
 0x102   :  { %v765_v60 = vadd.f32 %v737_v57, %v597_v56  ;;  %v408_v61 = vpop.f32.mrf.mxu1 }
 0x103   :  { %v282_v62 = vpop.f32.mrf.mxu0  ;;  %v445_v12 = vrot.slane %v408_v61, 1  ;;  %989 = vmatmul.bf16.gmra.mxu0 %v5892_v8  ;;  %1145 = vmatmul.bf16.gmra.mxu1 %v5892_v8 }
 0x104   :  { %v783_v63 = vadd.f32 %v5852_v22, %v765_v60 }
 0x105   :  { %v473_v17 = vadd.f32 %v445_v12, %v282_v62  ;;  %v5902_v62 = vpack.c.bf16 0.0, %v857_v53  ;;  %v5527_v53 = vld [vmem:[#allocation8 + $0x108] sm:$0xff] }
 0x106   :  { %vm797_vm7 = vcmp.ge.f32.partialorder %v783_v63, 0.0  ;;  %v811_v4 = vmul.f32 0.1, %v783_v63  ;;  %v575_v5 = vpop.f32.mrf.mxu2 }
 0x107   :  { %v701_v6 = vpop.f32.mrf.mxu3  ;;  %v598_v9 = vadd.f32 %v575_v5, %v472_v3  ;;  %v5541_v3 = vld [vmem:[#allocation8 + $0x178] sm:$0xff] }
 0x108   :  { %v825_v7 = vsel %vm797_vm7, %v783_v63, %v811_v4  ;;  %v738_v10 = vrot.slane %v701_v6, 1  ;;  %v5530_v4 = vld [vmem:[#allocation8 + $0x120] sm:$0xff]  ;;  %1928 = vmatpush.bf16.msra.mxu1 %v5541_v3 }
 0x109   :  { %840 = vst [vmem:[#allocation2 + $0xa1] sm:$0x7f] %v825_v7  ;;  %v5514_v6 = vld [vmem:[#allocation8 + $0xa0] sm:$0xff]  ;;  %1733 = vmatpush.bf16.msra.mxu0 %v5530_v4 }
 0x10a   :  { %v766_v13 = vadd.f32 %v738_v10, %v598_v9  ;;  %v410_v15 = vpop.f32.mrf.mxu1  ;;  %v5522_v7 = vld [vmem:[#allocation8 + $0xe0] sm:$0xff]  ;;  %v5540_v10 = vld [vmem:[#allocation8 + $0x170] sm:$0xff]  ;;  %1322 = vmatpush.bf16.msra.mxu2 %v5514_v6 }
 0x10b   :  { %v284_v14 = vpop.f32.mrf.mxu0  ;;  %v446_v27 = vrot.slane %v410_v15, 1  ;;  %1577 = vmatpush.bf16.msra.mxu3 %v5522_v7 }
 0x10c   :  { %v784_v16 = vadd.f32 %v5852_v22, %v766_v13  ;;  %1929 = vmatpush.bf16.msra.mxu1 %v5540_v10 }
 0x10d   :  { %v474_v33 = vadd.f32 %v446_v27, %v284_v14  ;;  %v859_v27 = vld [vmem:[#allocation2 + $0x60] sm:$0xff]  ;;  %1734 = vmatpush.bf16.msra.mxu0 %v5529_v36 }
 0x10e   :  { %vm798_vm8 = vcmp.ge.f32.partialorder %v784_v16, 0.0  ;;  %v812_v18 = vmul.f32 0.1, %v784_v16  ;;  %v577_v20 = vpop.f32.mrf.mxu2 }
 0x10f   :  { %v703_v21 = vpop.f32.mrf.mxu3  ;;  %v599_v24 = vadd.f32 %v577_v20, %v473_v17 }
 0x110   :  { %v826_v23 = vsel %vm798_vm8, %v784_v16, %v812_v18  ;;  %v739_v25 = vrot.slane %v703_v21, 1  ;;  %v867_v26 = vld [vmem:[#allocation2 + $0xa0] sm:$0xff]  ;;  %1930 = vmatpush.bf16.msra.mxu1 %v5539_v19 }
 0x111   :  { %841 = vst [vmem:[#allocation2 + $0xb1] sm:$0x7f] %v826_v23  ;;  %v5890_v28 = vpack.c.bf16 0.0, %v867_v26  ;;  %v5538_v26 = vld [vmem:[#allocation8 + $0x160] sm:$0xff] }
 0x112   :  { %v767_v29 = vadd.f32 %v739_v25, %v599_v24  ;;  %v413_v31 = vpop.f32.mrf.mxu1 }
 0x113   :  { %v287_v30 = vpop.f32.mrf.mxu0  ;;  %1011 = vmatmul.bf16.gmra.mxu2 %v5890_v28  ;;  %1167 = vmatmul.bf16.gmra.mxu3 %v5890_v28  ;;  %v447_v45 = vrot.slane %v413_v31, 1 }
 0x114   :  { %v785_v32 = vadd.f32 %v5852_v22, %v767_v29  ;;  %993 = vmatmul.bf16.gmra.mxu0 %v5902_v62  ;;  %1149 = vmatmul.bf16.gmra.mxu1 %v5902_v62 }
 0x115   :  { %v475_v50 = vadd.f32 %v447_v45, %v287_v30  ;;  %1931 = vmatpush.bf16.msra.mxu1 %v5538_v26 }
 0x116   :  { %vm799_vm9 = vcmp.ge.f32.partialorder %v785_v32, 0.0  ;;  %v813_v39 = vmul.f32 0.1, %v785_v32  ;;  %v580_v40 = vpop.f32.mrf.mxu2 }
 0x117   :  { %v706_v41 = vpop.f32.mrf.mxu3  ;;  %v600_v43 = vadd.f32 %v580_v40, %v474_v33 }
 0x118   :  { %v827_v42 = vsel %vm799_vm9, %v785_v32, %v813_v39  ;;  %v740_v44 = vrot.slane %v706_v41, 1  ;;  %v869_v52 = vld [vmem:[#allocation2 + $0xb0] sm:$0xff]  ;;  %v5912_v32 = vpack.c.bf16 0.0, %v859_v27  ;;  %v5537_v39 = vld [vmem:[#allocation8 + $0x158] sm:$0xff] }
 0x119   :  { %842 = vst [vmem:[#allocation2 + $0xc1] sm:$0x7f] %v827_v42  ;;  %v5900_v61 = vpack.c.bf16 0.0, %v869_v52  ;;  %1932 = vmatpush.bf16.msra.mxu1 %v5537_v39 }
 0x11a   :  { %v768_v46 = vadd.f32 %v740_v44, %v600_v43  ;;  %v415_v48 = vpop.f32.mrf.mxu1  ;;  %v5513_v43 = vld [vmem:[#allocation8 + $0x98] sm:$0xff] }
 0x11b   :  { %v289_v47 = vpop.f32.mrf.mxu0  ;;  %v448_v57 = vrot.slane %v415_v48, 1  ;;  %v5521_v44 = vld [vmem:[#allocation8 + $0xd8] sm:$0xff]  ;;  %v5536_v48 = vld [vmem:[#allocation8 + $0x150] sm:$0xff]  ;;  %1323 = vmatpush.bf16.msra.mxu2 %v5513_v43 }
 0x11c   :  { %v786_v49 = vadd.f32 %v5852_v22, %v768_v46  ;;  %1578 = vmatpush.bf16.msra.mxu3 %v5521_v44  ;;  %v5565_v44 = vld [vmem:[#allocation8 + $0x238] sm:$0xff] }
 0x11d   :  { %v476_v5 = vadd.f32 %v448_v57, %v289_v47  ;;  %v5528_v47 = vld [vmem:[#allocation8 + $0x110] sm:$0xff]  ;;  %1933 = vmatpush.bf16.msra.mxu1 %v5536_v48 }
 0x11e   :  { %vm800_vm10 = vcmp.ge.f32.partialorder %v786_v49, 0.0  ;;  %v814_v51 = vmul.f32 0.1, %v786_v49  ;;  %v582_v54 = vpop.f32.mrf.mxu2  ;;  %1735 = vmatpush.bf16.msra.mxu0 %v5528_v47 }
 0x11f   :  { %v708_v55 = vpop.f32.mrf.mxu3  ;;  %v601_v59 = vadd.f32 %v582_v54, %v475_v50  ;;  %v5535_v54 = vld [vmem:[#allocation8 + $0x148] sm:$0xff] }
 0x120   :  { %v828_v56 = vsel %vm800_vm10, %v786_v49, %v814_v51  ;;  %v741_v60 = vrot.slane %v708_v55, 1  ;;  %v871_v24 = vld [vmem:[#allocation2 + $0xc0] sm:$0xff] }
 0x121   :  { %843 = vst [vmem:[#allocation2 + $0xd1] sm:$0x7f] %v828_v56  ;;  %v5910_v31 = vpack.c.bf16 0.0, %v871_v24  ;;  %1934 = vmatpush.bf16.msra.mxu1 %v5535_v54 }
 0x122   :  { %v769_v63 = vadd.f32 %v741_v60, %v601_v59  ;;  %v418_v1 = vpop.f32.mrf.mxu1  ;;  %1736 = vmatpush.bf16.msra.mxu0 %v5527_v53  ;;  %v5526_v59 = vld [vmem:[#allocation8 + $0x100] sm:$0xff] }
 0x123   :  { %v292_v0 = vpop.f32.mrf.mxu0  ;;  %1015 = vmatmul.bf16.gmra.mxu2 %v5900_v61  ;;  %1171 = vmatmul.bf16.gmra.mxu3 %v5900_v61  ;;  %v449_v23 = vrot.slane %v418_v1, 1  ;;  %v5534_v60 = vld [vmem:[#allocation8 + $0x140] sm:$0xff] }
 0x124   :  { %v787_v2 = vadd.f32 %v5852_v22, %v769_v63  ;;  %997 = vmatmul.bf16.gmra.mxu0 %v5912_v32  ;;  %1153 = vmatmul.bf16.gmra.mxu1 %v5912_v32  ;;  %v861_v63 = vld [vmem:[#allocation2 + $0x70] sm:$0xff] }
 0x125   :  { %v477_v30 = vadd.f32 %v449_v23, %v292_v0  ;;  %v5923_v1 = vpack.c.bf16 0.0, %v861_v63  ;;  %1935 = vmatpush.bf16.msra.mxu1 %v5534_v60 }
 0x126   :  { %vm801_vm11 = vcmp.ge.f32.partialorder %v787_v2, 0.0  ;;  %v815_v9 = vmul.f32 0.1, %v787_v2  ;;  %v585_v12 = vpop.f32.mrf.mxu2  ;;  %1737 = vmatpush.bf16.msra.mxu0 %v5526_v59 }
 0x127   :  { %v711_v13 = vpop.f32.mrf.mxu3  ;;  %v602_v15 = vadd.f32 %v585_v12, %v476_v5 }
 0x128   :  { %v829_v14 = vsel %vm801_vm11, %v787_v2, %v815_v9  ;;  %v742_v16 = vrot.slane %v711_v13, 1  ;;  %v873_v57 = vld [vmem:[#allocation2 + $0xd0] sm:$0xff]  ;;  %v5511_v13 = vld [vmem:[#allocation8 + $0x88] sm:$0xff] }
 0x129   :  { %844 = vst [vmem:[#allocation2 + $0xe1] sm:$0x7f] %v829_v14  ;;  %v5921_v0 = vpack.c.bf16 0.0, %v873_v57  ;;  %v5520_v2 = vld [vmem:[#allocation8 + $0xd0] sm:$0xff]  ;;  %v5519_v14 = vld [vmem:[#allocation8 + $0xc8] sm:$0xff] }
 0x12a   :  { %v420_v18 = vpop.f32.mrf.mxu1  ;;  %v770_v20 = vadd.f32 %v742_v16, %v602_v15  ;;  %1579 = vmatpush.bf16.msra.mxu3 %v5520_v2  ;;  %2536 = vmatpush.bf16.msrb.mxu0 %v5565_v44 }
 0x12b   :  { %v294_v17 = vpop.f32.mrf.mxu0 }
 0x12c   :  { %v788_v21 = vadd.f32 %v5852_v22, %v770_v20 }
 0x12e   :  { %vm802_vm12 = vcmp.ge.f32.partialorder %v788_v21, 0.0  ;;  %v816_v25 = vmul.f32 0.1, %v788_v21  ;;  %v587_v40 = vpop.f32.mrf.mxu2  ;;  %1580 = vmatpush.bf16.msra.mxu3 %v5519_v14 }
 0x12f   :  { %v713_v41 = vpop.f32.mrf.mxu3  ;;  %v603_v45 = vadd.f32 %v587_v40, %v477_v30 }
 0x130   :  { %v830_v29 = vsel %vm802_vm12, %v788_v21, %v816_v25  ;;  %v743_v46 = vrot.slane %v713_v41, 1  ;;  %v875_v3 = vld [vmem:[#allocation2 + $0xe0] sm:$0xff] }
 0x131   :  { %845 = vst [vmem:[#allocation2 + $0xf1] sm:$0x7f] %v830_v29  ;;  %v5929_v7 = vpack.c.bf16 0.0, %v875_v3 }
 0x132   :  { %v1130_v34 = vpop.f32.mrf.mxu1  ;;  %v771_v49 = vadd.f32 %v743_v46, %v603_v45  ;;  %v5549_v45 = vld [vmem:[#allocation8 + $0x1b8] sm:$0xff] }
 0x133   :  { %v974_v33 = vpop.f32.mrf.mxu0  ;;  %1019 = vmatmul.bf16.gmra.mxu2 %v5910_v31  ;;  %1175 = vmatmul.bf16.gmra.mxu3 %v5910_v31  ;;  %v1212_v35 = vrot.slane %v1130_v34, 1  ;;  %v5518_v34 = vld [vmem:[#allocation8 + $0xc0] sm:$0xff]  ;;  %v5557_v46 = vld [vmem:[#allocation8 + $0x1f8] sm:$0xff] }
 0x134   :  { %v789_v50 = vadd.f32 %v5852_v22, %v771_v49  ;;  %1001 = vmatmul.bf16.gmra.mxu0 %v5923_v1  ;;  %1157 = vmatmul.bf16.gmra.mxu1 %v5923_v1  ;;  %v5512_v22 = vld [vmem:[#allocation8 + $0x90] sm:$0xff] }
 0x135   :  { %v5918_v42 = vadd.f32 %v1212_v35, %v974_v33  ;;  %1324 = vmatpush.bf16.msra.mxu2 %v5512_v22  ;;  %v5510_v33 = vld [vmem:[#allocation8 + $0x80] sm:$0xff]  ;;  %1581 = vmatpush.bf16.msra.mxu3 %v5518_v34 }
 0x136   :  { %vm803_vm13 = vcmp.ge.f32.partialorder %v789_v50, 0.0  ;;  %v817_v55 = vmul.f32 0.1, %v789_v50  ;;  %v1008_v17 = vpop.f32.mrf.mxu2 }
 0x137   :  { %v1164_v18 = vpop.f32.mrf.mxu3 }
 0x138   :  { %v831_v56 = vsel %vm803_vm13, %v789_v50, %v817_v55  ;;  %v877_v15 = vld [vmem:[#allocation2 + $0xf0] sm:$0xff]  ;;  %v1219_v19 = vrot.slane %v1164_v18, 1 }
 0x139   :  { %846 = vst [vmem:[#allocation2 + $0x101] sm:$0x7f] %v831_v56  ;;  %1325 = vmatpush.bf16.msra.mxu2 %v5511_v13  ;;  %v5937_v16 = vpack.c.bf16 0.0, %v877_v15  ;;  %2338 = vmatpush.bf16.msrb.mxu3 %v5557_v46 }
 0x13a   :  { %v1132_v52 = vpop.f32.mrf.mxu1  ;;  %v5943_v20 = vadd.f32 %v1219_v19, %v1008_v17 }
 0x13b   :  { %v976_v51 = vpop.f32.mrf.mxu0 }
 0x13d   :  { %1326 = vmatpush.bf16.msra.mxu2 %v5510_v33 }
 0x13e   :  { %v1010_v27 = vpop.f32.mrf.mxu2 }
 0x13f   :  { %v1166_v29 = vpop.f32.mrf.mxu3 }
 0x140   :  { %v879_v21 = vld [vmem:[#allocation2 + $0x100] sm:$0xff] }
 0x141   :  { %v5945_v25 = vpack.c.bf16 0.0, %v879_v21  ;;  %2182 = vmatpush.bf16.msrb.mxu2 %v5549_v45 }
 0x143   :  { %1023 = vmatmul.bf16.gmra.mxu2 %v5921_v0  ;;  %1179 = vmatmul.bf16.gmra.mxu3 %v5921_v0 }
 0x144   :  { %1004 = vmatmul.bf16.gmra.mxu0 %v5778_v11  ;;  %1160 = vmatmul.bf16.gmra.mxu1 %v5778_v11 }
 0x150   :  { %v978_v4 = vpop.f32.mrf.mxu0  ;;  %v1134_v5 = vpop.f32.mrf.mxu1 }
 0x151   :  { %v1213_v6 = vrot.slane %v1134_v5, 1  ;;  %v5564_v5 = vld [vmem:[#allocation8 + $0x230] sm:$0xff] }
 0x152   :  { %2537 = vmatpush.bf16.msrb.mxu0 %v5564_v5 }
 0x153   :  { %v5931_v9 = vadd.f32 %v1213_v6, %v978_v4  ;;  %1027 = vmatmul.bf16.gmra.mxu2 %v5929_v7  ;;  %1183 = vmatmul.bf16.gmra.mxu3 %v5929_v7  ;;  %v5548_v6 = vld [vmem:[#allocation8 + $0x1b0] sm:$0xff] }
 0x154   :  { %1738 = vmatmul.bf16.vlgmr.msra.gmra.mxu0 %v5778_v11  ;;  %1936 = vmatmul.bf16.vlgmr.msra.gmra.mxu1 %v5778_v11 }
 0x155   :  { %2183 = vmatpush.bf16.msrb.mxu2 %v5548_v6 }
 0x158   :  { %v980_v10 = vpop.f32.mrf.mxu0  ;;  %v1136_v12 = vpop.f32.mrf.mxu1 }
 0x159   :  { %v5556_v10 = vld [vmem:[#allocation8 + $0x1f0] sm:$0xff] }
 0x15a   :  { %2339 = vmatpush.bf16.msrb.mxu3 %v5556_v10 }
 0x160   :  { %v982_v23 = vpop.f32.mrf.mxu0  ;;  %v1138_v24 = vpop.f32.mrf.mxu1 }
 0x161   :  { %v1214_v26 = vrot.slane %v1138_v24, 1 }
 0x163   :  { %1031 = vmatmul.bf16.gmra.mxu2 %v5937_v16  ;;  %1187 = vmatmul.bf16.gmra.mxu3 %v5937_v16  ;;  %v5949_v30 = vadd.f32 %v1214_v26, %v982_v23 }
 0x164   :  { %1741 = vmatmul.bf16.gmra.mxu0 %v5861_v38  ;;  %1939 = vmatmul.bf16.gmra.mxu1 %v5861_v38 }
 0x168   :  { %v984_v35 = vpop.f32.mrf.mxu0  ;;  %v1140_v36 = vpop.f32.mrf.mxu1 }
 0x170   :  { %v986_v39 = vpop.f32.mrf.mxu0  ;;  %v1142_v40 = vpop.f32.mrf.mxu1 }
 0x171   :  { %v1215_v41 = vrot.slane %v1142_v40, 1 }
 0x173   :  { %1035 = vmatmul.bf16.gmra.mxu2 %v5945_v25  ;;  %1191 = vmatmul.bf16.gmra.mxu3 %v5945_v25  ;;  %v5955_v43 = vadd.f32 %v1215_v41, %v986_v39 }
 0x174   :  { %1745 = vmatmul.bf16.gmra.mxu0 %v5879_v37  ;;  %1944 = vmatmul.bf16.gmra.mxu1 %v5879_v37 }
 0x178   :  { %v988_v47 = vpop.f32.mrf.mxu0  ;;  %v1144_v48 = vpop.f32.mrf.mxu1 }
 0x180   :  { %v990_v49 = vpop.f32.mrf.mxu0  ;;  %v1146_v50 = vpop.f32.mrf.mxu1 }
 0x181   :  { %v1216_v51 = vrot.slane %v1146_v50, 1 }
 0x183   :  { %1038 = vmatmul.bf16.gmra.mxu2 %v5778_v11  ;;  %1194 = vmatmul.bf16.gmra.mxu3 %v5778_v11  ;;  %v5961_v52 = vadd.f32 %v1216_v51, %v990_v49 }
 0x184   :  { %1749 = vmatmul.bf16.gmra.mxu0 %v5884_v58  ;;  %1949 = vmatmul.bf16.gmra.mxu1 %v5884_v58 }
 0x188   :  { %v992_v56 = vpop.f32.mrf.mxu0  ;;  %v1148_v57 = vpop.f32.mrf.mxu1 }
 0x191   :  { %v994_v22 = vpop.f32.mrf.mxu0  ;;  %v1150_v2 = vpop.f32.mrf.mxu1 }
 0x192   :  { %v1217_v3 = vrot.slane %v1150_v2, 1 }
 0x193   :  { %1327 = vmatmul.bf16.vlgmr.msra.gmra.mxu2 %v5778_v11  ;;  %1582 = vmatmul.bf16.vlgmr.msra.gmra.mxu3 %v5778_v11 }
 0x194   :  { %v5969_v4 = vadd.f32 %v1217_v3, %v994_v22  ;;  %1753 = vmatmul.bf16.gmra.mxu0 %v5892_v8  ;;  %1954 = vmatmul.bf16.gmra.mxu1 %v5892_v8 }
 0x196   :  { %v1012_v53 = vpop.f32.mrf.mxu2  ;;  %v1168_v54 = vpop.f32.mrf.mxu3 }
 0x197   :  { %v1220_v55 = vrot.slane %v1168_v54, 1  ;;  %v5547_v54 = vld [vmem:[#allocation8 + $0x1a8] sm:$0xff] }
 0x198   :  { %2184 = vmatpush.bf16.msrb.mxu2 %v5547_v54 }
 0x199   :  { %v5965_v59 = vadd.f32 %v1220_v55, %v1012_v53  ;;  %v996_v15 = vpop.f32.mrf.mxu0  ;;  %v1152_v17 = vpop.f32.mrf.mxu1  ;;  %v5563_v53 = vld [vmem:[#allocation8 + $0x228] sm:$0xff] }
 0x19a   :  { %v5555_v55 = vld [vmem:[#allocation8 + $0x1e8] sm:$0xff]  ;;  %2538 = vmatpush.bf16.msrb.mxu0 %v5563_v53 }
 0x19b   :  { %2340 = vmatpush.bf16.msrb.mxu3 %v5555_v55 }
 0x19e   :  { %v1014_v60 = vpop.f32.mrf.mxu2  ;;  %v1170_v63 = vpop.f32.mrf.mxu3 }
 0x1a1   :  { %v998_v23 = vpop.f32.mrf.mxu0  ;;  %v1154_v24 = vpop.f32.mrf.mxu1 }
 0x1a2   :  { %v1218_v26 = vrot.slane %v1154_v24, 1 }
 0x1a3   :  { %1332 = vmatmul.bf16.gmra.mxu2 %v5861_v38  ;;  %1585 = vmatmul.bf16.gmra.mxu3 %v5861_v38 }
 0x1a4   :  { %v5977_v27 = vadd.f32 %v1218_v26, %v998_v23  ;;  %1757 = vmatmul.bf16.gmra.mxu0 %v5902_v62  ;;  %1959 = vmatmul.bf16.gmra.mxu1 %v5902_v62 }
 0x1a6   :  { %v1016_v12 = vpop.f32.mrf.mxu2  ;;  %v1172_v13 = vpop.f32.mrf.mxu3 }
 0x1a7   :  { %v1221_v14 = vrot.slane %v1172_v13, 1 }
 0x1a9   :  { %v5973_v18 = vadd.f32 %v1221_v14, %v1016_v12  ;;  %v1000_v35 = vpop.f32.mrf.mxu0  ;;  %v1156_v36 = vpop.f32.mrf.mxu1 }
 0x1ae   :  { %v1018_v19 = vpop.f32.mrf.mxu2  ;;  %v1174_v21 = vpop.f32.mrf.mxu3 }
 0x1b1   :  { %v1002_v44 = vpop.f32.mrf.mxu0  ;;  %v1158_v45 = vpop.f32.mrf.mxu1 }
 0x1b3   :  { %1337 = vmatmul.bf16.gmra.mxu2 %v5879_v37  ;;  %1589 = vmatmul.bf16.gmra.mxu3 %v5879_v37 }
 0x1b4   :  { %1761 = vmatmul.bf16.gmra.mxu0 %v5912_v32  ;;  %1964 = vmatmul.bf16.gmra.mxu1 %v5912_v32 }
 0x1b6   :  { %v1020_v29 = vpop.f32.mrf.mxu2  ;;  %v1176_v33 = vpop.f32.mrf.mxu3 }
 0x1b7   :  { %v1222_v34 = vrot.slane %v1176_v33, 1  ;;  %v5546_v33 = vld [vmem:[#allocation8 + $0x1a0] sm:$0xff] }
 0x1b8   :  { %2185 = vmatpush.bf16.msrb.mxu2 %v5546_v33 }
 0x1b9   :  { %v5981_v39 = vadd.f32 %v1222_v34, %v1020_v29  ;;  %v1003_v49 = vpop.f32.mrf.mxu0  ;;  %v1159_v50 = vpop.f32.mrf.mxu1  ;;  %v5562_v29 = vld [vmem:[#allocation8 + $0x220] sm:$0xff] }
 0x1ba   :  { %v5554_v34 = vld [vmem:[#allocation8 + $0x1e0] sm:$0xff]  ;;  %2539 = vmatpush.bf16.msrb.mxu0 %v5562_v29 }
 0x1bb   :  { %2341 = vmatpush.bf16.msrb.mxu3 %v5554_v34 }
 0x1be   :  { %v1022_v40 = vpop.f32.mrf.mxu2  ;;  %v1178_v41 = vpop.f32.mrf.mxu3 }
 0x1c1   :  { %v1005_v60 = vpop.f32.mrf.mxu0  ;;  %v1161_v63 = vpop.f32.mrf.mxu1 }
 0x1c3   :  { %1342 = vmatmul.bf16.gmra.mxu2 %v5884_v58  ;;  %1593 = vmatmul.bf16.gmra.mxu3 %v5884_v58 }
 0x1c4   :  { %1765 = vmatmul.bf16.gmra.mxu0 %v5923_v1  ;;  %1969 = vmatmul.bf16.gmra.mxu1 %v5923_v1 }
 0x1c6   :  { %v1024_v46 = vpop.f32.mrf.mxu2  ;;  %v1180_v47 = vpop.f32.mrf.mxu3 }
 0x1c7   :  { %v1223_v48 = vrot.slane %v1180_v47, 1 }
 0x1c9   :  { %v5987_v51 = vadd.f32 %v1223_v48, %v1024_v46  ;;  %v1006_v5 = vpop.f32.mrf.mxu0  ;;  %v1162_v6 = vpop.f32.mrf.mxu1 }
 0x1ce   :  { %v1026_v56 = vpop.f32.mrf.mxu2  ;;  %v1182_v57 = vpop.f32.mrf.mxu3 }
 0x1d1   :  { %v1739_v14 = vpop.f32.mrf.mxu0  ;;  %v1937_v15 = vpop.f32.mrf.mxu1 }
 0x1d2   :  { %v5561_v15 = vld [vmem:[#allocation8 + $0x218] sm:$0xff] }
 0x1d3   :  { %1347 = vmatmul.bf16.gmra.mxu2 %v5892_v8  ;;  %1597 = vmatmul.bf16.gmra.mxu3 %v5892_v8 }
 0x1d4   :  { %1769 = vmatmul.bf16.gmra.mxu0 %v5778_v11  ;;  %1974 = vmatmul.bf16.gmra.mxu1 %v5778_v11 }
 0x1d5   :  { %2540 = vmatpush.bf16.msrb.mxu0 %v5561_v15 }
 0x1d6   :  { %v1028_v22 = vpop.f32.mrf.mxu2  ;;  %v1184_v2 = vpop.f32.mrf.mxu3 }
 0x1d7   :  { %v1224_v3 = vrot.slane %v1184_v2, 1 }
 0x1d9   :  { %v5993_v10 = vadd.f32 %v1224_v3, %v1028_v22  ;;  %v1740_v23 = vpop.f32.mrf.mxu0  ;;  %v1938_v24 = vpop.f32.mrf.mxu1 }
 0x1de   :  { %v1030_v12 = vpop.f32.mrf.mxu2  ;;  %v1186_v13 = vpop.f32.mrf.mxu3 }
 0x1e1   :  { %v6001_v40 = vpop.f32.mrf.mxu0  ;;  %v1940_v41 = vpop.f32.mrf.mxu1 }
 0x1e2   :  { %v2047_v48 = vrot.slane %v1940_v41, 2 }
 0x1e3   :  { %1352 = vmatmul.bf16.gmra.mxu2 %v5902_v62  ;;  %1601 = vmatmul.bf16.gmra.mxu3 %v5902_v62 }
 0x1e4   :  { %1772 = vmatmul.bf16.gmra.mxu0 %v5778_v11  ;;  %1977 = vmatmul.bf16.gmra.mxu1 %v5778_v11 }
 0x1e6   :  { %v1032_v17 = vpop.f32.mrf.mxu2  ;;  %v1188_v19 = vpop.f32.mrf.mxu3 }
 0x1e7   :  { %v1225_v21 = vrot.slane %v1188_v19, 1  ;;  %v5553_v19 = vld [vmem:[#allocation8 + $0x1d8] sm:$0xff] }
 0x1e8   :  { %2342 = vmatpush.bf16.msrb.mxu3 %v5553_v19 }
 0x1e9   :  { %v5999_v26 = vadd.f32 %v1225_v21, %v1032_v17  ;;  %v1744_v46 = vpop.f32.mrf.mxu0  ;;  %v1942_v47 = vpop.f32.mrf.mxu1  ;;  %v5545_v17 = vld [vmem:[#allocation8 + $0x198] sm:$0xff] }
 0x1ea   :  { %v2048_v49 = vrot.slane %v1942_v47, 2  ;;  %2186 = vmatpush.bf16.msrb.mxu2 %v5545_v17 }
 0x1ec   :  { %v2049_v50 = vsel %vm1438_vm14, %v2047_v48, %v2048_v49 }
 0x1ee   :  { %v1034_v35 = vpop.f32.mrf.mxu2  ;;  %v1190_v36 = vpop.f32.mrf.mxu3 }
 0x1f1   :  { %v6008_v55 = vpop.f32.mrf.mxu0  ;;  %v1945_v56 = vpop.f32.mrf.mxu1 }
 0x1f2   :  { %v2050_v2 = vrot.slane %v1945_v56, 2  ;;  %v1821_v56 = vrot.slane %v6001_v40, 1 }
 0x1f3   :  { %1357 = vmatmul.bf16.gmra.mxu2 %v5912_v32  ;;  %1605 = vmatmul.bf16.gmra.mxu3 %v5912_v32 }
 0x1f4   :  { %1775 = vmatmul.bf16.gmra.mxu0 %v5890_v28  ;;  %1980 = vmatmul.bf16.gmra.mxu1 %v5890_v28 }
 0x1f6   :  { %v1036_v44 = vpop.f32.mrf.mxu2  ;;  %v1192_v45 = vpop.f32.mrf.mxu3 }
 0x1f9   :  { %v1748_v63 = vpop.f32.mrf.mxu0  ;;  %v1947_v22 = vpop.f32.mrf.mxu1 }
 0x1fa   :  { %v2051_v3 = vrot.slane %v1947_v22, 2 }
 0x1fc   :  { %v6015_v5 = vsel %vm1438_vm14, %v2050_v2, %v2051_v3 }
 0x1fe   :  { %v1037_v53 = vpop.f32.mrf.mxu2  ;;  %v1193_v54 = vpop.f32.mrf.mxu3 }
 0x201   :  { %v6017_v13 = vpop.f32.mrf.mxu0  ;;  %v1950_v14 = vpop.f32.mrf.mxu1 }
 0x202   :  { %v2053_v33 = vrot.slane %v1950_v14, 2 }
 0x203   :  { %1362 = vmatmul.bf16.gmra.mxu2 %v5923_v1  ;;  %1609 = vmatmul.bf16.gmra.mxu3 %v5923_v1 }
 0x204   :  { %1779 = vmatmul.bf16.gmra.mxu0 %v5900_v61  ;;  %1985 = vmatmul.bf16.gmra.mxu1 %v5900_v61 }
 0x206   :  { %v1039_v57 = vpop.f32.mrf.mxu2  ;;  %v1195_v60 = vpop.f32.mrf.mxu3 }
 0x209   :  { %v1752_v24 = vpop.f32.mrf.mxu0  ;;  %v1952_v29 = vpop.f32.mrf.mxu1 }
 0x20a   :  { %v2054_v34 = vrot.slane %v1952_v29, 2  ;;  %v5544_v29 = vld [vmem:[#allocation8 + $0x190] sm:$0xff] }
 0x20b   :  { %2187 = vmatpush.bf16.msrb.mxu2 %v5544_v29 }
 0x20c   :  { %v6024_v35 = vsel %vm1438_vm14, %v2053_v33, %v2054_v34  ;;  %v5552_v33 = vld [vmem:[#allocation8 + $0x1d0] sm:$0xff] }
 0x20d   :  { %2343 = vmatpush.bf16.msrb.mxu3 %v5552_v33 }
 0x20e   :  { %v1040_v6 = vpop.f32.mrf.mxu2  ;;  %v1196_v12 = vpop.f32.mrf.mxu3 }
 0x20f   :  { %v5573_v6 = vld [vmem:[#allocation9 + $0x38] sm:$0xff] }
 0x210   :  { %2918 = vmatpush.bf16.msrb.mxu1 %v5573_v6 }
 0x211   :  { %v6026_v46 = vpop.f32.mrf.mxu0  ;;  %v1955_v47 = vpop.f32.mrf.mxu1 }
 0x212   :  { %v2056_v2 = vrot.slane %v1955_v47, 2 }
 0x213   :  { %1365 = vmatmul.bf16.gmra.mxu2 %v5778_v11  ;;  %1613 = vmatmul.bf16.gmra.mxu3 %v5778_v11 }
 0x214   :  { %1783 = vmatmul.bf16.gmra.mxu0 %v5910_v31  ;;  %1990 = vmatmul.bf16.gmra.mxu1 %v5910_v31 }
 0x216   :  { %v1328_v21 = vpop.f32.mrf.mxu2  ;;  %v1583_v23 = vpop.f32.mrf.mxu3 }
 0x217   :  { %v1439_v44 = vrot.slane %v1328_v21, 2 }
 0x219   :  { %v1756_v60 = vpop.f32.mrf.mxu0  ;;  %v1957_v63 = vpop.f32.mrf.mxu1 }
 0x21a   :  { %v2057_v3 = vrot.slane %v1957_v63, 2 }
 0x21c   :  { %v6038_v12 = vsel %vm1438_vm14, %v2056_v2, %v2057_v3 }
 0x21e   :  { %v1330_v36 = vpop.f32.mrf.mxu2  ;;  %v1584_v41 = vpop.f32.mrf.mxu3 }
 0x21f   :  { %v1440_v45 = vrot.slane %v1330_v36, 2  ;;  %v1822_v41 = vrot.slane %v6008_v55, 1 }
 0x221   :  { %v1441_v48 = vsel %vm1438_vm14, %v1439_v44, %v1440_v45  ;;  %v6040_v21 = vpop.f32.mrf.mxu0  ;;  %v1960_v40 = vpop.f32.mrf.mxu1 }
 0x222   :  { %v1495_v49 = vadd.f32 %v1441_v48, %v5918_v42  ;;  %v2059_v48 = vrot.slane %v1960_v40, 2 }
 0x223   :  { %1368 = vmatmul.bf16.gmra.mxu2 %v5778_v11  ;;  %1616 = vmatmul.bf16.gmra.mxu3 %v5778_v11 }
 0x224   :  { %1787 = vmatmul.bf16.gmra.mxu0 %v5921_v0  ;;  %1995 = vmatmul.bf16.gmra.mxu1 %v5921_v0 }
 0x226   :  { %v1333_v53 = vpop.f32.mrf.mxu2  ;;  %v1586_v54 = vpop.f32.mrf.mxu3 }
 0x227   :  { %v1651_v57 = vadd.f32 %v1586_v54, %v1495_v49  ;;  %v1442_v17 = vrot.slane %v1333_v53, 2 }
 0x229   :  { %v1849_v22 = vadd.f32 %v1821_v56, %v1651_v57  ;;  %v1962_v45 = vpop.f32.mrf.mxu1 }
 0x22a   :  { %v2060_v49 = vrot.slane %v1962_v45, 2 }
 0x22b   :  { %v6035_v42 = vadd.f32 %v2049_v50, %v1849_v22  ;;  %v5560_v50 = vld [vmem:[#allocation8 + $0x210] sm:$0xff] }
 0x22c   :  { %2541 = vmatpush.bf16.msrb.mxu0 %v5560_v50  ;;  %v6053_v54 = vsel %vm1438_vm14, %v2059_v48, %v2060_v49 }
 0x22e   :  { %v1335_v14 = vpop.f32.mrf.mxu2  ;;  %v1588_v15 = vpop.f32.mrf.mxu3 }
 0x22f   :  { %v1443_v19 = vrot.slane %v1335_v14, 2  ;;  %v1823_v14 = vrot.slane %v6017_v13, 1 }
 0x231   :  { %v1444_v23 = vsel %vm1438_vm14, %v1442_v17, %v1443_v19  ;;  %v6057_v55 = vpop.f32.mrf.mxu1 }
 0x232   :  { %v1496_v24 = vadd.f32 %v1444_v23, %v5931_v9  ;;  %v1760_v9 = vpop.f32.mrf.mxu0 }
 0x233   :  { %1373 = vmatmul.bf16.gmra.mxu2 %v5890_v28  ;;  %1619 = vmatmul.bf16.gmra.mxu3 %v5890_v28  ;;  %v1824_v9 = vrot.slane %v6026_v46, 1 }
 0x234   :  { %1791 = vmatmul.bf16.gmra.mxu0 %v5929_v7  ;;  %2000 = vmatmul.bf16.gmra.mxu1 %v5929_v7 }
 0x236   :  { %v1338_v34 = vpop.f32.mrf.mxu2  ;;  %v1590_v36 = vpop.f32.mrf.mxu3 }
 0x237   :  { %v1652_v44 = vadd.f32 %v1590_v36, %v1496_v24  ;;  %v1445_v60 = vrot.slane %v1338_v34, 2 }
 0x239   :  { %v1850_v47 = vadd.f32 %v1822_v41, %v1652_v44  ;;  %v6066_v19 = vpop.f32.mrf.mxu1  ;;  %v5572_v41 = vld [vmem:[#allocation9 + $0x30] sm:$0xff] }
 0x23a   :  { %v6055_v22 = vpop.f32.mrf.mxu0  ;;  %2919 = vmatpush.bf16.msrb.mxu1 %v5572_v41 }
 0x23b   :  { %v6050_v53 = vadd.f32 %v6015_v5, %v1850_v47 }
 0x23e   :  { %v1340_v56 = vpop.f32.mrf.mxu2  ;;  %v1592_v57 = vpop.f32.mrf.mxu3 }
 0x23f   :  { %v1446_v63 = vrot.slane %v1340_v56, 2  ;;  %v5559_v56 = vld [vmem:[#allocation8 + $0x208] sm:$0xff] }
 0x240   :  { %v5551_v57 = vld [vmem:[#allocation8 + $0x1c8] sm:$0xff]  ;;  %2542 = vmatpush.bf16.msrb.mxu0 %v5559_v56 }
 0x241   :  { %v1447_v2 = vsel %vm1438_vm14, %v1445_v60, %v1446_v63  ;;  %v6073_v34 = vpop.f32.mrf.mxu1  ;;  %2344 = vmatpush.bf16.msrb.mxu3 %v5551_v57  ;;  %v1826_v57 = vrot.slane %v6055_v22, 1 }
 0x242   :  { %v1497_v3 = vadd.f32 %v1447_v2, %v5949_v30  ;;  %v1764_v17 = vpop.f32.mrf.mxu0 }
 0x243   :  { %1378 = vmatmul.bf16.gmra.mxu2 %v5900_v61  ;;  %1623 = vmatmul.bf16.gmra.mxu3 %v5900_v61  ;;  %v5558_v17 = vld [vmem:[#allocation8 + $0x200] sm:$0xff] }
 0x244   :  { %1795 = vmatmul.bf16.gmra.mxu0 %v5937_v16  ;;  %2005 = vmatmul.bf16.gmra.mxu1 %v5937_v16 }
 0x245   :  { %2543 = vmatpush.bf16.msrb.mxu0 %v5558_v17 }
 0x246   :  { %v1343_v5 = vpop.f32.mrf.mxu2  ;;  %v1594_v6 = vpop.f32.mrf.mxu3 }
 0x247   :  { %v1653_v15 = vadd.f32 %v1594_v6, %v1497_v3  ;;  %v1448_v50 = vrot.slane %v1343_v5, 2 }
 0x249   :  { %v1851_v40 = vadd.f32 %v1823_v14, %v1653_v15  ;;  %v6082_v48 = vpop.f32.mrf.mxu1 }
 0x24a   :  { %v6071_v33 = vpop.f32.mrf.mxu0 }
 0x24b   :  { %v6069_v23 = vadd.f32 %v6024_v35, %v1851_v40 }
 0x24e   :  { %v1345_v30 = vpop.f32.mrf.mxu2  ;;  %v1596_v24 = vpop.f32.mrf.mxu3 }
 0x24f   :  { %v1449_v29 = vrot.slane %v1345_v30, 2  ;;  %v1825_v30 = vrot.slane %v6040_v21, 1  ;;  %v5571_v21 = vld [vmem:[#allocation9 + $0x28] sm:$0xff] }
 0x250   :  { %2920 = vmatpush.bf16.msrb.mxu1 %v5571_v21 }
 0x251   :  { %v1450_v36 = vsel %vm1438_vm14, %v1448_v50, %v1449_v29  ;;  %v1975_v46 = vpop.f32.mrf.mxu1 }
 0x252   :  { %v1498_v13 = vadd.f32 %v1450_v36, %v5955_v43  ;;  %v1768_v47 = vpop.f32.mrf.mxu0  ;;  %v5543_v43 = vld [vmem:[#allocation8 + $0x188] sm:$0xff]  ;;  %v5550_v46 = vld [vmem:[#allocation8 + $0x1c0] sm:$0xff] }
 0x253   :  { %1383 = vmatmul.bf16.gmra.mxu2 %v5910_v31  ;;  %1627 = vmatmul.bf16.gmra.mxu3 %v5910_v31 }
 0x254   :  { %2188 = vmatpush.bf16.msrb.mxu2 %v5543_v43  ;;  %1799 = vmatmul.bf16.gmra.mxu0 %v5945_v25 }
 0x255   :  { %2010 = vmatmul.bf16.gmra.mxu1 %v5945_v25  ;;  %2345 = vmatpush.bf16.msrb.mxu3 %v5550_v46 }
 0x256   :  { %v1348_v35 = vpop.f32.mrf.mxu2  ;;  %v1598_v44 = vpop.f32.mrf.mxu3 }
 0x257   :  { %v1654_v45 = vadd.f32 %v1598_v44, %v1498_v13  ;;  %v1451_v3 = vrot.slane %v1348_v35, 2 }
 0x259   :  { %v1852_v49 = vadd.f32 %v1824_v9, %v1654_v45  ;;  %v1976_v29 = vpop.f32.mrf.mxu1 }
 0x25a   :  { %v1770_v6 = vpop.f32.mrf.mxu0 }
 0x25b   :  { %v6085_v60 = vadd.f32 %v6038_v12, %v1852_v49  ;;  %v5542_v6 = vld [vmem:[#allocation8 + $0x180] sm:$0xff] }
 0x25c   :  { %2189 = vmatpush.bf16.msrb.mxu2 %v5542_v6 }
 0x25e   :  { %v1350_v63 = vpop.f32.mrf.mxu2  ;;  %v1600_v2 = vpop.f32.mrf.mxu3 }
 0x25f   :  { %v1452_v5 = vrot.slane %v1350_v63, 2  ;;  %v2062_v2 = vrot.slane %v6057_v55, 2 }
 0x261   :  { %v1453_v14 = vsel %vm1438_vm14, %v1451_v3, %v1452_v5  ;;  %v1978_v45 = vpop.f32.mrf.mxu1 }
 0x262   :  { %v1499_v15 = vadd.f32 %v1453_v14, %v5961_v52  ;;  %v1771_v50 = vpop.f32.mrf.mxu0 }
 0x263   :  { %1388 = vmatmul.bf16.gmra.mxu2 %v5921_v0  ;;  %1631 = vmatmul.bf16.gmra.mxu3 %v5921_v0  ;;  %v2066_v50 = vrot.slane %v6082_v48, 2 }
 0x264   :  { %1803 = vmatmul.bf16.gmra.mxu0 %v5778_v11 }
 0x265   :  { %2015 = vmatmul.bf16.gmra.mxu1 %v5778_v11 }
 0x266   :  { %v1353_v12 = vpop.f32.mrf.mxu2  ;;  %v1602_v40 = vpop.f32.mrf.mxu3 }
 0x267   :  { %v1655_v24 = vadd.f32 %v1602_v40, %v1499_v15  ;;  %v1454_v35 = vrot.slane %v1353_v12, 2 }
 0x269   :  { %v1853_v36 = vadd.f32 %v1825_v30, %v1655_v24  ;;  %v1979_v3 = vpop.f32.mrf.mxu1 }
 0x26a   :  { %v1773_v9 = vpop.f32.mrf.mxu0 }
 0x26b   :  { %v6095_v52 = vadd.f32 %v6053_v54, %v1853_v36  ;;  %v2063_v54 = vrot.slane %v6066_v19, 2 }
 0x26d   :  { %v2064_v14 = vsel %vm1438_vm14, %v2062_v2, %v2063_v54 }
 0x26e   :  { %v1355_v41 = vpop.f32.mrf.mxu2  ;;  %v1604_v13 = vpop.f32.mrf.mxu3 }
 0x26f   :  { %v1455_v44 = vrot.slane %v1355_v41, 2  ;;  %v1827_v41 = vrot.slane %v6071_v33, 1 }
 0x271   :  { %v1456_v47 = vsel %vm1438_vm14, %v1454_v35, %v1455_v44  ;;  %v6109_v22 = vpop.f32.mrf.mxu1  ;;  %v2065_v35 = vrot.slane %v6073_v34, 2 }
 0x272   :  { %v1500_v49 = vadd.f32 %v1456_v47, %v5969_v4  ;;  %v1774_v4 = vpop.f32.mrf.mxu0 }
 0x273   :  { %1393 = vmatmul.bf16.gmra.mxu2 %v5929_v7  ;;  %1635 = vmatmul.bf16.gmra.mxu3 %v5929_v7 }
 0x274   :  { %2544 = vmatmul.bf16.vlgmr.msrb.gmra.mxu0 %v5778_v11 }
 0x276   :  { %v1358_v56 = vpop.f32.mrf.mxu2  ;;  %v1606_v43 = vpop.f32.mrf.mxu3 }
 0x277   :  { %v1656_v63 = vadd.f32 %v1606_v43, %v1500_v49  ;;  %v1457_v12 = vrot.slane %v1358_v56, 2 }
 0x279   :  { %v1854_v5 = vadd.f32 %v1826_v57, %v1656_v63  ;;  %v1983_v9 = vpop.f32.mrf.mxu1  ;;  %v5570_v57 = vld [vmem:[#allocation9 + $0x20] sm:$0xff] }
 0x27a   :  { %v1776_v30 = vpop.f32.mrf.mxu0  ;;  %2921 = vmatpush.bf16.msrb.mxu1 %v5570_v57 }
 0x27b   :  { %v6107_v15 = vadd.f32 %v2064_v14, %v1854_v5 }
 0x27e   :  { %v1360_v19 = vpop.f32.mrf.mxu2  ;;  %v1608_v17 = vpop.f32.mrf.mxu3 }
 0x27f   :  { %v1458_v40 = vrot.slane %v1360_v19, 2 }
 0x281   :  { %v1459_v55 = vsel %vm1438_vm14, %v1457_v12, %v1458_v40  ;;  %v6124_v56 = vpop.f32.mrf.mxu1 }
 0x282   :  { %v1501_v24 = vadd.f32 %v1459_v55, %v5977_v27  ;;  %v1778_v44 = vpop.f32.mrf.mxu0  ;;  %v2067_v27 = vsel %vm1438_vm14, %v2065_v35, %v2066_v50  ;;  %v1828_v35 = vrot.slane %v1776_v30, 1 }
 0x283   :  { %1398 = vmatmul.bf16.gmra.mxu2 %v5937_v16  ;;  %1639 = vmatmul.bf16.gmra.mxu3 %v5937_v16 }
 0x284   :  { %2547 = vmatmul.bf16.gmra.mxu0 %v5861_v38 }
 0x286   :  { %v1363_v29 = vpop.f32.mrf.mxu2  ;;  %v1610_v36 = vpop.f32.mrf.mxu3 }
 0x287   :  { %v1657_v13 = vadd.f32 %v1610_v36, %v1501_v24  ;;  %v2069_v36 = vrot.slane %v1983_v9, 2 }
 0x289   :  { %v1855_v45 = vadd.f32 %v1827_v41, %v1657_v13  ;;  %v1988_v43 = vpop.f32.mrf.mxu1 }
 0x28a   :  { %v6122_v54 = vpop.f32.mrf.mxu0 }
 0x28b   :  { %v6120_v47 = vadd.f32 %v2067_v27, %v1855_v45  ;;  %v2068_v45 = vrot.slane %v6109_v22, 2 }
 0x28e   :  { %v1364_v49 = vpop.f32.mrf.mxu2  ;;  %v1612_v21 = vpop.f32.mrf.mxu3 }
 0x291   :  { %v6131_v3 = vpop.f32.mrf.mxu1 }
 0x292   :  { %v1782_v48 = vpop.f32.mrf.mxu0 }
 0x293   :  { %1403 = vmatmul.bf16.gmra.mxu2 %v5945_v25  ;;  %1643 = vmatmul.bf16.gmra.mxu3 %v5945_v25 }
 0x294   :  { %2550 = vmatmul.bf16.gmra.mxu0 %v5879_v37 }
 0x296   :  { %v1366_v33 = vpop.f32.mrf.mxu2  ;;  %v1614_v34 = vpop.f32.mrf.mxu3 }
 0x297   :  { %v5569_v33 = vld [vmem:[#allocation9 + $0x18] sm:$0xff] }
 0x298   :  { %2922 = vmatpush.bf16.msrb.mxu1 %v5569_v33 }
 0x299   :  { %v6136_v14 = vpop.f32.mrf.mxu1 }
 0x29a   :  { %v6129_v4 = vpop.f32.mrf.mxu0 }
 0x29e   :  { %v1367_v63 = vpop.f32.mrf.mxu2  ;;  %v1615_v2 = vpop.f32.mrf.mxu3 }
 0x2a1   :  { %v6140_v24 = vpop.f32.mrf.mxu1 }
 0x2a2   :  { %v1786_v46 = vpop.f32.mrf.mxu0 }
 0x2a3   :  { %1406 = vmatmul.bf16.gmra.mxu2 %v5778_v11  ;;  %1647 = vmatmul.bf16.gmra.mxu3 %v5778_v11 }
 0x2a4   :  { %2555 = vmatmul.bf16.gmra.mxu0 %v5884_v58 }
 0x2a6   :  { %v1369_v5 = vpop.f32.mrf.mxu2  ;;  %v1617_v6 = vpop.f32.mrf.mxu3 }
 0x2a7   :  { %v1460_v12 = vrot.slane %v1369_v5, 2  ;;  %v2072_v6 = vrot.slane %v1988_v43, 2 }
 0x2a9   :  { %v6148_v49 = vpop.f32.mrf.mxu1 }
 0x2aa   :  { %v6138_v55 = vpop.f32.mrf.mxu0 }
 0x2ae   :  { %v1371_v19 = vpop.f32.mrf.mxu2  ;;  %v1618_v17 = vpop.f32.mrf.mxu3 }
 0x2af   :  { %v1461_v40 = vrot.slane %v1371_v19, 2  ;;  %v1829_v17 = vrot.slane %v6122_v54, 1 }
 0x2b1   :  { %v1462_v50 = vsel %vm1438_vm14, %v1460_v12, %v1461_v40  ;;  %v6155_v30 = vpop.f32.mrf.mxu1  ;;  %v2071_v40 = vrot.slane %v6124_v56, 2 }
 0x2b2   :  { %v1502_v29 = vadd.f32 %v1462_v50, %v5943_v20  ;;  %v1790_v27 = vpop.f32.mrf.mxu0  ;;  %v2070_v20 = vsel %vm1438_vm14, %v2068_v45, %v2069_v36 }
 0x2b3   :  { %2190 = vmatmul.bf16.vlgmr.msrb.gmra.mxu2 %v5778_v11  ;;  %2346 = vmatmul.bf16.vlgmr.msrb.gmra.mxu3 %v5778_v11  ;;  %v2075_v27 = vrot.slane %v6136_v14, 2 }
 0x2b4   :  { %2560 = vmatmul.bf16.gmra.mxu0 %v5892_v8 }
 0x2b6   :  { %v1374_v41 = vpop.f32.mrf.mxu2  ;;  %v1620_v13 = vpop.f32.mrf.mxu3 }
 0x2b7   :  { %v1658_v44 = vadd.f32 %v1620_v13, %v1502_v29  ;;  %v1463_v63 = vrot.slane %v1374_v41, 2 }
 0x2b9   :  { %v1856_v21 = vadd.f32 %v1828_v35, %v1658_v44  ;;  %v6164_v29 = vpop.f32.mrf.mxu1 }
 0x2ba   :  { %v6153_v2 = vpop.f32.mrf.mxu0 }
 0x2bb   :  { %v6151_v34 = vadd.f32 %v2070_v20, %v1856_v21  ;;  %v1830_v20 = vrot.slane %v6129_v4, 1 }
 0x2be   :  { %v1376_v48 = vpop.f32.mrf.mxu2  ;;  %v1622_v57 = vpop.f32.mrf.mxu3 }
 0x2bf   :  { %v1464_v9 = vrot.slane %v1376_v48, 2  ;;  %v2074_v57 = vrot.slane %v6131_v3, 2 }
 0x2c1   :  { %v1465_v22 = vsel %vm1438_vm14, %v1463_v63, %v1464_v9  ;;  %v6171_v45 = vpop.f32.mrf.mxu1 }
 0x2c2   :  { %v1503_v5 = vadd.f32 %v1465_v22, %v5965_v59  ;;  %v1794_v50 = vpop.f32.mrf.mxu0  ;;  %v2073_v59 = vsel %vm1438_vm14, %v2071_v40, %v2072_v6  ;;  %v2078_v40 = vrot.slane %v6148_v49, 2 }
 0x2c3   :  { %2193 = vmatmul.bf16.gmra.mxu2 %v5861_v38  ;;  %2349 = vmatmul.bf16.gmra.mxu3 %v5861_v38 }
 0x2c4   :  { %2565 = vmatmul.bf16.gmra.mxu0 %v5902_v62 }
 0x2c6   :  { %v1379_v46 = vpop.f32.mrf.mxu2  ;;  %v1624_v19 = vpop.f32.mrf.mxu3 }
 0x2c7   :  { %v1659_v12 = vadd.f32 %v1624_v19, %v1503_v5  ;;  %v1466_v35 = vrot.slane %v1379_v46, 2 }
 0x2c9   :  { %v1857_v36 = vadd.f32 %v1829_v17, %v1659_v12  ;;  %v6181_v9 = vpop.f32.mrf.mxu1  ;;  %v5568_v12 = vld [vmem:[#allocation9 + $0x10] sm:$0xff] }
 0x2ca   :  { %v6169_v43 = vpop.f32.mrf.mxu0  ;;  %2923 = vmatpush.bf16.msrb.mxu1 %v5568_v12 }
 0x2cb   :  { %v6167_v41 = vadd.f32 %v2073_v59, %v1857_v36  ;;  %v1831_v59 = vrot.slane %v6138_v55, 1 }
 0x2ce   :  { %v1381_v13 = vpop.f32.mrf.mxu2  ;;  %v1626_v38 = vpop.f32.mrf.mxu3 }
 0x2cf   :  { %v1467_v44 = vrot.slane %v1381_v13, 2  ;;  %v2077_v38 = vrot.slane %v6140_v24, 2  ;;  %v2081_v24 = vrot.slane %v6164_v29, 2 }
 0x2d1   :  { %v1468_v54 = vsel %vm1438_vm14, %v1466_v35, %v1467_v44 }
 0x2d2   :  { %v1504_v56 = vadd.f32 %v1468_v54, %v5973_v18  ;;  %v1798_v63 = vpop.f32.mrf.mxu0  ;;  %v2076_v18 = vsel %vm1438_vm14, %v2074_v57, %v2075_v27  ;;  %v6188_v17 = vpop.f32.mrf.mxu1  ;;  %v2079_v54 = vsel %vm1438_vm14, %v2077_v38, %v2078_v40  ;;  %v1833_v38 = vrot.slane %v6169_v43, 1 }
 0x2d3   :  { %2196 = vmatmul.bf16.gmra.mxu2 %v5879_v37  ;;  %2352 = vmatmul.bf16.gmra.mxu3 %v5879_v37 }
 0x2d4   :  { %2570 = vmatmul.bf16.gmra.mxu0 %v5912_v32 }
 0x2d6   :  { %v1384_v21 = vpop.f32.mrf.mxu2  ;;  %v1628_v33 = vpop.f32.mrf.mxu3 }
 0x2d7   :  { %v1660_v48 = vadd.f32 %v1628_v33, %v1504_v56  ;;  %v1469_v46 = vrot.slane %v1384_v21, 2 }
 0x2d9   :  { %v1858_v22 = vadd.f32 %v1830_v20, %v1660_v48 }
 0x2da   :  { %v6186_v14 = vpop.f32.mrf.mxu0  ;;  %v6198_v44 = vpop.f32.mrf.mxu1 }
 0x2db   :  { %v6184_v5 = vadd.f32 %v2076_v18, %v1858_v22  ;;  %v1832_v22 = vrot.slane %v6153_v2, 1  ;;  %v5567_v2 = vld [vmem:[#allocation9 + $0x8] sm:$0xff]  ;;  %v2087_v43 = vrot.slane %v6198_v44, 2 }
 0x2dc   :  { %2924 = vmatpush.bf16.msrb.mxu1 %v5567_v2  ;;  %v6249_v2 = vld [vmem:[#allocation2] sm:$0xff] }
 0x2de   :  { %v1386_v37 = vpop.f32.mrf.mxu2  ;;  %v1630_v6 = vpop.f32.mrf.mxu3 }
 0x2df   :  { %v1470_v19 = vrot.slane %v1386_v37, 2  ;;  %v2080_v37 = vrot.slane %v6155_v30, 2  ;;  %v2084_v30 = vrot.slane %v6181_v9, 2 }
 0x2e1   :  { %v1471_v4 = vsel %vm1438_vm14, %v1469_v46, %v1470_v19 }
 0x2e2   :  { %v1505_v3 = vadd.f32 %v1471_v4, %v5981_v39  ;;  %v1802_v35 = vpop.f32.mrf.mxu0  ;;  %v2016_v48 = vpop.f32.mrf.mxu1 }
 0x2e3   :  { %2200 = vmatmul.bf16.gmra.mxu2 %v5884_v58  ;;  %2356 = vmatmul.bf16.gmra.mxu3 %v5884_v58 }
 0x2e4   :  { %2575 = vmatmul.bf16.gmra.mxu0 %v5923_v1 }
 0x2e6   :  { %v1389_v50 = vpop.f32.mrf.mxu2  ;;  %v1632_v36 = vpop.f32.mrf.mxu3 }
 0x2e7   :  { %v1661_v13 = vadd.f32 %v1632_v36, %v1505_v3  ;;  %v1472_v21 = vrot.slane %v1389_v50, 2 }
 0x2e9   :  { %v1859_v39 = vadd.f32 %v1831_v59, %v1661_v13 }
 0x2ea   :  { %v1804_v49 = vpop.f32.mrf.mxu0  ;;  %v2017_v19 = vpop.f32.mrf.mxu1 }
 0x2eb   :  { %v6201_v56 = vadd.f32 %v2079_v54, %v1859_v39  ;;  %v2083_v39 = vrot.slane %v6171_v45, 2 }
 0x2ee   :  { %v1391_v58 = vpop.f32.mrf.mxu2  ;;  %v1634_v27 = vpop.f32.mrf.mxu3 }
 0x2ef   :  { %v1473_v33 = vrot.slane %v1391_v58, 2 }
 0x2f1   :  { %v1474_v20 = vsel %vm1438_vm14, %v1472_v21, %v1473_v33 }
 0x2f2   :  { %v1506_v55 = vadd.f32 %v1474_v20, %v5987_v51  ;;  %v1805_v6 = vpop.f32.mrf.mxu0  ;;  %v2082_v51 = vsel %vm1438_vm14, %v2080_v37, %v2081_v24  ;;  %v1834_v24 = vrot.slane %v6186_v14, 1 }
 0x2f3   :  { %2204 = vmatmul.bf16.gmra.mxu2 %v5892_v8  ;;  %2360 = vmatmul.bf16.gmra.mxu3 %v5892_v8 }
 0x2f4   :  { %2580 = vmatmul.bf16.gmra.mxu0 %v5778_v11 }
 0x2f6   :  { %v1394_v57 = vpop.f32.mrf.mxu2  ;;  %v1636_v63 = vpop.f32.mrf.mxu3 }
 0x2f7   :  { %v1662_v18 = vadd.f32 %v1636_v63, %v1506_v55  ;;  %v1475_v3 = vrot.slane %v1394_v57, 2  ;;  %v2086_v63 = vrot.slane %v6188_v17, 2 }
 0x2f9   :  { %v1860_v46 = vadd.f32 %v1832_v22, %v1662_v18  ;;  %v2088_v37 = vsel %vm1438_vm14, %v2086_v63, %v2087_v43 }
 0x2fa   :  { %v2545_v50 = vpop.f32.mrf.mxu0 }
 0x2fb   :  { %v6212_v4 = vadd.f32 %v2082_v51, %v1860_v46  ;;  %v5566_v51 = vld [vmem:[#allocation9] sm:$0xff] }
 0x2fc   :  { %2925 = vmatpush.bf16.msrb.mxu1 %v5566_v51 }
 0x2fe   :  { %v1396_v12 = vpop.f32.mrf.mxu2  ;;  %v1638_v8 = vpop.f32.mrf.mxu3 }
 0x2ff   :  { %v1476_v40 = vrot.slane %v1396_v12, 2 }
 0x301   :  { %v1477_v29 = vsel %vm1438_vm14, %v1475_v3, %v1476_v40 }
 0x302   :  { %v1507_v36 = vadd.f32 %v1477_v29, %v5993_v10  ;;  %v2546_v54 = vpop.f32.mrf.mxu0  ;;  %v2085_v10 = vsel %vm1438_vm14, %v2083_v39, %v2084_v30  ;;  %v6253_v30 = vpack.c.bf16 %v6249_v2, %v6249_v2  ;;  %v5589_v39 = vld [vmem:[#allocation9 + $0xb8] sm:$0xff] }
 0x303   :  { %2208 = vmatmul.bf16.gmra.mxu2 %v5902_v62  ;;  %2364 = vmatmul.bf16.gmra.mxu3 %v5902_v62 }
 0x304   :  { %2585 = vmatmul.bf16.gmra.mxu0 %v5778_v11  ;;  %2926 = vmatmul.bf16.vlgmr.msrb.gmra.mxu1 %v6253_v30 }
 0x305   :  { %3272 = vmatpush.bf16.msra.mxu3 %v5589_v39 }
 0x306   :  { %v1399_v59 = vpop.f32.mrf.mxu2  ;;  %v1640_v13 = vpop.f32.mrf.mxu3 }
 0x307   :  { %v1663_v35 = vadd.f32 %v1640_v13, %v1507_v36  ;;  %v1478_v33 = vrot.slane %v1399_v59, 2 }
 0x309   :  { %v1861_v58 = vadd.f32 %v1833_v38, %v1663_v35  ;;  %v5605_v35 = vld [vmem:[#allocation9 + $0x138] sm:$0xff] }
 0x30a   :  { %v2548_v20 = vpop.f32.mrf.mxu0  ;;  %3682 = vmatpush.bf16.msra.mxu1 %v5605_v35 }
 0x30b   :  { %v6223_v27 = vadd.f32 %v2085_v10, %v1861_v58 }
 0x30e   :  { %v1401_v62 = vpop.f32.mrf.mxu2  ;;  %v1642_v21 = vpop.f32.mrf.mxu3 }
 0x30f   :  { %v1479_v49 = vrot.slane %v1401_v62, 2  ;;  %v5581_v62 = vld [vmem:[#allocation9 + $0x78] sm:$0xff] }
 0x310   :  { %3074 = vmatpush.bf16.msra.mxu2 %v5581_v62  ;;  %v5597_v21 = vld [vmem:[#allocation9 + $0xf8] sm:$0xff]  ;;  %v5588_v62 = vld [vmem:[#allocation9 + $0xb0] sm:$0xff] }
 0x311   :  { %v1480_v9 = vsel %vm1438_vm14, %v1478_v33, %v1479_v49  ;;  %3526 = vmatpush.bf16.msra.mxu0 %v5597_v21  ;;  %v5580_v21 = vld [vmem:[#allocation9 + $0x70] sm:$0xff]  ;;  %3273 = vmatpush.bf16.msra.mxu3 %v5588_v62  ;;  %v5587_v62 = vld [vmem:[#allocation9 + $0xa8] sm:$0xff] }
 0x312   :  { %v1508_v48 = vadd.f32 %v1480_v9, %v5999_v26  ;;  %v2549_v22 = vpop.f32.mrf.mxu0 }
 0x313   :  { %2212 = vmatmul.bf16.gmra.mxu2 %v5912_v32  ;;  %2368 = vmatmul.bf16.gmra.mxu3 %v5912_v32 }
 0x314   :  { %2588 = vmatmul.bf16.gmra.mxu0 %v5890_v28  ;;  %3075 = vmatpush.bf16.msra.mxu2 %v5580_v21 }
 0x315   :  { %3274 = vmatpush.bf16.msra.mxu3 %v5587_v62 }
 0x316   :  { %v1404_v45 = vpop.f32.mrf.mxu2  ;;  %v1644_v55 = vpop.f32.mrf.mxu3 }
 0x317   :  { %v1664_v57 = vadd.f32 %v1644_v55, %v1508_v48 }
 0x319   :  { %v1862_v18 = vadd.f32 %v1834_v24, %v1664_v57  ;;  %v6269_v24 = vld [vmem:[%s6936_s4] ss:$0 sm:$0xff] }
 0x31a   :  { %v2551_v32 = vpop.f32.mrf.mxu0 }
 0x31b   :  { %v6234_v26 = vadd.f32 %v2088_v37, %v1862_v18  ;;  %v2655_v43 = vrot.slane %v2551_v32, 2 }
 0x31e   :  { %v1405_v6 = vpop.f32.mrf.mxu2  ;;  %v1646_v46 = vpop.f32.mrf.mxu3 }
 0x322   :  { %v2553_v19 = vpop.f32.mrf.mxu0 }
 0x323   :  { %2216 = vmatmul.bf16.gmra.mxu2 %v5923_v1  ;;  %2372 = vmatmul.bf16.gmra.mxu3 %v5923_v1  ;;  %v2656_v33 = vrot.slane %v2553_v19, 2 }
 0x324   :  { %2591 = vmatmul.bf16.gmra.mxu0 %v5900_v61 }
 0x326   :  { %v1407_v44 = vpop.f32.mrf.mxu2  ;;  %v1648_v14 = vpop.f32.mrf.mxu3 }
 0x32a   :  { %v6239_v8 = vpop.f32.mrf.mxu0 }
 0x32b   :  { %v2658_v51 = vrot.slane %v6239_v8, 2 }
 0x32e   :  { %v1408_v17 = vpop.f32.mrf.mxu2  ;;  %v1649_v12 = vpop.f32.mrf.mxu3 }
 0x332   :  { %v2558_v1 = vpop.f32.mrf.mxu0 }
 0x333   :  { %2220 = vmatmul.bf16.gmra.mxu2 %v5778_v11  ;;  %2376 = vmatmul.bf16.gmra.mxu3 %v5778_v11  ;;  %v2659_v46 = vrot.slane %v2558_v1, 2  ;;  %v5595_v1 = vld [vmem:[#allocation9 + $0xe8] sm:$0xff] }
 0x334   :  { %2596 = vmatmul.bf16.gmra.mxu0 %v5910_v31 }
 0x336   :  { %v2191_v3 = vpop.f32.mrf.mxu2  ;;  %v2347_v40 = vpop.f32.mrf.mxu3 }
 0x337   :  { %v2660_v40 = vsel %vm1438_vm14, %v2658_v51, %v2659_v46 }
 0x33a   :  { %v6244_v36 = vpop.f32.mrf.mxu0 }
 0x33e   :  { %v2192_v50 = vpop.f32.mrf.mxu2  ;;  %v2348_v29 = vpop.f32.mrf.mxu3 }
 0x342   :  { %v6256_v38 = vpop.f32.mrf.mxu0 }
 0x343   :  { %2224 = vmatmul.bf16.gmra.mxu2 %v5778_v11  ;;  %2380 = vmatmul.bf16.gmra.mxu3 %v5778_v11 }
 0x344   :  { %2601 = vmatmul.bf16.gmra.mxu0 %v5921_v0 }
 0x346   :  { %v2194_v59 = vpop.f32.mrf.mxu2  ;;  %v2350_v13 = vpop.f32.mrf.mxu3 }
 0x34a   :  { %v6258_v10 = vpop.f32.mrf.mxu0 }
 0x34e   :  { %v2195_v54 = vpop.f32.mrf.mxu2  ;;  %v2351_v58 = vpop.f32.mrf.mxu3 }
 0x34f   :  { %v5594_v54 = vld [vmem:[#allocation9 + $0xe0] sm:$0xff]  ;;  %v5604_v58 = vld [vmem:[#allocation9 + $0x130] sm:$0xff] }
 0x350   :  { %3683 = vmatpush.bf16.msra.mxu1 %v5604_v58  ;;  %v5603_v58 = vld [vmem:[#allocation9 + $0x128] sm:$0xff] }
 0x352   :  { %v6264_v45 = vpop.f32.mrf.mxu0 }
 0x353   :  { %2227 = vmatmul.bf16.gmra.mxu2 %v5890_v28  ;;  %2383 = vmatmul.bf16.gmra.mxu3 %v5890_v28  ;;  %v2657_v28 = vsel %vm1438_vm14, %v2655_v43, %v2656_v33  ;;  %v5593_v33 = vld [vmem:[#allocation9 + $0xd8] sm:$0xff] }
 0x354   :  { %2606 = vmatmul.bf16.gmra.mxu0 %v5929_v7  ;;  %3684 = vmatpush.bf16.msra.mxu1 %v5603_v58 }
 0x356   :  { %v2197_v49 = vpop.f32.mrf.mxu2  ;;  %v2353_v20 = vpop.f32.mrf.mxu3 }
 0x357   :  { %v2259_v9 = vadd.f32 %v2197_v49, %v6035_v42  ;;  %v2429_v48 = vrot.slane %v2353_v20, 1  ;;  %v2662_v49 = vrot.slane %v6256_v38, 2 }
 0x359   :  { %v2457_v55 = vadd.f32 %v2429_v48, %v2259_v9 }
 0x35a   :  { %v6273_v42 = vpop.f32.mrf.mxu0 }
 0x35b   :  { %v2711_v57 = vadd.f32 %v2657_v28, %v2457_v55  ;;  %v2661_v55 = vrot.slane %v6244_v36, 2 }
 0x35d   :  { %v2729_v63 = vadd.f32 %v6269_v24, %v2711_v57 }
 0x35e   :  { %v2199_v22 = vpop.f32.mrf.mxu2  ;;  %v2355_v18 = vpop.f32.mrf.mxu3 }
 0x35f   :  { %vm2743_vm15 = vcmp.ge.f32.partialorder %v2729_v63, 0.0  ;;  %v2757_v37 = vmul.f32 0.1, %v2729_v63  ;;  %v2663_v22 = vsel %vm1438_vm14, %v2661_v55, %v2662_v49 }
 0x361   :  { %v2771_v6 = vsel %vm2743_vm15, %v2729_v63, %v2757_v37  ;;  %v5592_v63 = vld [vmem:[#allocation9 + $0xd0] sm:$0xff] }
 0x362   :  { %2786 = vst [vmem:[#allocation3 + $0x11] sm:$0x7f] %v2771_v6  ;;  %v6280_v17 = vpop.f32.mrf.mxu0 }
 0x363   :  { %2230 = vmatmul.bf16.gmra.mxu2 %v5900_v61  ;;  %2386 = vmatmul.bf16.gmra.mxu3 %v5900_v61  ;;  %v5596_v61 = vld [vmem:[#allocation9 + $0xf0] sm:$0xff]  ;;  %v2668_v21 = vrot.slane %v6280_v17, 2 }
 0x364   :  { %3527 = vmatpush.bf16.msra.mxu0 %v5596_v61  ;;  %v2664_v61 = vrot.slane %v6258_v10, 2 }
 0x365   :  { %2611 = vmatmul.bf16.gmra.mxu0 %v5937_v16 }
 0x366   :  { %v2201_v32 = vpop.f32.mrf.mxu2  ;;  %v2357_v44 = vpop.f32.mrf.mxu3 }
 0x367   :  { %v2260_v14 = vadd.f32 %v2201_v32, %v6050_v53  ;;  %v2430_v19 = vrot.slane %v2357_v44, 1 }
 0x368   :  { %3528 = vmatpush.bf16.msra.mxu0 %v5595_v1 }
 0x369   :  { %v2458_v12 = vadd.f32 %v2430_v19, %v2260_v14  ;;  %v2802_v3 = vld [vmem:[#allocation3 + $0x10] sm:$0xff]  ;;  %v5590_v14 = vld [vmem:[#allocation9 + $0xc0] sm:$0xff]  ;;  %v2665_v19 = vrot.slane %v6264_v45, 2 }
 0x36a   :  { %v6284_v50 = vpack.c.bf16 %v6249_v2, %v2802_v3  ;;  %v6288_v35 = vpop.f32.mrf.mxu0 }
 0x36b   :  { %v2712_v29 = vadd.f32 %v2660_v40, %v2458_v12 }
 0x36c   :  { %2930 = vmatmul.bf16.gmra.mxu1 %v6284_v50  ;;  %3529 = vmatpush.bf16.msra.mxu0 %v5594_v54 }
 0x36d   :  { %v2730_v53 = vadd.f32 %v6269_v24, %v2712_v29 }
 0x36e   :  { %v2203_v59 = vpop.f32.mrf.mxu2  ;;  %v2359_v13 = vpop.f32.mrf.mxu3 }
 0x36f   :  { %vm2744_vm0 = vcmp.ge.f32.partialorder %v2730_v53, 0.0  ;;  %v2758_v8 = vmul.f32 0.1, %v2730_v53  ;;  %v2666_v59 = vsel %vm1438_vm14, %v2664_v61, %v2665_v19  ;;  %v2670_v19 = vrot.slane %v6288_v35, 2 }
 0x370   :  { %3530 = vmatpush.bf16.msra.mxu0 %v5593_v33 }
 0x371   :  { %v2772_v39 = vsel %vm2744_vm0, %v2730_v53, %v2758_v8 }
 0x372   :  { %2787 = vst [vmem:[#allocation3 + $0x21] sm:$0x7f] %v2772_v39  ;;  %v6296_v28 = vpop.f32.mrf.mxu0 }
 0x373   :  { %2234 = vmatmul.bf16.gmra.mxu2 %v5910_v31  ;;  %2390 = vmatmul.bf16.gmra.mxu3 %v5910_v31 }
 0x374   :  { %3531 = vmatpush.bf16.msra.mxu0 %v5592_v63  ;;  %v5579_v63 = vld [vmem:[#allocation9 + $0x68] sm:$0xff] }
 0x375   :  { %2616 = vmatmul.bf16.gmra.mxu0 %v5945_v25  ;;  %3076 = vmatpush.bf16.msra.mxu2 %v5579_v63 }
 0x376   :  { %v2205_v20 = vpop.f32.mrf.mxu2  ;;  %v2361_v9 = vpop.f32.mrf.mxu3 }
 0x377   :  { %v2261_v48 = vadd.f32 %v2205_v20, %v6069_v23  ;;  %v2431_v43 = vrot.slane %v2361_v9, 1  ;;  %v5591_v23 = vld [vmem:[#allocation9 + $0xc8] sm:$0xff] }
 0x378   :  { %3532 = vmatpush.bf16.msra.mxu0 %v5591_v23 }
 0x379   :  { %v2459_v31 = vadd.f32 %v2431_v43, %v2261_v48  ;;  %v2804_v57 = vld [vmem:[#allocation3 + $0x20] sm:$0xff]  ;;  %v2667_v48 = vrot.slane %v6273_v42, 2 }
 0x37a   :  { %v6300_v18 = vpack.c.bf16 %v6249_v2, %v2804_v57  ;;  %v6304_v32 = vpop.f32.mrf.mxu0 }
 0x37b   :  { %v2713_v38 = vadd.f32 %v2663_v22, %v2459_v31 }
 0x37c   :  { %2934 = vmatmul.bf16.gmra.mxu1 %v6300_v18  ;;  %3533 = vmatpush.bf16.msra.mxu0 %v5590_v14 }
 0x37d   :  { %v2731_v37 = vadd.f32 %v6269_v24, %v2713_v38 }
 0x37e   :  { %v2207_v6 = vpop.f32.mrf.mxu2  ;;  %v2363_v36 = vpop.f32.mrf.mxu3 }
 0x37f   :  { %vm2745_vm1 = vcmp.ge.f32.partialorder %v2731_v37, 0.0  ;;  %v2759_v46 = vmul.f32 0.1, %v2731_v37  ;;  %v2671_v6 = vrot.slane %v6296_v28, 2 }
 0x381   :  { %v2773_v44 = vsel %vm2745_vm1, %v2731_v37, %v2759_v46 }
 0x382   :  { %2788 = vst [vmem:[#allocation3 + $0x31] sm:$0x7f] %v2773_v44  ;;  %v6312_v29 = vpop.f32.mrf.mxu0 }
 0x383   :  { %2238 = vmatmul.bf16.gmra.mxu2 %v5921_v0  ;;  %2394 = vmatmul.bf16.gmra.mxu3 %v5921_v0 }
 0x385   :  { %2621 = vmatmul.bf16.gmra.mxu0 %v5778_v11 }
 0x386   :  { %v2209_v51 = vpop.f32.mrf.mxu2  ;;  %v2365_v12 = vpop.f32.mrf.mxu3 }
 0x387   :  { %v2262_v3 = vadd.f32 %v2209_v51, %v6085_v60  ;;  %v2432_v40 = vrot.slane %v2365_v12, 1 }
 0x389   :  { %v2460_v1 = vadd.f32 %v2432_v40, %v2262_v3  ;;  %v2806_v53 = vld [vmem:[#allocation3 + $0x30] sm:$0xff]  ;;  %v2672_v40 = vsel %vm1438_vm14, %v2670_v19, %v2671_v6 }
 0x38a   :  { %v6316_v0 = vpack.c.bf16 %v6249_v2, %v2806_v53  ;;  %v2586_v54 = vpop.f32.mrf.mxu0 }
 0x38b   :  { %v2714_v13 = vadd.f32 %v2666_v59, %v2460_v1  ;;  %v2674_v54 = vrot.slane %v6312_v29, 2 }
 0x38c   :  { %2938 = vmatmul.bf16.gmra.mxu1 %v6316_v0 }
 0x38d   :  { %v2732_v45 = vadd.f32 %v6269_v24, %v2714_v13  ;;  %v5578_v13 = vld [vmem:[#allocation9 + $0x60] sm:$0xff] }
 0x38e   :  { %v2211_v8 = vpop.f32.mrf.mxu2  ;;  %v2367_v39 = vpop.f32.mrf.mxu3  ;;  %3077 = vmatpush.bf16.msra.mxu2 %v5578_v13 }
 0x38f   :  { %vm2746_vm2 = vcmp.ge.f32.partialorder %v2732_v45, 0.0  ;;  %v2760_v60 = vmul.f32 0.1, %v2732_v45  ;;  %v5577_v8 = vld [vmem:[#allocation9 + $0x58] sm:$0xff] }
 0x390   :  { %v5585_v39 = vld [vmem:[#allocation9 + $0x98] sm:$0xff] }
 0x391   :  { %v2774_v10 = vsel %vm2746_vm2, %v2732_v45, %v2760_v60  ;;  %v5586_v45 = vld [vmem:[#allocation9 + $0xa0] sm:$0xff]  ;;  %v2673_v60 = vrot.slane %v6304_v32, 2  ;;  %v5584_v32 = vld [vmem:[#allocation9 + $0x90] sm:$0xff] }
 0x392   :  { %2789 = vst [vmem:[#allocation3 + $0x41] sm:$0x7f] %v2774_v10  ;;  %v2587_v43 = vpop.f32.mrf.mxu0  ;;  %3275 = vmatpush.bf16.msra.mxu3 %v5586_v45  ;;  %3078 = vmatpush.bf16.msra.mxu2 %v5577_v8 }
 0x393   :  { %2242 = vmatmul.bf16.gmra.mxu2 %v5929_v7  ;;  %2398 = vmatmul.bf16.gmra.mxu3 %v5929_v7  ;;  %v2669_v7 = vsel %vm1438_vm14, %v2667_v48, %v2668_v21  ;;  %v5576_v48 = vld [vmem:[#allocation9 + $0x50] sm:$0xff]  ;;  %v5602_v43 = vld [vmem:[#allocation9 + $0x120] sm:$0xff] }
 0x394   :  { %3685 = vmatpush.bf16.msra.mxu1 %v5602_v43 }
 0x395   :  { %3534 = vmatmul.bf16.vlgmr.msra.gmra.mxu0 %v6253_v30 }
 0x396   :  { %v2213_v33 = vpop.f32.mrf.mxu2  ;;  %v2369_v49 = vpop.f32.mrf.mxu3  ;;  %3276 = vmatpush.bf16.msra.mxu3 %v5585_v39  ;;  %3079 = vmatpush.bf16.msra.mxu2 %v5576_v48 }
 0x397   :  { %v2263_v20 = vadd.f32 %v2213_v33, %v6095_v52  ;;  %v2433_v9 = vrot.slane %v2369_v49, 1 }
 0x399   :  { %v2461_v55 = vadd.f32 %v2433_v9, %v2263_v20  ;;  %v2808_v31 = vld [vmem:[#allocation3 + $0x40] sm:$0xff]  ;;  %v2675_v20 = vsel %vm1438_vm14, %v2673_v60, %v2674_v54 }
 0x39a   :  { %v6328_v57 = vpack.c.bf16 %v6249_v2, %v2808_v31  ;;  %v2589_v42 = vpop.f32.mrf.mxu0  ;;  %3277 = vmatpush.bf16.msra.mxu3 %v5584_v32  ;;  %v5583_v31 = vld [vmem:[#allocation9 + $0x88] sm:$0xff] }
 0x39b   :  { %v2715_v22 = vadd.f32 %v2669_v7, %v2461_v55  ;;  %v6364_v42 = vpop.f32.mrf.mxu1 }
 0x39c   :  { %2942 = vmatmul.bf16.gmra.mxu1 %v6328_v57 }
 0x39d   :  { %v2733_v17 = vadd.f32 %v6269_v24, %v2715_v22 }
 0x39e   :  { %v2215_v38 = vpop.f32.mrf.mxu2  ;;  %v2371_v52 = vpop.f32.mrf.mxu3  ;;  %3278 = vmatpush.bf16.msra.mxu3 %v5583_v31 }
 0x39f   :  { %vm2747_vm3 = vcmp.ge.f32.partialorder %v2733_v17, 0.0  ;;  %v2761_v37 = vmul.f32 0.1, %v2733_v17  ;;  %v5574_v52 = vld [vmem:[#allocation9 + $0x40] sm:$0xff] }
 0x3a1   :  { %v2775_v23 = vsel %vm2747_vm3, %v2733_v17, %v2761_v37  ;;  %v5582_v37 = vld [vmem:[#allocation9 + $0x80] sm:$0xff] }
 0x3a2   :  { %2790 = vst [vmem:[#allocation3 + $0x51] sm:$0x7f] %v2775_v23  ;;  %v2590_v51 = vpop.f32.mrf.mxu0  ;;  %3279 = vmatpush.bf16.msra.mxu3 %v5582_v37 }
 0x3a3   :  { %2246 = vmatmul.bf16.gmra.mxu2 %v5937_v16  ;;  %2402 = vmatmul.bf16.gmra.mxu3 %v5937_v16 }
 0x3a5   :  { %3537 = vmatmul.bf16.gmra.mxu0 %v6284_v50 }
 0x3a6   :  { %v2217_v36 = vpop.f32.mrf.mxu2  ;;  %v2373_v46 = vpop.f32.mrf.mxu3 }
 0x3a7   :  { %v2264_v44 = vadd.f32 %v2217_v36, %v6107_v15  ;;  %v2434_v14 = vrot.slane %v2373_v46, 1 }
 0x3a9   :  { %v2462_v12 = vadd.f32 %v2434_v14, %v2264_v44  ;;  %v2810_v3 = vld [vmem:[#allocation3 + $0x50] sm:$0xff]  ;;  %v2929_v14 = vpop.f32.mrf.mxu1 }
 0x3aa   :  { %v6340_v61 = vpack.c.bf16 %v6249_v2, %v2810_v3  ;;  %v6344_v59 = vpop.f32.mrf.mxu0 }
 0x3ab   :  { %v2716_v16 = vadd.f32 %v2672_v40, %v2462_v12  ;;  %v2676_v39 = vrot.slane %v6344_v59, 2 }
 0x3ac   :  { %2946 = vmatmul.bf16.gmra.mxu1 %v6340_v61 }
 0x3ad   :  { %v2734_v28 = vadd.f32 %v6269_v24, %v2716_v16  ;;  %v5601_v16 = vld [vmem:[#allocation9 + $0x118] sm:$0xff] }
 0x3ae   :  { %v2219_v1 = vpop.f32.mrf.mxu2  ;;  %v2375_v53 = vpop.f32.mrf.mxu3  ;;  %3686 = vmatpush.bf16.msra.mxu1 %v5601_v16 }
 0x3af   :  { %vm2748_vm4 = vcmp.ge.f32.partialorder %v2734_v28, 0.0  ;;  %v2762_v15 = vmul.f32 0.1, %v2734_v28 }
 0x3b1   :  { %v2776_v35 = vsel %vm2748_vm4, %v2734_v28, %v2762_v15 }
 0x3b2   :  { %2791 = vst [vmem:[#allocation3 + $0x61] sm:$0x7f] %v2776_v35  ;;  %v6352_v33 = vpop.f32.mrf.mxu0 }
 0x3b3   :  { %2250 = vmatmul.bf16.gmra.mxu2 %v5945_v25  ;;  %2406 = vmatmul.bf16.gmra.mxu3 %v5945_v25  ;;  %v2677_v15 = vrot.slane %v6352_v33, 2 }
 0x3b5   :  { %3541 = vmatmul.bf16.gmra.mxu0 %v6300_v18 }
 0x3b6   :  { %v2221_v10 = vpop.f32.mrf.mxu2  ;;  %v2377_v58 = vpop.f32.mrf.mxu3 }
 0x3b7   :  { %v2265_v62 = vadd.f32 %v2221_v10, %v6120_v47  ;;  %v2435_v21 = vrot.slane %v2377_v58, 1  ;;  %v5575_v47 = vld [vmem:[#allocation9 + $0x48] sm:$0xff]  ;;  %v2678_v58 = vsel %vm1438_vm14, %v2676_v39, %v2677_v15 }
 0x3b8   :  { %3080 = vmatpush.bf16.msra.mxu2 %v5575_v47 }
 0x3b9   :  { %v2463_v49 = vadd.f32 %v2435_v21, %v2265_v62  ;;  %v2812_v25 = vld [vmem:[#allocation3 + $0x60] sm:$0xff] }
 0x3ba   :  { %v6356_v9 = vpack.c.bf16 %v6249_v2, %v2812_v25  ;;  %v6360_v17 = vpop.f32.mrf.mxu0 }
 0x3bb   :  { %v2717_v29 = vadd.f32 %v2675_v20, %v2463_v49 }
 0x3bc   :  { %2950 = vmatmul.bf16.gmra.mxu1 %v6356_v9  ;;  %3081 = vmatpush.bf16.msra.mxu2 %v5574_v52 }
 0x3bd   :  { %v2735_v55 = vadd.f32 %v6269_v24, %v2717_v29 }
 0x3be   :  { %v2223_v7 = vpop.f32.mrf.mxu2  ;;  %v2379_v63 = vpop.f32.mrf.mxu3 }
 0x3bf   :  { %vm2749_vm5 = vcmp.ge.f32.partialorder %v2735_v55, 0.0  ;;  %v2763_v22 = vmul.f32 0.1, %v2735_v55 }
 0x3c1   :  { %v2777_v38 = vsel %vm2749_vm5, %v2735_v55, %v2763_v22  ;;  %v2679_v55 = vrot.slane %v6360_v17, 2 }
 0x3c2   :  { %2792 = vst [vmem:[#allocation3 + $0x71] sm:$0x7f] %v2777_v38  ;;  %v2599_v36 = vpop.f32.mrf.mxu0 }
 0x3c3   :  { %2254 = vmatmul.bf16.gmra.mxu2 %v5778_v11  ;;  %2410 = vmatmul.bf16.gmra.mxu3 %v5778_v11  ;;  %v2680_v48 = vrot.slane %v2599_v36, 2 }
 0x3c5   :  { %3545 = vmatmul.bf16.gmra.mxu0 %v6316_v0  ;;  %v2681_v38 = vsel %vm1438_vm14, %v2679_v55, %v2680_v48 }
 0x3c6   :  { %v2225_v23 = vpop.f32.mrf.mxu2  ;;  %v2381_v6 = vpop.f32.mrf.mxu3 }
 0x3c9   :  { %v2814_v46 = vld [vmem:[#allocation3 + $0x70] sm:$0xff] }
 0x3ca   :  { %v6368_v44 = vpack.c.bf16 %v6249_v2, %v2814_v46  ;;  %v6371_v12 = vpop.f32.mrf.mxu0 }
 0x3cc   :  { %2954 = vmatmul.bf16.gmra.mxu1 %v6368_v44 }
 0x3ce   :  { %v2226_v19 = vpop.f32.mrf.mxu2  ;;  %v2382_v51 = vpop.f32.mrf.mxu3 }
 0x3cf   :  { %v5600_v19 = vld [vmem:[#allocation9 + $0x110] sm:$0xff] }
 0x3d0   :  { %3687 = vmatpush.bf16.msra.mxu1 %v5600_v19 }
 0x3d2   :  { %v6376_v40 = vpop.f32.mrf.mxu0 }
 0x3d3   :  { %3082 = vmatmul.bf16.vlgmr.msra.gmra.mxu2 %v6253_v30  ;;  %3280 = vmatmul.bf16.vlgmr.msra.gmra.mxu3 %v6253_v30  ;;  %v2683_v51 = vrot.slane %v6376_v40, 2 }
 0x3d5   :  { %3549 = vmatmul.bf16.gmra.mxu0 %v6328_v57 }
 0x3d6   :  { %v2228_v11 = vpop.f32.mrf.mxu2  ;;  %v2384_v3 = vpop.f32.mrf.mxu3 }
 0x3da   :  { %v6379_v53 = vpop.f32.mrf.mxu0 }
 0x3dc   :  { %2957 = vmatmul.bf16.gmra.mxu1 %v6253_v30 }
 0x3de   :  { %v2229_v28 = vpop.f32.mrf.mxu2  ;;  %v2385_v1 = vpop.f32.mrf.mxu3 }
 0x3df   :  { %v2682_v1 = vrot.slane %v6371_v12, 2 }
 0x3e2   :  { %v6387_v60 = vpop.f32.mrf.mxu0 }
 0x3e3   :  { %3086 = vmatmul.bf16.gmra.mxu2 %v6284_v50  ;;  %3285 = vmatmul.bf16.gmra.mxu3 %v6284_v50 }
 0x3e5   :  { %3553 = vmatmul.bf16.gmra.mxu0 %v6340_v61 }
 0x3e6   :  { %v2231_v35 = vpop.f32.mrf.mxu2  ;;  %v2387_v13 = vpop.f32.mrf.mxu3 }
 0x3e7   :  { %v2266_v45 = vadd.f32 %v2231_v35, %v6151_v34  ;;  %v2436_v8 = vrot.slane %v2387_v13, 1 }
 0x3e9   :  { %v2464_v54 = vadd.f32 %v2436_v8, %v2266_v45  ;;  %v6389_v10 = vpop.f32.mrf.mxu1  ;;  %v2684_v8 = vsel %vm1438_vm14, %v2682_v1, %v2683_v51 }
 0x3ea   :  { %v6394_v34 = vpop.f32.mrf.mxu0 }
 0x3eb   :  { %v2718_v62 = vadd.f32 %v2678_v58, %v2464_v54 }
 0x3ec   :  { %2960 = vmatmul.bf16.gmra.mxu1 %v6253_v30 }
 0x3ed   :  { %v2736_v21 = vadd.f32 %v6269_v24, %v2718_v62 }
 0x3ee   :  { %v2233_v33 = vpop.f32.mrf.mxu2  ;;  %v2389_v49 = vpop.f32.mrf.mxu3 }
 0x3ef   :  { %vm2750_vm6 = vcmp.ge.f32.partialorder %v2736_v21, 0.0  ;;  %v2764_v25 = vmul.f32 0.1, %v2736_v21  ;;  %v2686_v49 = vrot.slane %v6387_v60, 2 }
 0x3f1   :  { %v2778_v20 = vsel %vm2750_vm6, %v2736_v21, %v2764_v25  ;;  %v2933_v59 = vpop.f32.mrf.mxu1 }
 0x3f2   :  { %2793 = vst [vmem:[#allocation3 + $0xa1] sm:$0x7f] %v2778_v20  ;;  %v6401_v31 = vpop.f32.mrf.mxu0 }
 0x3f3   :  { %3090 = vmatmul.bf16.gmra.mxu2 %v6300_v18  ;;  %3290 = vmatmul.bf16.gmra.mxu3 %v6300_v18 }
 0x3f5   :  { %3557 = vmatmul.bf16.gmra.mxu0 %v6356_v9 }
 0x3f6   :  { %v2235_v32 = vpop.f32.mrf.mxu2  ;;  %v2391_v43 = vpop.f32.mrf.mxu3 }
 0x3f7   :  { %v2267_v29 = vadd.f32 %v2235_v32, %v6167_v41  ;;  %v2437_v47 = vrot.slane %v2391_v43, 1  ;;  %v2685_v32 = vrot.slane %v6379_v53, 2 }
 0x3f9   :  { %v2465_v7 = vadd.f32 %v2437_v47, %v2267_v29  ;;  %v6403_v63 = vpop.f32.mrf.mxu1  ;;  %v2820_v22 = vld [vmem:[#allocation3 + $0xa0] sm:$0xff] }
 0x3fa   :  { %v6407_v52 = vpack.c.bf16 %v6249_v2, %v2820_v22  ;;  %v6411_v36 = vpop.f32.mrf.mxu0 }
 0x3fb   :  { %v2719_v37 = vadd.f32 %v2681_v38, %v2465_v7  ;;  %v2687_v7 = vsel %vm1438_vm14, %v2685_v32, %v2686_v49 }
 0x3fc   :  { %2964 = vmatmul.bf16.gmra.mxu1 %v6407_v52 }
 0x3fd   :  { %v2737_v23 = vadd.f32 %v6269_v24, %v2719_v37 }
 0x3fe   :  { %v2237_v41 = vpop.f32.mrf.mxu2  ;;  %v2393_v6 = vpop.f32.mrf.mxu3 }
 0x3ff   :  { %vm2751_vm7 = vcmp.ge.f32.partialorder %v2737_v23, 0.0  ;;  %v2765_v17 = vmul.f32 0.1, %v2737_v23 }
 0x401   :  { %v2779_v46 = vsel %vm2751_vm7, %v2737_v23, %v2765_v17  ;;  %v2937_v14 = vpop.f32.mrf.mxu1  ;;  %v5599_v17 = vld [vmem:[#allocation9 + $0x108] sm:$0xff] }
 0x402   :  { %2794 = vst [vmem:[#allocation3 + $0xb1] sm:$0x7f] %v2779_v46  ;;  %v6419_v15 = vpop.f32.mrf.mxu0  ;;  %v2689_v46 = vrot.slane %v6401_v31, 2  ;;  %3688 = vmatpush.bf16.msra.mxu1 %v5599_v17 }
 0x403   :  { %3094 = vmatmul.bf16.gmra.mxu2 %v6316_v0  ;;  %3295 = vmatmul.bf16.gmra.mxu3 %v6316_v0 }
 0x405   :  { %3561 = vmatmul.bf16.gmra.mxu0 %v6368_v44 }
 0x406   :  { %v2239_v11 = vpop.f32.mrf.mxu2  ;;  %v2395_v3 = vpop.f32.mrf.mxu3 }
 0x407   :  { %v2268_v16 = vadd.f32 %v2239_v11, %v6184_v5  ;;  %v2438_v28 = vrot.slane %v2395_v3, 1  ;;  %v2688_v3 = vrot.slane %v6394_v34, 2 }
 0x409   :  { %v2466_v35 = vadd.f32 %v2438_v28, %v2268_v16  ;;  %v6421_v13 = vpop.f32.mrf.mxu1  ;;  %v2822_v45 = vld [vmem:[#allocation3 + $0xb0] sm:$0xff] }
 0x40a   :  { %v6425_v39 = vpack.c.bf16 %v6249_v2, %v2822_v45  ;;  %v6429_v62 = vpop.f32.mrf.mxu0  ;;  %v2690_v45 = vsel %vm1438_vm14, %v2688_v3, %v2689_v46 }
 0x40b   :  { %v2720_v54 = vadd.f32 %v2684_v8, %v2466_v35 }
 0x40c   :  { %2968 = vmatmul.bf16.gmra.mxu1 %v6425_v39 }
 0x40d   :  { %v2738_v40 = vadd.f32 %v6269_v24, %v2720_v54 }
 0x40e   :  { %v2241_v5 = vpop.f32.mrf.mxu2  ;;  %v2397_v58 = vpop.f32.mrf.mxu3 }
 0x40f   :  { %vm2752_vm8 = vcmp.ge.f32.partialorder %v2738_v40, 0.0  ;;  %v2766_v12 = vmul.f32 0.1, %v2738_v40 }
 0x411   :  { %v2780_v21 = vsel %vm2752_vm8, %v2738_v40, %v2766_v12  ;;  %v2941_v33 = vpop.f32.mrf.mxu1 }
 0x412   :  { %2795 = vst [vmem:[#allocation3 + $0xc1] sm:$0x7f] %v2780_v21  ;;  %v6437_v43 = vpop.f32.mrf.mxu0  ;;  %v2692_v21 = vrot.slane %v6419_v15, 2 }
 0x413   :  { %3098 = vmatmul.bf16.gmra.mxu2 %v6328_v57  ;;  %3300 = vmatmul.bf16.gmra.mxu3 %v6328_v57 }
 0x415   :  { %3565 = vmatmul.bf16.gmra.mxu0 %v6253_v30 }
 0x416   :  { %v2243_v25 = vpop.f32.mrf.mxu2  ;;  %v2399_v20 = vpop.f32.mrf.mxu3 }
 0x417   :  { %v2269_v59 = vadd.f32 %v2243_v25, %v6201_v56  ;;  %v2439_v48 = vrot.slane %v2399_v20, 1 }
 0x419   :  { %v2467_v29 = vadd.f32 %v2439_v48, %v2269_v59  ;;  %v6439_v47 = vpop.f32.mrf.mxu1  ;;  %v2824_v55 = vld [vmem:[#allocation3 + $0xc0] sm:$0xff]  ;;  %v2691_v59 = vrot.slane %v6411_v36, 2 }
 0x41a   :  { %v6443_v22 = vpack.c.bf16 %v6249_v2, %v2824_v55  ;;  %v3535_v23 = vpop.f32.mrf.mxu0 }
 0x41b   :  { %v2721_v38 = vadd.f32 %v2687_v7, %v2467_v29  ;;  %v2693_v7 = vsel %vm1438_vm14, %v2691_v59, %v2692_v21 }
 0x41c   :  { %2972 = vmatmul.bf16.gmra.mxu1 %v6443_v22 }
 0x41d   :  { %v2739_v60 = vadd.f32 %v6269_v24, %v2721_v38 }
 0x41e   :  { %v2245_v56 = vpop.f32.mrf.mxu2  ;;  %v2401_v37 = vpop.f32.mrf.mxu3 }
 0x41f   :  { %vm2753_vm9 = vcmp.ge.f32.partialorder %v2739_v60, 0.0  ;;  %v2767_v53 = vmul.f32 0.1, %v2739_v60 }
 0x421   :  { %v2781_v41 = vsel %vm2753_vm9, %v2739_v60, %v2767_v53  ;;  %v2945_v6 = vpop.f32.mrf.mxu1 }
 0x422   :  { %2796 = vst [vmem:[#allocation3 + $0xd1] sm:$0x7f] %v2781_v41  ;;  %v3536_v16 = vpop.f32.mrf.mxu0  ;;  %v2694_v41 = vrot.slane %v6429_v62, 2  ;;  %v2695_v6 = vrot.slane %v6437_v43, 2 }
 0x423   :  { %3102 = vmatmul.bf16.gmra.mxu2 %v6340_v61  ;;  %3305 = vmatmul.bf16.gmra.mxu3 %v6340_v61 }
 0x425   :  { %3568 = vmatmul.bf16.gmra.mxu0 %v6253_v30 }
 0x426   :  { %v2247_v14 = vpop.f32.mrf.mxu2  ;;  %v2403_v19 = vpop.f32.mrf.mxu3 }
 0x427   :  { %v2270_v51 = vadd.f32 %v2247_v14, %v6212_v4  ;;  %v2440_v11 = vrot.slane %v2403_v19, 1 }
 0x429   :  { %v2468_v28 = vadd.f32 %v2440_v11, %v2270_v51  ;;  %v6453_v1 = vpop.f32.mrf.mxu1  ;;  %v2826_v35 = vld [vmem:[#allocation3 + $0xd0] sm:$0xff] }
 0x42a   :  { %v6457_v8 = vpack.c.bf16 %v6249_v2, %v2826_v35  ;;  %v6461_v34 = vpop.f32.mrf.mxu0  ;;  %v2696_v35 = vsel %vm1438_vm14, %v2694_v41, %v2695_v6  ;;  %v5621_v41 = vld [vmem:[#allocation9 + $0x1b8] sm:$0xff] }
 0x42b   :  { %v2722_v54 = vadd.f32 %v2690_v45, %v2468_v28  ;;  %v5598_v28 = vld [vmem:[#allocation9 + $0x100] sm:$0xff]  ;;  %4134 = vmatpush.bf16.msrb.mxu3 %v5621_v41 }
 0x42c   :  { %2976 = vmatmul.bf16.gmra.mxu1 %v6457_v8 }
 0x42d   :  { %v2740_v31 = vadd.f32 %v6269_v24, %v2722_v54  ;;  %3689 = vmatpush.bf16.msra.mxu1 %v5598_v28 }
 0x42e   :  { %v2249_v40 = vpop.f32.mrf.mxu2  ;;  %v2405_v4 = vpop.f32.mrf.mxu3 }
 0x42f   :  { %vm2754_vm10 = vcmp.ge.f32.partialorder %v2740_v31, 0.0  ;;  %v2768_v5 = vmul.f32 0.1, %v2740_v31 }
 0x431   :  { %v2782_v58 = vsel %vm2754_vm10, %v2740_v31, %v2768_v5  ;;  %v2949_v12 = vpop.f32.mrf.mxu1 }
 0x432   :  { %2797 = vst [vmem:[#allocation3 + $0xe1] sm:$0x7f] %v2782_v58  ;;  %v3540_v48 = vpop.f32.mrf.mxu0 }
 0x433   :  { %3106 = vmatmul.bf16.gmra.mxu2 %v6356_v9  ;;  %3310 = vmatmul.bf16.gmra.mxu3 %v6356_v9 }
 0x435   :  { %3571 = vmatmul.bf16.gmra.mxu0 %v6407_v52 }
 0x436   :  { %v2251_v33 = vpop.f32.mrf.mxu2  ;;  %v2407_v49 = vpop.f32.mrf.mxu3 }
 0x437   :  { %v2271_v25 = vadd.f32 %v2251_v33, %v6223_v27  ;;  %v2441_v20 = vrot.slane %v2407_v49, 1 }
 0x439   :  { %v2469_v32 = vadd.f32 %v2441_v20, %v2271_v25  ;;  %v6469_v29 = vpop.f32.mrf.mxu1  ;;  %v2828_v55 = vld [vmem:[#allocation3 + $0xe0] sm:$0xff] }
 0x43a   :  { %v6473_v38 = vpack.c.bf16 %v6249_v2, %v2828_v55  ;;  %v6477_v36 = vpop.f32.mrf.mxu0 }
 0x43b   :  { %v2723_v60 = vadd.f32 %v2693_v7, %v2469_v32 }
 0x43c   :  { %2980 = vmatmul.bf16.gmra.mxu1 %v6473_v38 }
 0x43d   :  { %v2741_v15 = vadd.f32 %v6269_v24, %v2723_v60 }
 0x43e   :  { %v2253_v56 = vpop.f32.mrf.mxu2  ;;  %v2409_v27 = vpop.f32.mrf.mxu3 }
 0x43f   :  { %vm2755_vm11 = vcmp.ge.f32.partialorder %v2741_v15, 0.0  ;;  %v2769_v37 = vmul.f32 0.1, %v2741_v15 }
 0x441   :  { %v2783_v53 = vsel %vm2755_vm11, %v2741_v15, %v2769_v37  ;;  %v2953_v23 = vpop.f32.mrf.mxu1 }
 0x442   :  { %2798 = vst [vmem:[#allocation3 + $0xf1] sm:$0x7f] %v2783_v53  ;;  %v3544_v51 = vpop.f32.mrf.mxu0 }
 0x443   :  { %3110 = vmatmul.bf16.gmra.mxu2 %v6368_v44  ;;  %3315 = vmatmul.bf16.gmra.mxu3 %v6368_v44 }
 0x445   :  { %3575 = vmatmul.bf16.gmra.mxu0 %v6425_v39 }
 0x446   :  { %v2255_v17 = vpop.f32.mrf.mxu2  ;;  %v2411_v46 = vpop.f32.mrf.mxu3 }
 0x447   :  { %v2272_v14 = vadd.f32 %v2255_v17, %v6234_v26  ;;  %v2442_v19 = vrot.slane %v2411_v46, 1 }
 0x449   :  { %v2470_v11 = vadd.f32 %v2442_v19, %v2272_v14  ;;  %v2955_v3 = vpop.f32.mrf.mxu1  ;;  %v2830_v16 = vld [vmem:[#allocation3 + $0xf0] sm:$0xff] }
 0x44a   :  { %v6487_v45 = vpack.c.bf16 %v6249_v2, %v2830_v16  ;;  %v6491_v40 = vpop.f32.mrf.mxu0  ;;  %v5613_v16 = vld [vmem:[#allocation9 + $0x178] sm:$0xff] }
 0x44b   :  { %v2724_v54 = vadd.f32 %v2696_v35, %v2470_v11  ;;  %3880 = vmatpush.bf16.msrb.mxu2 %v5613_v16  ;;  %v5629_v35 = vld [vmem:[#allocation9 + $0x1f8] sm:$0xff] }
 0x44c   :  { %2984 = vmatmul.bf16.gmra.mxu1 %v6487_v45  ;;  %4290 = vmatpush.bf16.msrb.mxu0 %v5629_v35 }
 0x44d   :  { %v2742_v62 = vadd.f32 %v6269_v24, %v2724_v54 }
 0x44e   :  { %v2257_v43 = vpop.f32.mrf.mxu2  ;;  %v2413_v31 = vpop.f32.mrf.mxu3 }
 0x44f   :  { %vm2756_vm12 = vcmp.ge.f32.partialorder %v2742_v62, 0.0  ;;  %v2770_v26 = vmul.f32 0.1, %v2742_v62 }
 0x451   :  { %v2784_v4 = vsel %vm2756_vm12, %v2742_v62, %v2770_v26  ;;  %v2956_v5 = vpop.f32.mrf.mxu1 }
 0x452   :  { %2799 = vst [vmem:[#allocation3 + $0x101] sm:$0x7f] %v2784_v4  ;;  %v3548_v21 = vpop.f32.mrf.mxu0 }
 0x453   :  { %3113 = vmatmul.bf16.gmra.mxu2 %v6253_v30  ;;  %3318 = vmatmul.bf16.gmra.mxu3 %v6253_v30 }
 0x455   :  { %3579 = vmatmul.bf16.gmra.mxu0 %v6443_v22 }
 0x456   :  { %v3083_v58 = vpop.f32.mrf.mxu2  ;;  %v3281_v12 = vpop.f32.mrf.mxu3 }
 0x457   :  { %v3165_v25 = vrot.slane %v3083_v58, 1  ;;  %v3391_v20 = vrot.slane %v3281_v12, 2 }
 0x459   :  { %v2958_v33 = vpop.f32.mrf.mxu1  ;;  %v2832_v24 = vld [vmem:[#allocation3 + $0x100] sm:$0xff]  ;;  %v3193_v55 = vadd.f32 %v3165_v25, %v6364_v42  ;;  %v5637_v42 = vld [vmem:[#allocation9 + $0x238] sm:$0xff] }
 0x45a   :  { %v6497_v49 = vpack.c.bf16 %v6249_v2, %v2832_v24  ;;  %v6501_v7 = vpop.f32.mrf.mxu0  ;;  %4488 = vmatpush.bf16.msrb.mxu1 %v5637_v42 }
 0x45c   :  { %2988 = vmatmul.bf16.gmra.mxu1 %v6497_v49 }
 0x45e   :  { %v3085_v59 = vpop.f32.mrf.mxu2  ;;  %v3283_v48 = vpop.f32.mrf.mxu3 }
 0x45f   :  { %v3392_v32 = vrot.slane %v3283_v48, 2 }
 0x461   :  { %v3393_v60 = vsel %vm1438_vm14, %v3391_v20, %v3392_v32  ;;  %v2959_v15 = vpop.f32.mrf.mxu1 }
 0x462   :  { %v3447_v56 = vadd.f32 %v3393_v60, %v3193_v55  ;;  %v3552_v53 = vpop.f32.mrf.mxu0  ;;  %v5627_v60 = vld [vmem:[#allocation9 + $0x1e8] sm:$0xff] }
 0x463   :  { %3116 = vmatmul.bf16.gmra.mxu2 %v6253_v30  ;;  %3321 = vmatmul.bf16.gmra.mxu3 %v6253_v30 }
 0x464   :  { %v6508_v2 = vadd.f32 %v6461_v34, %v3447_v56 }
 0x465   :  { %3583 = vmatmul.bf16.gmra.mxu0 %v6457_v8 }
 0x466   :  { %v3087_v27 = vpop.f32.mrf.mxu2  ;;  %v3286_v37 = vpop.f32.mrf.mxu3 }
 0x467   :  { %v3166_v6 = vrot.slane %v3087_v27, 1  ;;  %v3394_v14 = vrot.slane %v3286_v37, 2 }
 0x469   :  { %v6510_v23 = vpop.f32.mrf.mxu1  ;;  %v3194_v51 = vadd.f32 %v3166_v6, %v6389_v10 }
 0x46a   :  { %v6514_v34 = vpop.f32.mrf.mxu0 }
 0x46c   :  { %2991 = vmatmul.bf16.gmra.mxu1 %v6253_v30 }
 0x46e   :  { %v3089_v17 = vpop.f32.mrf.mxu2  ;;  %v3288_v46 = vpop.f32.mrf.mxu3 }
 0x46f   :  { %v3395_v19 = vrot.slane %v3288_v46, 2  ;;  %v5626_v17 = vld [vmem:[#allocation9 + $0x1e0] sm:$0xff]  ;;  %v5636_v46 = vld [vmem:[#allocation9 + $0x230] sm:$0xff] }
 0x470   :  { %4489 = vmatpush.bf16.msrb.mxu1 %v5636_v46  ;;  %v5619_v46 = vld [vmem:[#allocation9 + $0x1a8] sm:$0xff] }
 0x471   :  { %v3396_v11 = vsel %vm1438_vm14, %v3394_v14, %v3395_v19  ;;  %v2963_v3 = vpop.f32.mrf.mxu1  ;;  %v5620_v14 = vld [vmem:[#allocation9 + $0x1b0] sm:$0xff] }
 0x472   :  { %v3448_v28 = vadd.f32 %v3396_v11, %v3194_v51  ;;  %v3556_v43 = vpop.f32.mrf.mxu0  ;;  %v5612_v51 = vld [vmem:[#allocation9 + $0x170] sm:$0xff]  ;;  %4135 = vmatpush.bf16.msrb.mxu3 %v5620_v14 }
 0x473   :  { %3120 = vmatmul.bf16.gmra.mxu2 %v6407_v52  ;;  %3326 = vmatmul.bf16.gmra.mxu3 %v6407_v52  ;;  %v5623_v43 = vld [vmem:[#allocation9 + $0x1c8] sm:$0xff] }
 0x474   :  { %v6521_v54 = vadd.f32 %v6477_v36, %v3448_v28  ;;  %3881 = vmatpush.bf16.msrb.mxu2 %v5612_v51 }
 0x475   :  { %3587 = vmatmul.bf16.gmra.mxu0 %v6473_v38 }
 0x476   :  { %v3091_v62 = vpop.f32.mrf.mxu2  ;;  %v3291_v10 = vpop.f32.mrf.mxu3  ;;  %4136 = vmatpush.bf16.msrb.mxu3 %v5619_v46 }
 0x477   :  { %v3167_v26 = vrot.slane %v3091_v62, 1  ;;  %v3397_v58 = vrot.slane %v3291_v10, 2  ;;  %v5624_v62 = vld [vmem:[#allocation9 + $0x1d0] sm:$0xff] }
 0x479   :  { %v6523_v31 = vpop.f32.mrf.mxu1  ;;  %v3195_v21 = vadd.f32 %v3167_v26, %v6403_v63  ;;  %v5628_v63 = vld [vmem:[#allocation9 + $0x1f0] sm:$0xff] }
 0x47a   :  { %v6527_v33 = vpop.f32.mrf.mxu0  ;;  %4291 = vmatpush.bf16.msrb.mxu0 %v5628_v63 }
 0x47c   :  { %3690 = vmatmul.bf16.vlgmr.msra.gmra.mxu1 %v6253_v30 }
 0x47e   :  { %v3093_v4 = vpop.f32.mrf.mxu2  ;;  %v3293_v5 = vpop.f32.mrf.mxu3  ;;  %4292 = vmatpush.bf16.msrb.mxu0 %v5627_v60 }
 0x47f   :  { %v3398_v12 = vrot.slane %v3293_v5, 2 }
 0x481   :  { %v3399_v36 = vsel %vm1438_vm14, %v3397_v58, %v3398_v12  ;;  %v2967_v24 = vpop.f32.mrf.mxu1 }
 0x482   :  { %v3449_v25 = vadd.f32 %v3399_v36, %v3195_v21  ;;  %v3560_v32 = vpop.f32.mrf.mxu0  ;;  %4293 = vmatpush.bf16.msrb.mxu0 %v5626_v17  ;;  %v5622_v24 = vld [vmem:[#allocation9 + $0x1c0] sm:$0xff]  ;;  %v5635_v17 = vld [vmem:[#allocation9 + $0x228] sm:$0xff] }
 0x483   :  { %3124 = vmatmul.bf16.gmra.mxu2 %v6425_v39  ;;  %3331 = vmatmul.bf16.gmra.mxu3 %v6425_v39 }
 0x484   :  { %v6534_v20 = vadd.f32 %v6491_v40, %v3449_v25  ;;  %4490 = vmatpush.bf16.msrb.mxu1 %v5635_v17  ;;  %v5615_v17 = vld [vmem:[#allocation9 + $0x188] sm:$0xff] }
 0x485   :  { %3591 = vmatmul.bf16.gmra.mxu0 %v6487_v45 }
 0x486   :  { %v3095_v59 = vpop.f32.mrf.mxu2  ;;  %v3296_v48 = vpop.f32.mrf.mxu3 }
 0x487   :  { %v3168_v15 = vrot.slane %v3095_v59, 1  ;;  %v3400_v37 = vrot.slane %v3296_v48, 2 }
 0x489   :  { %v6536_v55 = vpop.f32.mrf.mxu1  ;;  %v3196_v42 = vadd.f32 %v3168_v15, %v6421_v13  ;;  %v5625_v13 = vld [vmem:[#allocation9 + $0x1d8] sm:$0xff] }
 0x48a   :  { %v6540_v40 = vpop.f32.mrf.mxu0  ;;  %4294 = vmatpush.bf16.msrb.mxu0 %v5625_v13 }
 0x48c   :  { %3693 = vmatmul.bf16.gmra.mxu1 %v6284_v50 }
 0x48e   :  { %v3097_v56 = vpop.f32.mrf.mxu2  ;;  %v3298_v27 = vpop.f32.mrf.mxu3  ;;  %4295 = vmatpush.bf16.msrb.mxu0 %v5624_v62 }
 0x48f   :  { %v3401_v53 = vrot.slane %v3298_v27, 2 }
 0x491   :  { %v3402_v41 = vsel %vm1438_vm14, %v3400_v37, %v3401_v53  ;;  %v2971_v6 = vpop.f32.mrf.mxu1 }
 0x492   :  { %v3450_v19 = vadd.f32 %v3402_v41, %v3196_v42  ;;  %v3564_v28 = vpop.f32.mrf.mxu0  ;;  %4296 = vmatpush.bf16.msrb.mxu0 %v5623_v43 }
 0x493   :  { %3128 = vmatmul.bf16.gmra.mxu2 %v6443_v22  ;;  %3336 = vmatmul.bf16.gmra.mxu3 %v6443_v22 }
 0x494   :  { %v6547_v11 = vadd.f32 %v6501_v7, %v3450_v19 }
 0x495   :  { %3595 = vmatmul.bf16.gmra.mxu0 %v6497_v49 }
 0x496   :  { %v3099_v3 = vpop.f32.mrf.mxu2  ;;  %v3301_v16 = vpop.f32.mrf.mxu3  ;;  %4297 = vmatpush.bf16.msrb.mxu0 %v5622_v24 }
 0x497   :  { %v3169_v10 = vrot.slane %v3099_v3, 1  ;;  %v3403_v7 = vrot.slane %v3301_v16, 2  ;;  %v5611_v3 = vld [vmem:[#allocation9 + $0x168] sm:$0xff] }
 0x498   :  { %3882 = vmatpush.bf16.msrb.mxu2 %v5611_v3  ;;  %v5606_v3 = vld [vmem:[#allocation9 + $0x140] sm:$0xff] }
 0x499   :  { %v6549_v35 = vpop.f32.mrf.mxu1  ;;  %v3197_v58 = vadd.f32 %v3169_v10, %v6439_v47 }
 0x49a   :  { %v3566_v12 = vpop.f32.mrf.mxu0 }
 0x49c   :  { %3697 = vmatmul.bf16.gmra.mxu1 %v6300_v18 }
 0x49e   :  { %v3101_v26 = vpop.f32.mrf.mxu2  ;;  %v3303_v4 = vpop.f32.mrf.mxu3 }
 0x49f   :  { %v3404_v5 = vrot.slane %v3303_v4, 2 }
 0x4a1   :  { %v3405_v21 = vsel %vm1438_vm14, %v3403_v7, %v3404_v5  ;;  %v2975_v36 = vpop.f32.mrf.mxu1 }
 0x4a2   :  { %v3451_v25 = vadd.f32 %v3405_v21, %v3197_v58  ;;  %v3567_v47 = vpop.f32.mrf.mxu0 }
 0x4a3   :  { %3132 = vmatmul.bf16.gmra.mxu2 %v6457_v8  ;;  %3341 = vmatmul.bf16.gmra.mxu3 %v6457_v8  ;;  %v5610_v47 = vld [vmem:[#allocation9 + $0x160] sm:$0xff] }
 0x4a4   :  { %v6558_v59 = vadd.f32 %v6514_v34, %v3451_v25  ;;  %3883 = vmatpush.bf16.msrb.mxu2 %v5610_v47 }
 0x4a5   :  { %3599 = vmatmul.bf16.gmra.mxu0 %v6253_v30 }
 0x4a6   :  { %v3103_v48 = vpop.f32.mrf.mxu2  ;;  %v3306_v32 = vpop.f32.mrf.mxu3 }
 0x4a7   :  { %v3170_v60 = vrot.slane %v3103_v48, 1  ;;  %v3406_v27 = vrot.slane %v3306_v32, 2 }
 0x4a9   :  { %v6560_v63 = vpop.f32.mrf.mxu1  ;;  %v3198_v53 = vadd.f32 %v3170_v60, %v6453_v1  ;;  %v5618_v60 = vld [vmem:[#allocation9 + $0x1a0] sm:$0xff] }
 0x4aa   :  { %v3569_v42 = vpop.f32.mrf.mxu0  ;;  %4137 = vmatpush.bf16.msrb.mxu3 %v5618_v60 }
 0x4ab   :  { %v5608_v42 = vld [vmem:[#allocation9 + $0x150] sm:$0xff] }
 0x4ac   :  { %3701 = vmatmul.bf16.gmra.mxu1 %v6316_v0 }
 0x4ae   :  { %v3105_v15 = vpop.f32.mrf.mxu2  ;;  %v3308_v56 = vpop.f32.mrf.mxu3 }
 0x4af   :  { %v3407_v37 = vrot.slane %v3308_v56, 2  ;;  %v5617_v15 = vld [vmem:[#allocation9 + $0x198] sm:$0xff] }
 0x4b0   :  { %4138 = vmatpush.bf16.msrb.mxu3 %v5617_v15 }
 0x4b1   :  { %v3408_v41 = vsel %vm1438_vm14, %v3406_v27, %v3407_v37  ;;  %v2979_v34 = vpop.f32.mrf.mxu1 }
 0x4b2   :  { %v3452_v6 = vadd.f32 %v3408_v41, %v3198_v53  ;;  %v3570_v1 = vpop.f32.mrf.mxu0  ;;  %v5616_v41 = vld [vmem:[#allocation9 + $0x190] sm:$0xff]  ;;  %v5634_v34 = vld [vmem:[#allocation9 + $0x220] sm:$0xff] }
 0x4b3   :  { %3136 = vmatmul.bf16.gmra.mxu2 %v6473_v38  ;;  %3346 = vmatmul.bf16.gmra.mxu3 %v6473_v38 }
 0x4b4   :  { %v6569_v14 = vadd.f32 %v6527_v33, %v3452_v6  ;;  %4491 = vmatpush.bf16.msrb.mxu1 %v5634_v34  ;;  %v5607_v6 = vld [vmem:[#allocation9 + $0x148] sm:$0xff]  ;;  %4139 = vmatpush.bf16.msrb.mxu3 %v5616_v41 }
 0x4b5   :  { %4298 = vmatmul.bf16.vlgmr.msrb.gmra.mxu0 %v6253_v30 }
 0x4b6   :  { %v3107_v19 = vpop.f32.mrf.mxu2  ;;  %v3311_v51 = vpop.f32.mrf.mxu3 }
 0x4b7   :  { %v3171_v16 = vrot.slane %v3107_v19, 1  ;;  %v3409_v10 = vrot.slane %v3311_v51, 2 }
 0x4b8   :  { %4140 = vmatpush.bf16.msrb.mxu3 %v5615_v17 }
 0x4b9   :  { %v6571_v13 = vpop.f32.mrf.mxu1  ;;  %v3199_v26 = vadd.f32 %v3171_v16, %v6469_v29  ;;  %v5614_v16 = vld [vmem:[#allocation9 + $0x180] sm:$0xff] }
 0x4ba   :  { %v6575_v33 = vpop.f32.mrf.mxu0 }
 0x4bc   :  { %3705 = vmatmul.bf16.gmra.mxu1 %v6328_v57  ;;  %4141 = vmatpush.bf16.msrb.mxu3 %v5614_v16 }
 0x4be   :  { %v3109_v28 = vpop.f32.mrf.mxu2  ;;  %v3313_v62 = vpop.f32.mrf.mxu3 }
 0x4bf   :  { %v3410_v43 = vrot.slane %v3313_v62, 2 }
 0x4c1   :  { %v3411_v4 = vsel %vm1438_vm14, %v3409_v10, %v3410_v43  ;;  %v2983_v7 = vpop.f32.mrf.mxu1 }
 0x4c2   :  { %v3453_v5 = vadd.f32 %v3411_v4, %v3199_v26  ;;  %v3574_v36 = vpop.f32.mrf.mxu0 }
 0x4c3   :  { %3140 = vmatmul.bf16.gmra.mxu2 %v6487_v45  ;;  %3351 = vmatmul.bf16.gmra.mxu3 %v6487_v45 }
 0x4c4   :  { %v6582_v58 = vadd.f32 %v6540_v40, %v3453_v5  ;;  %v5609_v40 = vld [vmem:[#allocation9 + $0x158] sm:$0xff] }
 0x4c5   :  { %4301 = vmatmul.bf16.gmra.mxu0 %v6284_v50  ;;  %3884 = vmatpush.bf16.msrb.mxu2 %v5609_v40 }
 0x4c6   :  { %v3111_v12 = vpop.f32.mrf.mxu2  ;;  %v3316_v21 = vpop.f32.mrf.mxu3 }
 0x4c9   :  { %v6584_v24 = vpop.f32.mrf.mxu1  ;;  %3885 = vmatpush.bf16.msrb.mxu2 %v5608_v42 }
 0x4ca   :  { %v6587_v48 = vpop.f32.mrf.mxu0 }
 0x4cc   :  { %3709 = vmatmul.bf16.gmra.mxu1 %v6340_v61 }
 0x4cd   :  { %3886 = vmatpush.bf16.msrb.mxu2 %v5607_v6 }
 0x4ce   :  { %v3112_v29 = vpop.f32.mrf.mxu2  ;;  %v3317_v25 = vpop.f32.mrf.mxu3 }
 0x4d1   :  { %v2987_v32 = vpop.f32.mrf.mxu1  ;;  %3887 = vmatpush.bf16.msrb.mxu2 %v5606_v3 }
 0x4d2   :  { %v3578_v37 = vpop.f32.mrf.mxu0 }
 0x4d3   :  { %3144 = vmatmul.bf16.gmra.mxu2 %v6497_v49  ;;  %3356 = vmatmul.bf16.gmra.mxu3 %v6497_v49 }
 0x4d5   :  { %4304 = vmatmul.bf16.gmra.mxu0 %v6300_v18 }
 0x4d6   :  { %v3114_v56 = vpop.f32.mrf.mxu2  ;;  %v3319_v27 = vpop.f32.mrf.mxu3 }
 0x4d9   :  { %v2989_v53 = vpop.f32.mrf.mxu1 }
 0x4da   :  { %v6593_v51 = vpop.f32.mrf.mxu0 }
 0x4dc   :  { %3713 = vmatmul.bf16.gmra.mxu1 %v6356_v9 }
 0x4de   :  { %v3115_v46 = vpop.f32.mrf.mxu2  ;;  %v3320_v19 = vpop.f32.mrf.mxu3 }
 0x4e1   :  { %v2990_v1 = vpop.f32.mrf.mxu1 }
 0x4e2   :  { %v3582_v10 = vpop.f32.mrf.mxu0 }
 0x4e3   :  { %3147 = vmatmul.bf16.gmra.mxu2 %v6253_v30  ;;  %3359 = vmatmul.bf16.gmra.mxu3 %v6253_v30 }
 0x4e5   :  { %4308 = vmatmul.bf16.gmra.mxu0 %v6316_v0 }
 0x4e6   :  { %v3117_v28 = vpop.f32.mrf.mxu2  ;;  %v3322_v62 = vpop.f32.mrf.mxu3 }
 0x4e7   :  { %v3172_v26 = vrot.slane %v3117_v28, 1  ;;  %v3412_v4 = vrot.slane %v3322_v62, 2 }
 0x4e9   :  { %v2992_v43 = vpop.f32.mrf.mxu1  ;;  %v3200_v21 = vadd.f32 %v3172_v26, %v6510_v23  ;;  %v5633_v23 = vld [vmem:[#allocation9 + $0x218] sm:$0xff] }
 0x4ea   :  { %v6600_v36 = vpop.f32.mrf.mxu0  ;;  %4492 = vmatpush.bf16.msrb.mxu1 %v5633_v23 }
 0x4ec   :  { %3717 = vmatmul.bf16.gmra.mxu1 %v6368_v44 }
 0x4ee   :  { %v3119_v7 = vpop.f32.mrf.mxu2  ;;  %v3324_v5 = vpop.f32.mrf.mxu3 }
 0x4ef   :  { %v3413_v12 = vrot.slane %v3324_v5, 2 }
 0x4f1   :  { %v3414_v29 = vsel %vm1438_vm14, %v3412_v4, %v3413_v12  ;;  %v2993_v25 = vpop.f32.mrf.mxu1 }
 0x4f2   :  { %v3454_v32 = vadd.f32 %v3414_v29, %v3200_v21  ;;  %v3586_v15 = vpop.f32.mrf.mxu0 }
 0x4f3   :  { %3888 = vmatmul.bf16.vlgmr.msrb.gmra.mxu2 %v6253_v30  ;;  %4142 = vmatmul.bf16.vlgmr.msrb.gmra.mxu3 %v6253_v30 }
 0x4f4   :  { %v6607_v47 = vadd.f32 %v6575_v33, %v3454_v32 }
 0x4f5   :  { %4312 = vmatmul.bf16.gmra.mxu0 %v6328_v57 }
 0x4f6   :  { %v3121_v60 = vpop.f32.mrf.mxu2  ;;  %v3327_v40 = vpop.f32.mrf.mxu3 }
 0x4f7   :  { %v3173_v27 = vrot.slane %v3121_v60, 1  ;;  %v3415_v42 = vrot.slane %v3327_v40, 2 }
 0x4f9   :  { %v3691_v56 = vpop.f32.mrf.mxu1  ;;  %v3201_v34 = vadd.f32 %v3173_v27, %v6523_v31 }
 0x4fa   :  { %v6611_v6 = vpop.f32.mrf.mxu0 }
 0x4fc   :  { %3721 = vmatmul.bf16.gmra.mxu1 %v6253_v30 }
 0x4fe   :  { %v3123_v37 = vpop.f32.mrf.mxu2  ;;  %v3329_v53 = vpop.f32.mrf.mxu3 }
 0x4ff   :  { %v3416_v41 = vrot.slane %v3329_v53, 2 }
 0x501   :  { %v3417_v33 = vsel %vm1438_vm14, %v3415_v42, %v3416_v41  ;;  %v3692_v17 = vpop.f32.mrf.mxu1 }
 0x502   :  { %v3455_v46 = vadd.f32 %v3417_v33, %v3201_v34  ;;  %v3590_v16 = vpop.f32.mrf.mxu0  ;;  %v5632_v33 = vld [vmem:[#allocation9 + $0x210] sm:$0xff] }
 0x503   :  { %3891 = vmatmul.bf16.gmra.mxu2 %v6284_v50  ;;  %4145 = vmatmul.bf16.gmra.mxu3 %v6284_v50 }
 0x504   :  { %v6618_v19 = vadd.f32 %v6587_v48, %v3455_v46  ;;  %4493 = vmatpush.bf16.msrb.mxu1 %v5632_v33 }
 0x505   :  { %4316 = vmatmul.bf16.gmra.mxu0 %v6340_v61 }
 0x506   :  { %v3125_v1 = vpop.f32.mrf.mxu2  ;;  %v3332_v3 = vpop.f32.mrf.mxu3 }
 0x507   :  { %v3174_v62 = vrot.slane %v3125_v1, 1  ;;  %v3418_v4 = vrot.slane %v3332_v3, 2 }
 0x509   :  { %v3694_v28 = vpop.f32.mrf.mxu1  ;;  %v3202_v5 = vadd.f32 %v3174_v62, %v6536_v55 }
 0x50a   :  { %v3773_v31 = vrot.slane %v3694_v28, 1  ;;  %v6625_v12 = vpop.f32.mrf.mxu0 }
 0x50c   :  { %v6621_v10 = vadd.f32 %v3773_v31, %v6508_v2  ;;  %3724 = vmatmul.bf16.gmra.mxu1 %v6253_v30 }
 0x50e   :  { %v3127_v43 = vpop.f32.mrf.mxu2  ;;  %v3334_v26 = vpop.f32.mrf.mxu3 }
 0x50f   :  { %v3419_v7 = vrot.slane %v3334_v26, 2 }
 0x511   :  { %v3420_v48 = vsel %vm1438_vm14, %v3418_v4, %v3419_v7  ;;  %v3696_v21 = vpop.f32.mrf.mxu1 }
 0x512   :  { %v3456_v29 = vadd.f32 %v3420_v48, %v3202_v5  ;;  %v3594_v60 = vpop.f32.mrf.mxu0 }
 0x513   :  { %3896 = vmatmul.bf16.gmra.mxu2 %v6300_v18  ;;  %4148 = vmatmul.bf16.gmra.mxu3 %v6300_v18 }
 0x514   :  { %v6632_v2 = vadd.f32 %v6593_v51, %v3456_v29 }
 0x515   :  { %4320 = vmatmul.bf16.gmra.mxu0 %v6356_v9 }
 0x516   :  { %v3129_v25 = vpop.f32.mrf.mxu2  ;;  %v3337_v32 = vpop.f32.mrf.mxu3 }
 0x517   :  { %v3175_v15 = vrot.slane %v3129_v25, 1  ;;  %v3421_v37 = vrot.slane %v3337_v32, 2 }
 0x519   :  { %v3698_v40 = vpop.f32.mrf.mxu1  ;;  %v3203_v42 = vadd.f32 %v3175_v15, %v6549_v35 }
 0x51a   :  { %v3774_v55 = vrot.slane %v3698_v40, 1  ;;  %v6639_v41 = vpop.f32.mrf.mxu0 }
 0x51c   :  { %v6635_v56 = vadd.f32 %v3774_v55, %v6521_v54  ;;  %3727 = vmatmul.bf16.gmra.mxu1 %v6407_v52 }
 0x51e   :  { %v3131_v23 = vpop.f32.mrf.mxu2  ;;  %v3339_v27 = vpop.f32.mrf.mxu3 }
 0x51f   :  { %v3422_v53 = vrot.slane %v3339_v27, 2 }
 0x521   :  { %v3423_v51 = vsel %vm1438_vm14, %v3421_v37, %v3422_v53  ;;  %v3700_v34 = vpop.f32.mrf.mxu1 }
 0x522   :  { %v3457_v17 = vadd.f32 %v3423_v51, %v3203_v42  ;;  %v3598_v35 = vpop.f32.mrf.mxu0 }
 0x523   :  { %3901 = vmatmul.bf16.gmra.mxu2 %v6316_v0  ;;  %4152 = vmatmul.bf16.gmra.mxu3 %v6316_v0 }
 0x524   :  { %v6646_v54 = vadd.f32 %v6600_v36, %v3457_v17 }
 0x525   :  { %4324 = vmatmul.bf16.gmra.mxu0 %v6368_v44 }
 0x526   :  { %v3133_v46 = vpop.f32.mrf.mxu2  ;;  %v3342_v1 = vpop.f32.mrf.mxu3 }
 0x527   :  { %v3176_v28 = vrot.slane %v3133_v46, 1  ;;  %v3424_v26 = vrot.slane %v3342_v1, 2 }
 0x529   :  { %v3702_v3 = vpop.f32.mrf.mxu1  ;;  %v3204_v7 = vadd.f32 %v3176_v28, %v6560_v63 }
 0x52a   :  { %v3775_v16 = vrot.slane %v3702_v3, 1  ;;  %v3600_v5 = vpop.f32.mrf.mxu0 }
 0x52c   :  { %v6649_v31 = vadd.f32 %v3775_v16, %v6534_v20  ;;  %3731 = vmatmul.bf16.gmra.mxu1 %v6425_v39 }
 0x52e   :  { %v3135_v62 = vpop.f32.mrf.mxu2  ;;  %v3344_v43 = vpop.f32.mrf.mxu3 }
 0x52f   :  { %v3425_v4 = vrot.slane %v3344_v43, 2 }
 0x531   :  { %v3426_v36 = vsel %vm1438_vm14, %v3424_v26, %v3425_v4  ;;  %v3704_v48 = vpop.f32.mrf.mxu1 }
 0x532   :  { %v3458_v21 = vadd.f32 %v3426_v36, %v3204_v7  ;;  %v3601_v32 = vpop.f32.mrf.mxu0 }
 0x533   :  { %3906 = vmatmul.bf16.gmra.mxu2 %v6328_v57  ;;  %4156 = vmatmul.bf16.gmra.mxu3 %v6328_v57 }
 0x534   :  { %v6658_v20 = vadd.f32 %v6611_v6, %v3458_v21 }
 0x535   :  { %4328 = vmatmul.bf16.gmra.mxu0 %v6253_v30 }
 0x536   :  { %v3137_v29 = vpop.f32.mrf.mxu2  ;;  %v3347_v25 = vpop.f32.mrf.mxu3 }
 0x537   :  { %v3177_v63 = vrot.slane %v3137_v29, 1  ;;  %v3427_v27 = vrot.slane %v3347_v25, 2 }
 0x539   :  { %v3706_v60 = vpop.f32.mrf.mxu1  ;;  %v3205_v53 = vadd.f32 %v3177_v63, %v6571_v13 }
 0x53a   :  { %v3776_v40 = vrot.slane %v3706_v60, 1  ;;  %v4299_v42 = vpop.f32.mrf.mxu0 }
 0x53c   :  { %v6661_v55 = vadd.f32 %v3776_v40, %v6547_v11  ;;  %3735 = vmatmul.bf16.gmra.mxu1 %v6443_v22  ;;  %v5631_v11 = vld [vmem:[#allocation9 + $0x208] sm:$0xff] }
 0x53d   :  { %4494 = vmatpush.bf16.msrb.mxu1 %v5631_v11 }
 0x53e   :  { %v3139_v15 = vpop.f32.mrf.mxu2  ;;  %v3349_v23 = vpop.f32.mrf.mxu3 }
 0x53f   :  { %v3428_v37 = vrot.slane %v3349_v23, 2 }
 0x541   :  { %v3429_v6 = vsel %vm1438_vm14, %v3427_v27, %v3428_v37  ;;  %v3708_v51 = vpop.f32.mrf.mxu1 }
 0x542   :  { %v3459_v34 = vadd.f32 %v3429_v6, %v3205_v53  ;;  %v4300_v1 = vpop.f32.mrf.mxu0  ;;  %v5630_v53 = vld [vmem:[#allocation9 + $0x200] sm:$0xff] }
 0x543   :  { %3911 = vmatmul.bf16.gmra.mxu2 %v6340_v61  ;;  %4160 = vmatmul.bf16.gmra.mxu3 %v6340_v61 }
 0x544   :  { %v6670_v33 = vadd.f32 %v6625_v12, %v3459_v34  ;;  %4495 = vmatpush.bf16.msrb.mxu1 %v5630_v53 }
 0x545   :  { %4332 = vmatmul.bf16.gmra.mxu0 %v6253_v30 }
 0x546   :  { %v3141_v17 = vpop.f32.mrf.mxu2  ;;  %v3352_v46 = vpop.f32.mrf.mxu3 }
 0x547   :  { %v3178_v3 = vrot.slane %v3141_v17, 1  ;;  %v3430_v43 = vrot.slane %v3352_v46, 2 }
 0x549   :  { %v3710_v13 = vpop.f32.mrf.mxu1  ;;  %v3206_v4 = vadd.f32 %v3178_v3, %v6584_v24 }
 0x54a   :  { %v3777_v35 = vrot.slane %v3710_v13, 1  ;;  %v4302_v12 = vpop.f32.mrf.mxu0 }
 0x54c   :  { %v6673_v16 = vadd.f32 %v3777_v35, %v6558_v59  ;;  %3739 = vmatmul.bf16.gmra.mxu1 %v6457_v8 }
 0x54e   :  { %v3143_v28 = vpop.f32.mrf.mxu2  ;;  %v3354_v62 = vpop.f32.mrf.mxu3 }
 0x54f   :  { %v3431_v26 = vrot.slane %v3354_v62, 2 }
 0x551   :  { %v3432_v7 = vsel %vm1438_vm14, %v3430_v43, %v3431_v26  ;;  %v3712_v5 = vpop.f32.mrf.mxu1 }
 0x552   :  { %v3460_v36 = vadd.f32 %v3432_v7, %v3206_v4  ;;  %v4303_v29 = vpop.f32.mrf.mxu0 }
 0x553   :  { %3916 = vmatmul.bf16.gmra.mxu2 %v6356_v9  ;;  %4164 = vmatmul.bf16.gmra.mxu3 %v6356_v9 }
 0x554   :  { %v6682_v59 = vadd.f32 %v6639_v41, %v3460_v36 }
 0x555   :  { %4335 = vmatmul.bf16.gmra.mxu0 %v6407_v52 }
 0x556   :  { %v3145_v48 = vpop.f32.mrf.mxu2  ;;  %v3357_v21 = vpop.f32.mrf.mxu3 }
 0x559   :  { %v3714_v25 = vpop.f32.mrf.mxu1 }
 0x55a   :  { %v3778_v32 = vrot.slane %v3714_v25, 1  ;;  %v4305_v63 = vpop.f32.mrf.mxu0 }
 0x55c   :  { %v6685_v24 = vadd.f32 %v3778_v32, %v6569_v14  ;;  %3743 = vmatmul.bf16.gmra.mxu1 %v6473_v38 }
 0x55e   :  { %v3146_v60 = vpop.f32.mrf.mxu2  ;;  %v3358_v40 = vpop.f32.mrf.mxu3 }
 0x55f   :  { %v4381_v40 = vrot.slane %v4305_v63, 1 }
 0x561   :  { %v3716_v15 = vpop.f32.mrf.mxu1 }
 0x562   :  { %v4307_v27 = vpop.f32.mrf.mxu0 }
 0x563   :  { %3921 = vmatmul.bf16.gmra.mxu2 %v6368_v44  ;;  %4168 = vmatmul.bf16.gmra.mxu3 %v6368_v44 }
 0x565   :  { %4338 = vmatmul.bf16.gmra.mxu0 %v6425_v39 }
 0x566   :  { %v3148_v41 = vpop.f32.mrf.mxu2  ;;  %v3360_v23 = vpop.f32.mrf.mxu3 }
 0x569   :  { %v3718_v37 = vpop.f32.mrf.mxu1 }
 0x56a   :  { %v3779_v42 = vrot.slane %v3718_v37, 1  ;;  %v4309_v34 = vpop.f32.mrf.mxu0 }
 0x56c   :  { %v6692_v14 = vadd.f32 %v3779_v42, %v6582_v58  ;;  %3747 = vmatmul.bf16.gmra.mxu1 %v6487_v45 }
 0x56e   :  { %v3149_v6 = vpop.f32.mrf.mxu2  ;;  %v3361_v51 = vpop.f32.mrf.mxu3 }
 0x571   :  { %v3720_v11 = vpop.f32.mrf.mxu1 }
 0x572   :  { %v4311_v1 = vpop.f32.mrf.mxu0 }
 0x573   :  { %3926 = vmatmul.bf16.gmra.mxu2 %v6253_v30  ;;  %4172 = vmatmul.bf16.gmra.mxu3 %v6253_v30 }
 0x575   :  { %4342 = vmatmul.bf16.gmra.mxu0 %v6443_v22 }
 0x576   :  { %v3889_v17 = vpop.f32.mrf.mxu2  ;;  %v4143_v46 = vpop.f32.mrf.mxu3 }
 0x579   :  { %v3722_v13 = vpop.f32.mrf.mxu1 }
 0x57a   :  { %v6699_v3 = vpop.f32.mrf.mxu0  ;;  %v4382_v13 = vrot.slane %v4309_v34, 1 }
 0x57c   :  { %3751 = vmatmul.bf16.gmra.mxu1 %v6497_v49 }
 0x57e   :  { %v3890_v58 = vpop.f32.mrf.mxu2  ;;  %v4144_v35 = vpop.f32.mrf.mxu3 }
 0x581   :  { %v3723_v28 = vpop.f32.mrf.mxu1 }
 0x582   :  { %v4315_v26 = vpop.f32.mrf.mxu0 }
 0x583   :  { %3929 = vmatmul.bf16.gmra.mxu2 %v6253_v30  ;;  %4176 = vmatmul.bf16.gmra.mxu3 %v6253_v30 }
 0x585   :  { %4346 = vmatmul.bf16.gmra.mxu0 %v6457_v8 }
 0x586   :  { %v3892_v62 = vpop.f32.mrf.mxu2  ;;  %v4146_v43 = vpop.f32.mrf.mxu3 }
 0x587   :  { %v3999_v5 = vrot.slane %v3892_v62, 2 }
 0x589   :  { %v3725_v4 = vpop.f32.mrf.mxu1 }
 0x58a   :  { %v6705_v48 = vpop.f32.mrf.mxu0 }
 0x58c   :  { %3755 = vmatmul.bf16.gmra.mxu1 %v6253_v30 }
 0x58e   :  { %v3894_v12 = vpop.f32.mrf.mxu2  ;;  %v4147_v7 = vpop.f32.mrf.mxu3 }
 0x58f   :  { %v4000_v36 = vrot.slane %v3894_v12, 2 }
 0x591   :  { %v3726_v21 = vpop.f32.mrf.mxu1  ;;  %v4001_v29 = vsel %vm1438_vm14, %v3999_v5, %v4000_v36 }
 0x592   :  { %v4055_v25 = vadd.f32 %v4001_v29, %v6621_v10  ;;  %v4319_v41 = vpop.f32.mrf.mxu0 }
 0x593   :  { %3932 = vmatmul.bf16.gmra.mxu2 %v6407_v52  ;;  %4179 = vmatmul.bf16.gmra.mxu3 %v6407_v52 }
 0x595   :  { %4350 = vmatmul.bf16.gmra.mxu0 %v6473_v38 }
 0x596   :  { %v3897_v32 = vpop.f32.mrf.mxu2  ;;  %v4149_v60 = vpop.f32.mrf.mxu3 }
 0x597   :  { %v4211_v15 = vadd.f32 %v4149_v60, %v4055_v25  ;;  %v4002_v6 = vrot.slane %v3897_v32, 2 }
 0x599   :  { %v6712_v23 = vadd.f32 %v4381_v40, %v4211_v15  ;;  %v3728_v27 = vpop.f32.mrf.mxu1 }
 0x59a   :  { %v3780_v37 = vrot.slane %v3728_v27, 1  ;;  %v6718_v11 = vpop.f32.mrf.mxu0 }
 0x59c   :  { %v6715_v53 = vadd.f32 %v3780_v37, %v6607_v47  ;;  %4496 = vmatmul.bf16.vlgmr.msrb.gmra.mxu1 %v6253_v30 }
 0x59e   :  { %v3899_v10 = vpop.f32.mrf.mxu2  ;;  %v4151_v42 = vpop.f32.mrf.mxu3 }
 0x59f   :  { %v4003_v51 = vrot.slane %v3899_v10, 2 }
 0x5a1   :  { %v3730_v17 = vpop.f32.mrf.mxu1  ;;  %v4004_v63 = vsel %vm1438_vm14, %v4002_v6, %v4003_v51 }
 0x5a2   :  { %v4056_v46 = vadd.f32 %v4004_v63, %v6635_v56  ;;  %v4323_v35 = vpop.f32.mrf.mxu0 }
 0x5a3   :  { %3937 = vmatmul.bf16.gmra.mxu2 %v6425_v39  ;;  %4182 = vmatmul.bf16.gmra.mxu3 %v6425_v39 }
 0x5a5   :  { %4354 = vmatmul.bf16.gmra.mxu0 %v6487_v45 }
 0x5a6   :  { %v3902_v47 = vpop.f32.mrf.mxu2  ;;  %v4153_v1 = vpop.f32.mrf.mxu3 }
 0x5a7   :  { %v4212_v58 = vadd.f32 %v4153_v1, %v4056_v46  ;;  %v4005_v12 = vrot.slane %v3902_v47, 2 }
 0x5a9   :  { %v6725_v28 = vadd.f32 %v4382_v13, %v4212_v58  ;;  %v3732_v62 = vpop.f32.mrf.mxu1 }
 0x5aa   :  { %v3781_v43 = vrot.slane %v3732_v62, 1  ;;  %v6731_v5 = vpop.f32.mrf.mxu0 }
 0x5ac   :  { %v6728_v26 = vadd.f32 %v3781_v43, %v6618_v19  ;;  %4499 = vmatmul.bf16.gmra.mxu1 %v6284_v50  ;;  %v4383_v50 = vrot.slane %v6699_v3, 1 }
 0x5ae   :  { %v3904_v56 = vpop.f32.mrf.mxu2  ;;  %v4155_v4 = vpop.f32.mrf.mxu3 }
 0x5af   :  { %v4006_v7 = vrot.slane %v3904_v56, 2 }
 0x5b1   :  { %v3734_v36 = vpop.f32.mrf.mxu1  ;;  %v4007_v34 = vsel %vm1438_vm14, %v4005_v12, %v4006_v7 }
 0x5b2   :  { %v4057_v21 = vadd.f32 %v4007_v34, %v6649_v31  ;;  %v4327_v32 = vpop.f32.mrf.mxu0 }
 0x5b3   :  { %3942 = vmatmul.bf16.gmra.mxu2 %v6443_v22  ;;  %4186 = vmatmul.bf16.gmra.mxu3 %v6443_v22 }
 0x5b5   :  { %4358 = vmatmul.bf16.gmra.mxu0 %v6497_v49 }
 0x5b6   :  { %v3907_v19 = vpop.f32.mrf.mxu2  ;;  %v4157_v29 = vpop.f32.mrf.mxu3 }
 0x5b7   :  { %v4213_v25 = vadd.f32 %v4157_v29, %v4057_v21  ;;  %v4008_v37 = vrot.slane %v3907_v19, 2 }
 0x5b9   :  { %v6739_v60 = vadd.f32 %v4383_v50, %v4213_v25  ;;  %v3736_v40 = vpop.f32.mrf.mxu1 }
 0x5ba   :  { %v3782_v15 = vrot.slane %v3736_v40, 1  ;;  %v6745_v42 = vpop.f32.mrf.mxu0 }
 0x5bc   :  { %v6742_v41 = vadd.f32 %v3782_v15, %v6632_v2  ;;  %4502 = vmatmul.bf16.gmra.mxu1 %v6300_v18  ;;  %v4384_v18 = vrot.slane %v6705_v48, 1 }
 0x5be   :  { %v3909_v31 = vpop.f32.mrf.mxu2  ;;  %v4159_v27 = vpop.f32.mrf.mxu3 }
 0x5bf   :  { %v4009_v10 = vrot.slane %v3909_v31, 2 }
 0x5c1   :  { %v3738_v6 = vpop.f32.mrf.mxu1  ;;  %v4010_v3 = vsel %vm1438_vm14, %v4008_v37, %v4009_v10 }
 0x5c2   :  { %v4058_v51 = vadd.f32 %v4010_v3, %v6661_v55  ;;  %v4331_v46 = vpop.f32.mrf.mxu0 }
 0x5c3   :  { %3947 = vmatmul.bf16.gmra.mxu2 %v6457_v8  ;;  %4190 = vmatmul.bf16.gmra.mxu3 %v6457_v8 }
 0x5c5   :  { %4362 = vmatmul.bf16.gmra.mxu0 %v6253_v30 }
 0x5c6   :  { %v3912_v2 = vpop.f32.mrf.mxu2  ;;  %v4161_v17 = vpop.f32.mrf.mxu3 }
 0x5c7   :  { %v4214_v63 = vadd.f32 %v4161_v17, %v4058_v51  ;;  %v4011_v62 = vrot.slane %v3912_v2, 2 }
 0x5c9   :  { %v6753_v47 = vadd.f32 %v4384_v18, %v4214_v63  ;;  %v3740_v1 = vpop.f32.mrf.mxu1 }
 0x5ca   :  { %v3783_v13 = vrot.slane %v3740_v1, 1  ;;  %v4333_v56 = vpop.f32.mrf.mxu0 }
 0x5cc   :  { %v6756_v58 = vadd.f32 %v3783_v13, %v6646_v54  ;;  %4507 = vmatmul.bf16.gmra.mxu1 %v6316_v0  ;;  %v4385_v0 = vrot.slane %v6718_v11, 1 }
 0x5ce   :  { %v3914_v55 = vpop.f32.mrf.mxu2  ;;  %v4163_v35 = vpop.f32.mrf.mxu3 }
 0x5cf   :  { %v4012_v43 = vrot.slane %v3914_v55, 2  ;;  %v4387_v35 = vrot.slane %v6745_v42, 1 }
 0x5d1   :  { %v3742_v4 = vpop.f32.mrf.mxu1  ;;  %v4013_v12 = vsel %vm1438_vm14, %v4011_v62, %v4012_v43 }
 0x5d2   :  { %v4059_v48 = vadd.f32 %v4013_v12, %v6673_v16  ;;  %v4334_v34 = vpop.f32.mrf.mxu0 }
 0x5d3   :  { %3952 = vmatmul.bf16.gmra.mxu2 %v6473_v38  ;;  %4194 = vmatmul.bf16.gmra.mxu3 %v6473_v38 }
 0x5d6   :  { %v3917_v54 = vpop.f32.mrf.mxu2  ;;  %v4165_v7 = vpop.f32.mrf.mxu3 }
 0x5d7   :  { %v4215_v36 = vadd.f32 %v4165_v7, %v4059_v48  ;;  %v4014_v32 = vrot.slane %v3917_v54, 2 }
 0x5d9   :  { %v6765_v21 = vadd.f32 %v4385_v0, %v4215_v36  ;;  %v3744_v19 = vpop.f32.mrf.mxu1 }
 0x5da   :  { %v3784_v29 = vrot.slane %v3744_v19, 1  ;;  %v4336_v15 = vpop.f32.mrf.mxu0 }
 0x5dc   :  { %v6768_v50 = vadd.f32 %v3784_v29, %v6658_v20  ;;  %4512 = vmatmul.bf16.gmra.mxu1 %v6328_v57  ;;  %v4386_v20 = vrot.slane %v6731_v5, 1 }
 0x5de   :  { %v3919_v16 = vpop.f32.mrf.mxu2  ;;  %v4167_v25 = vpop.f32.mrf.mxu3 }
 0x5df   :  { %v4015_v40 = vrot.slane %v3919_v16, 2 }
 0x5e1   :  { %v3746_v31 = vpop.f32.mrf.mxu1  ;;  %v4016_v27 = vsel %vm1438_vm14, %v4014_v32, %v4015_v40 }
 0x5e2   :  { %v4060_v11 = vadd.f32 %v4016_v27, %v6685_v24  ;;  %v4337_v57 = vpop.f32.mrf.mxu0 }
 0x5e3   :  { %3957 = vmatmul.bf16.gmra.mxu2 %v6487_v45  ;;  %4198 = vmatmul.bf16.gmra.mxu3 %v6487_v45 }
 0x5e6   :  { %v3922_v37 = vpop.f32.mrf.mxu2  ;;  %v4169_v10 = vpop.f32.mrf.mxu3 }
 0x5e7   :  { %v4216_v6 = vadd.f32 %v4169_v10, %v4060_v11  ;;  %v4017_v63 = vrot.slane %v3922_v37, 2 }
 0x5e9   :  { %v6776_v3 = vadd.f32 %v4386_v20, %v4216_v6  ;;  %v3748_v51 = vpop.f32.mrf.mxu1 }
 0x5ea   :  { %v3785_v2 = vrot.slane %v3748_v51, 1  ;;  %v4339_v1 = vpop.f32.mrf.mxu0 }
 0x5ec   :  { %v6779_v17 = vadd.f32 %v3785_v2, %v6670_v33  ;;  %4517 = vmatmul.bf16.gmra.mxu1 %v6340_v61  ;;  %v4388_v2 = vrot.slane %v4339_v1, 1 }
 0x5ee   :  { %v3924_v24 = vpop.f32.mrf.mxu2  ;;  %v4171_v18 = vpop.f32.mrf.mxu3 }
 0x5ef   :  { %v4018_v46 = vrot.slane %v3924_v24, 2 }
 0x5f1   :  { %v3750_v13 = vpop.f32.mrf.mxu1  ;;  %v4019_v55 = vsel %vm1438_vm14, %v4017_v63, %v4018_v46 }
 0x5f2   :  { %v4061_v5 = vadd.f32 %v4019_v55, %v6692_v14  ;;  %v4341_v61 = vpop.f32.mrf.mxu0 }
 0x5f3   :  { %3962 = vmatmul.bf16.gmra.mxu2 %v6497_v49  ;;  %4202 = vmatmul.bf16.gmra.mxu3 %v6497_v49 }
 0x5f6   :  { %v3927_v33 = vpop.f32.mrf.mxu2  ;;  %v4173_v62 = vpop.f32.mrf.mxu3 }
 0x5f7   :  { %v4217_v43 = vadd.f32 %v4173_v62, %v4061_v5 }
 0x5f9   :  { %v6787_v56 = vadd.f32 %v4387_v35, %v4217_v43  ;;  %v3752_v4 = vpop.f32.mrf.mxu1 }
 0x5fa   :  { %v3786_v12 = vrot.slane %v3752_v4, 1  ;;  %v4343_v7 = vpop.f32.mrf.mxu0 }
 0x5fb   :  { %v4389_v4 = vrot.slane %v4343_v7, 1 }
 0x5fc   :  { %v6790_v48 = vadd.f32 %v3786_v12, %v6682_v59  ;;  %4522 = vmatmul.bf16.gmra.mxu1 %v6356_v9 }
 0x5fe   :  { %v3928_v14 = vpop.f32.mrf.mxu2  ;;  %v4175_v54 = vpop.f32.mrf.mxu3 }
 0x601   :  { %v3754_v0 = vpop.f32.mrf.mxu1 }
 0x602   :  { %v4345_v34 = vpop.f32.mrf.mxu0 }
 0x603   :  { %4206 = vmatmul.bf16.gmra.mxu3 %v6253_v30  ;;  %3967 = vmatmul.bf16.gmra.mxu2 %v6253_v30 }
 0x606   :  { %v3930_v42 = vpop.f32.mrf.mxu2  ;;  %v4177_v36 = vpop.f32.mrf.mxu3 }
 0x609   :  { %v3756_v19 = vpop.f32.mrf.mxu1 }
 0x60a   :  { %v4347_v59 = vpop.f32.mrf.mxu0 }
 0x60c   :  { %4527 = vmatmul.bf16.gmra.mxu1 %v6368_v44 }
 0x60e   :  { %v3931_v29 = vpop.f32.mrf.mxu2  ;;  %v4178_v16 = vpop.f32.mrf.mxu3 }
 0x611   :  { %v3757_v25 = vpop.f32.mrf.mxu1 }
 0x612   :  { %v4349_v40 = vpop.f32.mrf.mxu0 }
 0x616   :  { %v3933_v32 = vpop.f32.mrf.mxu2  ;;  %v4180_v9 = vpop.f32.mrf.mxu3 }
 0x617   :  { %v4020_v11 = vrot.slane %v3933_v32, 2  ;;  %v6818_v9 = vld [vmem:[%s6938_s6] ss:$0 sm:$0xff] }
 0x619   :  { %v4497_v15 = vpop.f32.mrf.mxu1 }
 0x61a   :  { %v6797_v10 = vpop.f32.mrf.mxu0 }
 0x61c   :  { %4532 = vmatmul.bf16.gmra.mxu1 %v6253_v30 }
 0x61e   :  { %v3935_v31 = vpop.f32.mrf.mxu2  ;;  %v4181_v27 = vpop.f32.mrf.mxu3 }
 0x61f   :  { %v4021_v37 = vrot.slane %v3935_v31, 2  ;;  %v4390_v27 = vrot.slane %v4347_v59, 1 }
 0x621   :  { %v4498_v20 = vpop.f32.mrf.mxu1  ;;  %v4022_v6 = vsel %vm1438_vm14, %v4020_v11, %v4021_v37 }
 0x622   :  { %v4062_v44 = vadd.f32 %v4022_v6, %v6715_v53  ;;  %v4353_v18 = vpop.f32.mrf.mxu0 }
 0x626   :  { %v3938_v57 = vpop.f32.mrf.mxu2  ;;  %v4183_v51 = vpop.f32.mrf.mxu3 }
 0x627   :  { %v4218_v24 = vadd.f32 %v4183_v51, %v4062_v44  ;;  %v4023_v5 = vrot.slane %v3938_v57, 2 }
 0x629   :  { %v6801_v63 = vadd.f32 %v4388_v2, %v4218_v24  ;;  %v4500_v46 = vpop.f32.mrf.mxu1 }
 0x62a   :  { %v6804_v33 = vpop.f32.mrf.mxu0 }
 0x62c   :  { %4537 = vmatmul.bf16.gmra.mxu1 %v6253_v30 }
 0x62e   :  { %v3940_v13 = vpop.f32.mrf.mxu2  ;;  %v4185_v55 = vpop.f32.mrf.mxu3 }
 0x62f   :  { %v4024_v35 = vrot.slane %v3940_v13, 2 }
 0x631   :  { %v4501_v62 = vpop.f32.mrf.mxu1  ;;  %v4025_v43 = vsel %vm1438_vm14, %v4023_v5, %v4024_v35 }
 0x632   :  { %v4063_v53 = vadd.f32 %v4025_v43, %v6728_v26  ;;  %v4357_v14 = vpop.f32.mrf.mxu0 }
 0x636   :  { %v3943_v61 = vpop.f32.mrf.mxu2  ;;  %v4187_v1 = vpop.f32.mrf.mxu3 }
 0x637   :  { %v4219_v12 = vadd.f32 %v4187_v1, %v4063_v53  ;;  %v4026_v34 = vrot.slane %v3943_v61, 2  ;;  %v4391_v53 = vrot.slane %v6797_v10, 1 }
 0x639   :  { %v6808_v54 = vadd.f32 %v4389_v4, %v4219_v12  ;;  %v4503_v0 = vpop.f32.mrf.mxu1 }
 0x63a   :  { %v6811_v29 = vpop.f32.mrf.mxu0  ;;  %v4607_v26 = vrot.slane %v4503_v0, 2 }
 0x63c   :  { %4540 = vmatmul.bf16.gmra.mxu1 %v6407_v52 }
 0x63e   :  { %v3945_v42 = vpop.f32.mrf.mxu2  ;;  %v4189_v36 = vpop.f32.mrf.mxu3 }
 0x63f   :  { %v4027_v19 = vrot.slane %v3945_v42, 2 }
 0x641   :  { %v4505_v16 = vpop.f32.mrf.mxu1  ;;  %v4028_v25 = vsel %vm1438_vm14, %v4026_v34, %v4027_v19 }
 0x642   :  { %v4608_v32 = vrot.slane %v4505_v16, 2  ;;  %v4064_v7 = vadd.f32 %v4028_v25, %v6742_v41  ;;  %v4361_v20 = vpop.f32.mrf.mxu0 }
 0x644   :  { %v4609_v52 = vsel %vm1438_vm14, %v4607_v26, %v4608_v32 }
 0x645   :  { %v4663_v40 = vadd.f32 %v4609_v52, %v6712_v23  ;;  %v4392_v52 = vrot.slane %v6804_v33, 1 }
 0x646   :  { %v3948_v15 = vpop.f32.mrf.mxu2  ;;  %v4191_v31 = vpop.f32.mrf.mxu3 }
 0x647   :  { %v4681_v11 = vadd.f32 %v6818_v9, %v4663_v40  ;;  %v4220_v37 = vadd.f32 %v4191_v31, %v4064_v7  ;;  %v4029_v2 = vrot.slane %v3948_v15, 2 }
 0x649   :  { %vm4695_vm13 = vcmp.ge.f32.partialorder %v4681_v11, 0.0  ;;  %v4709_v6 = vmul.f32 0.1, %v4681_v11  ;;  %v6823_v44 = vadd.f32 %v4390_v27, %v4220_v37  ;;  %v4508_v41 = vpop.f32.mrf.mxu1 }
 0x64a   :  { %v4610_v46 = vrot.slane %v4508_v41, 2 }
 0x64b   :  { %v4723_v57 = vsel %vm4695_vm13, %v4681_v11, %v4709_v6 }
 0x64c   :  { %4737 = vst [vmem:[%s6939_s7] sm:$0x7f] %v4723_v57  ;;  %4543 = vmatmul.bf16.gmra.mxu1 %v6425_v39 }
 0x64e   :  { %v3950_v23 = vpop.f32.mrf.mxu2  ;;  %v4193_v51 = vpop.f32.mrf.mxu3 }
 0x64f   :  { %v4030_v59 = vrot.slane %v3950_v23, 2 }
 0x651   :  { %v4510_v24 = vpop.f32.mrf.mxu1  ;;  %v4031_v18 = vsel %vm1438_vm14, %v4029_v2, %v4030_v59 }
 0x652   :  { %v4611_v13 = vrot.slane %v4510_v24, 2  ;;  %v4065_v55 = vadd.f32 %v4031_v18, %v6756_v58 }
 0x654   :  { %v4612_v5 = vsel %vm1438_vm14, %v4610_v46, %v4611_v13 }
 0x655   :  { %v4664_v35 = vadd.f32 %v4612_v5, %v6725_v28 }
 0x656   :  { %v3953_v62 = vpop.f32.mrf.mxu2  ;;  %v4195_v43 = vpop.f32.mrf.mxu3 }
 0x657   :  { %v4682_v39 = vadd.f32 %v6818_v9, %v4664_v35  ;;  %v4221_v61 = vadd.f32 %v4195_v43, %v4065_v55  ;;  %v4032_v0 = vrot.slane %v3953_v62, 2 }
 0x659   :  { %vm4696_vm15 = vcmp.ge.f32.partialorder %v4682_v39, 0.0  ;;  %v4710_v1 = vmul.f32 0.1, %v4682_v39  ;;  %v6835_v4 = vadd.f32 %v4391_v53, %v4221_v61  ;;  %v4513_v12 = vpop.f32.mrf.mxu1 }
 0x65a   :  { %v4613_v34 = vrot.slane %v4513_v12, 2 }
 0x65b   :  { %v4724_v14 = vsel %vm4696_vm15, %v4682_v39, %v4710_v1 }
 0x65c   :  { %4738 = vst [vmem:[%s6939_s7 + $0x8] sm:$0x7f] %v4724_v14  ;;  %4548 = vmatmul.bf16.gmra.mxu1 %v6443_v22 }
 0x65e   :  { %v3955_v28 = vpop.f32.mrf.mxu2  ;;  %v4197_v58 = vpop.f32.mrf.mxu3 }
 0x65f   :  { %v4033_v42 = vrot.slane %v3955_v28, 2 }
 0x661   :  { %v4515_v10 = vpop.f32.mrf.mxu1  ;;  %v4034_v36 = vsel %vm1438_vm14, %v4032_v0, %v4033_v42 }
 0x662   :  { %v4614_v19 = vrot.slane %v4515_v10, 2  ;;  %v4066_v16 = vadd.f32 %v4034_v36, %v6768_v50 }
 0x664   :  { %v4615_v25 = vsel %vm1438_vm14, %v4613_v34, %v4614_v19 }
 0x665   :  { %v4665_v26 = vadd.f32 %v4615_v25, %v6739_v60  ;;  %v4363_v60 = vpop.f32.mrf.mxu0 }
 0x666   :  { %v3958_v32 = vpop.f32.mrf.mxu2  ;;  %v4199_v7 = vpop.f32.mrf.mxu3  ;;  %v4394_v0 = vrot.slane %v4363_v60, 1 }
 0x667   :  { %v4683_v22 = vadd.f32 %v6818_v9, %v4665_v26  ;;  %v4222_v40 = vadd.f32 %v4199_v7, %v4066_v16  ;;  %v4035_v20 = vrot.slane %v3958_v32, 2 }
 0x669   :  { %vm4697_vm0 = vcmp.ge.f32.partialorder %v4683_v22, 0.0  ;;  %v4711_v15 = vmul.f32 0.1, %v4683_v22  ;;  %v6847_v31 = vadd.f32 %v4392_v52, %v4222_v40  ;;  %v4518_v27 = vpop.f32.mrf.mxu1 }
 0x66a   :  { %v4616_v57 = vrot.slane %v4518_v27, 2 }
 0x66b   :  { %v4725_v11 = vsel %vm4697_vm0, %v4683_v22, %v4711_v15 }
 0x66c   :  { %4739 = vst [vmem:[%s6939_s7 + $0x10] sm:$0x7f] %v4725_v11  ;;  %4553 = vmatmul.bf16.gmra.mxu1 %v6457_v8  ;;  %v4393_v8 = vrot.slane %v6811_v29, 1 }
 0x66d   :  { %v4365_v59 = vpop.f32.mrf.mxu0 }
 0x66e   :  { %v3960_v50 = vpop.f32.mrf.mxu2  ;;  %v4201_v37 = vpop.f32.mrf.mxu3 }
 0x66f   :  { %v4036_v33 = vrot.slane %v3960_v50, 2 }
 0x671   :  { %v4520_v6 = vpop.f32.mrf.mxu1  ;;  %v4037_v41 = vsel %vm1438_vm14, %v4035_v20, %v4036_v33 }
 0x672   :  { %v4617_v23 = vrot.slane %v4520_v6, 2  ;;  %v4067_v51 = vadd.f32 %v4037_v41, %v6779_v17 }
 0x674   :  { %v4618_v2 = vsel %vm1438_vm14, %v4616_v57, %v4617_v23 }
 0x675   :  { %v4666_v24 = vadd.f32 %v4618_v2, %v6753_v47 }
 0x676   :  { %v3963_v18 = vpop.f32.mrf.mxu2  ;;  %v4203_v46 = vpop.f32.mrf.mxu3 }
 0x677   :  { %v4684_v13 = vadd.f32 %v6818_v9, %v4666_v24  ;;  %v4223_v55 = vadd.f32 %v4203_v46, %v4067_v51  ;;  %v4038_v53 = vrot.slane %v3963_v18, 2 }
 0x679   :  { %vm4698_vm1 = vcmp.ge.f32.partialorder %v4684_v13, 0.0  ;;  %v4712_v5 = vmul.f32 0.1, %v4684_v13  ;;  %v6859_v35 = vadd.f32 %v4393_v8, %v4223_v55  ;;  %v4523_v62 = vpop.f32.mrf.mxu1 }
 0x67a   :  { %v4619_v1 = vrot.slane %v4523_v62, 2 }
 0x67b   :  { %v4726_v43 = vsel %vm4698_vm1, %v4684_v13, %v4712_v5 }
 0x67c   :  { %4740 = vst [vmem:[%s6939_s7 + $0x18] sm:$0x7f] %v4726_v43  ;;  %4558 = vmatmul.bf16.gmra.mxu1 %v6473_v38 }
 0x67e   :  { %v3965_v47 = vpop.f32.mrf.mxu2  ;;  %v4205_v17 = vpop.f32.mrf.mxu3 }
 0x67f   :  { %v4039_v39 = vrot.slane %v3965_v47, 2 }
 0x681   :  { %v4525_v29 = vpop.f32.mrf.mxu1  ;;  %v4040_v61 = vsel %vm1438_vm14, %v4038_v53, %v4039_v39 }
 0x682   :  { %v4620_v12 = vrot.slane %v4525_v29, 2  ;;  %v4068_v14 = vadd.f32 %v4040_v61, %v6790_v48 }
 0x684   :  { %v4621_v28 = vsel %vm1438_vm14, %v4619_v1, %v4620_v12 }
 0x685   :  { %v4667_v58 = vadd.f32 %v4621_v28, %v6765_v21 }
 0x686   :  { %v4207_v42 = vpop.f32.mrf.mxu3  ;;  %v3968_v10 = vpop.f32.mrf.mxu2 }
 0x687   :  { %v4685_v38 = vadd.f32 %v6818_v9, %v4667_v58  ;;  %v4224_v36 = vadd.f32 %v4207_v42, %v4068_v14 }
 0x689   :  { %vm4699_vm2 = vcmp.ge.f32.partialorder %v4685_v38, 0.0  ;;  %v4713_v34 = vmul.f32 0.1, %v4685_v38  ;;  %v6870_v19 = vadd.f32 %v4394_v0, %v4224_v36  ;;  %v4528_v16 = vpop.f32.mrf.mxu1 }
 0x68a   :  { %v4622_v32 = vrot.slane %v4528_v16, 2 }
 0x68b   :  { %v4727_v25 = vsel %vm4699_vm2, %v4685_v38, %v4713_v34 }
 0x68c   :  { %4741 = vst [vmem:[%s6939_s7 + $0x20] sm:$0x7f] %v4727_v25  ;;  %4563 = vmatmul.bf16.gmra.mxu1 %v6487_v45 }
 0x68e   :  { %v4209_v48 = vpop.f32.mrf.mxu3  ;;  %v3969_v21 = vpop.f32.mrf.mxu2 }
 0x691   :  { %v4530_v26 = vpop.f32.mrf.mxu1 }
 0x692   :  { %v4623_v7 = vrot.slane %v4530_v26, 2 }
 0x694   :  { %v4624_v52 = vsel %vm1438_vm14, %v4622_v32, %v4623_v7 }
 0x695   :  { %v4668_v22 = vadd.f32 %v4624_v52, %v6776_v3 }
 0x697   :  { %v4686_v40 = vadd.f32 %v6818_v9, %v4668_v22 }
 0x699   :  { %vm4700_vm3 = vcmp.ge.f32.partialorder %v4686_v40, 0.0  ;;  %v4714_v15 = vmul.f32 0.1, %v4686_v40  ;;  %v4533_v27 = vpop.f32.mrf.mxu1 }
 0x69a   :  { %v4625_v60 = vrot.slane %v4533_v27, 2 }
 0x69b   :  { %v4728_v11 = vsel %vm4700_vm3, %v4686_v40, %v4714_v15 }
 0x69c   :  { %4742 = vst [vmem:[%s6939_s7 + $0x28] sm:$0x7f] %v4728_v11  ;;  %4568 = vmatmul.bf16.gmra.mxu1 %v6497_v49 }
 0x6a1   :  { %v4535_v45 = vpop.f32.mrf.mxu1 }
 0x6a2   :  { %v4626_v50 = vrot.slane %v4535_v45, 2 }
 0x6a4   :  { %v4627_v37 = vsel %vm1438_vm14, %v4625_v60, %v4626_v50 }
 0x6a5   :  { %v4669_v20 = vadd.f32 %v4627_v37, %v6787_v56 }
 0x6a7   :  { %v4687_v3 = vadd.f32 %v6818_v9, %v4669_v20 }
 0x6a9   :  { %vm4701_vm4 = vcmp.ge.f32.partialorder %v4687_v3, 0.0  ;;  %v4715_v33 = vmul.f32 0.1, %v4687_v3  ;;  %v4538_v6 = vpop.f32.mrf.mxu1 }
 0x6ab   :  { %v4729_v41 = vsel %vm4701_vm4, %v4687_v3, %v4715_v33 }
 0x6ac   :  { %4743 = vst [vmem:[%s6939_s7 + $0x30] sm:$0x7f] %v4729_v41  ;;  %4573 = vmatmul.bf16.gmra.mxu1 %v6253_v30 }
 0x6b1   :  { %v4539_v49 = vpop.f32.mrf.mxu1 }
 0x6b9   :  { %v4541_v57 = vpop.f32.mrf.mxu1 }
 0x6c1   :  { %v4542_v23 = vpop.f32.mrf.mxu1 }
 0x6c9   :  { %v4544_v51 = vpop.f32.mrf.mxu1 }
 0x6ca   :  { %v4628_v59 = vrot.slane %v4544_v51, 2 }
 0x6d1   :  { %v4546_v2 = vpop.f32.mrf.mxu1 }
 0x6d2   :  { %v4629_v24 = vrot.slane %v4546_v2, 2 }
 0x6d4   :  { %v4630_v56 = vsel %vm1438_vm14, %v4628_v59, %v4629_v24 }
 0x6d5   :  { %v4670_v18 = vadd.f32 %v4630_v56, %v6801_v63 }
 0x6d7   :  { %v4688_v46 = vadd.f32 %v6818_v9, %v4670_v18 }
 0x6d9   :  { %vm4702_vm5 = vcmp.ge.f32.partialorder %v4688_v46, 0.0  ;;  %v4716_v8 = vmul.f32 0.1, %v4688_v46  ;;  %v4549_v13 = vpop.f32.mrf.mxu1 }
 0x6da   :  { %v4631_v5 = vrot.slane %v4549_v13, 2 }
 0x6db   :  { %v4730_v55 = vsel %vm4702_vm5, %v4688_v46, %v4716_v8 }
 0x6dc   :  { %4744 = vst [vmem:[%s6939_s7 + $0x38] sm:$0x7f] %v4730_v55 }
 0x6e1   :  { %v4551_v30 = vpop.f32.mrf.mxu1 }
 0x6e2   :  { %v4632_v62 = vrot.slane %v4551_v30, 2 }
 0x6e4   :  { %v4633_v43 = vsel %vm1438_vm14, %v4631_v5, %v4632_v62 }
 0x6e5   :  { %v4671_v47 = vadd.f32 %v4633_v43, %v6808_v54 }
 0x6e7   :  { %v4689_v17 = vadd.f32 %v6818_v9, %v4671_v47 }
 0x6e9   :  { %vm4703_vm6 = vcmp.ge.f32.partialorder %v4689_v17, 0.0  ;;  %v4717_v63 = vmul.f32 0.1, %v4689_v17  ;;  %v4554_v53 = vpop.f32.mrf.mxu1 }
 0x6ea   :  { %v4634_v61 = vrot.slane %v4554_v53, 2 }
 0x6eb   :  { %v4731_v39 = vsel %vm4703_vm6, %v4689_v17, %v4717_v63 }
 0x6ec   :  { %4745 = vst [vmem:[%s6939_s7 + $0x40] sm:$0x7f] %v4731_v39 }
 0x6f1   :  { %v4556_v29 = vpop.f32.mrf.mxu1 }
 0x6f2   :  { %v4635_v1 = vrot.slane %v4556_v29, 2 }
 0x6f4   :  { %v4636_v12 = vsel %vm1438_vm14, %v4634_v61, %v4635_v1 }
 0x6f5   :  { %v4672_v14 = vadd.f32 %v4636_v12, %v6823_v44 }
 0x6f7   :  { %v4690_v28 = vadd.f32 %v6818_v9, %v4672_v14 }
 0x6f9   :  { %vm4704_vm7 = vcmp.ge.f32.partialorder %v4690_v28, 0.0  ;;  %v4718_v54 = vmul.f32 0.1, %v4690_v28  ;;  %v4559_v58 = vpop.f32.mrf.mxu1 }
 0x6fa   :  { %v4637_v10 = vrot.slane %v4559_v58, 2 }
 0x6fb   :  { %v4732_v0 = vsel %vm4704_vm7, %v4690_v28, %v4718_v54 }
 0x6fc   :  { %4746 = vst [vmem:[%s6939_s7 + $0x48] sm:$0x7f] %v4732_v0 }
 0x701   :  { %v4561_v42 = vpop.f32.mrf.mxu1 }
 0x702   :  { %v4638_v38 = vrot.slane %v4561_v42, 2 }
 0x704   :  { %v4639_v36 = vsel %vm1438_vm14, %v4637_v10, %v4638_v38 }
 0x705   :  { %v4673_v34 = vadd.f32 %v4639_v36, %v6835_v4 }
 0x707   :  { %v4691_v16 = vadd.f32 %v6818_v9, %v4673_v34 }
 0x709   :  { %vm4705_vm8 = vcmp.ge.f32.partialorder %v4691_v16, 0.0  ;;  %v4719_v44 = vmul.f32 0.1, %v4691_v16  ;;  %v4564_v25 = vpop.f32.mrf.mxu1 }
 0x70a   :  { %v4640_v26 = vrot.slane %v4564_v25, 2 }
 0x70b   :  { %v4733_v48 = vsel %vm4705_vm8, %v4691_v16, %v4719_v44 }
 0x70c   :  { %4747 = vst [vmem:[%s6939_s7 + $0x50] sm:$0x7f] %v4733_v48 }
 0x711   :  { %v4566_v21 = vpop.f32.mrf.mxu1 }
 0x712   :  { %v4641_v32 = vrot.slane %v4566_v21, 2 }
 0x714   :  { %v4642_v7 = vsel %vm1438_vm14, %v4640_v26, %v4641_v32 }
 0x715   :  { %v4674_v52 = vadd.f32 %v4642_v7, %v6847_v31 }
 0x717   :  { %v4692_v22 = vadd.f32 %v6818_v9, %v4674_v52 }
 0x719   :  { %vm4706_vm9 = vcmp.ge.f32.partialorder %v4692_v22, 0.0  ;;  %v4720_v4 = vmul.f32 0.1, %v4692_v22  ;;  %v4569_v40 = vpop.f32.mrf.mxu1 }
 0x71a   :  { %v4643_v11 = vrot.slane %v4569_v40, 2 }
 0x71b   :  { %v4734_v15 = vsel %vm4706_vm9, %v4692_v22, %v4720_v4 }
 0x71c   :  { %4748 = vst [vmem:[%s6939_s7 + $0x58] sm:$0x7f] %v4734_v15 }
 0x721   :  { %v4571_v27 = vpop.f32.mrf.mxu1 }
 0x722   :  { %v4644_v45 = vrot.slane %v4571_v27, 2 }
 0x724   :  { %v4645_v60 = vsel %vm1438_vm14, %v4643_v11, %v4644_v45 }
 0x725   :  { %v4675_v50 = vadd.f32 %v4645_v60, %v6859_v35 }
 0x727   :  { %v4693_v37 = vadd.f32 %v6818_v9, %v4675_v50 }
 0x729   :  { %vm4707_vm10 = vcmp.ge.f32.partialorder %v4693_v37, 0.0  ;;  %v4721_v31 = vmul.f32 0.1, %v4693_v37  ;;  %v4574_v20 = vpop.f32.mrf.mxu1 }
 0x72a   :  { %v4646_v6 = vrot.slane %v4574_v20, 2 }
 0x72b   :  { %v4735_v3 = vsel %vm4707_vm10, %v4693_v37, %v4721_v31 }
 0x72c   :  { %4749 = vst [vmem:[%s6939_s7 + $0x60] sm:$0x7f] %v4735_v3 }
 0x731   :  { %v4576_v33 = vpop.f32.mrf.mxu1 }
 0x732   :  { %v4647_v41 = vrot.slane %v4576_v33, 2 }
 0x734   :  { %v4648_v49 = vsel %vm1438_vm14, %v4646_v6, %v4647_v41 }
 0x735   :  { %v4676_v57 = vadd.f32 %v4648_v49, %v6870_v19 }
 0x737   :  { %v4694_v23 = vadd.f32 %v6818_v9, %v4676_v57 }
 0x739   :  { %vm4708_vm11 = vcmp.ge.f32.partialorder %v4694_v23, 0.0  ;;  %v4722_v35 = vmul.f32 0.1, %v4694_v23 }
 0x73b   :  { %v4736_v51 = vsel %vm4708_vm11, %v4694_v23, %v4722_v35 }
 0x73c   :  { %4750 = vst [vmem:[%s6939_s7 + $0x68] sm:$0x7f] %v4736_v51 }
 0x73d   :  { %4755 = vsyncpa [#allocation5], 1 }
 0x73e   :  { %4756 = vsyncpa [#allocation7], 1 }
 0x73f   :  { %4757 = vsyncpa [#allocation10], 1 }

</bundles_post_ra>
